<compile_context>
chip_gen: v5e
topology: v5e:2x2
jax: 0.10.0
libtpu: 0.0.40
codegen_flags: <defaults>
</compile_context>

<pallas_src>
import math
import functools

import jax
import jax.numpy as jnp
from jax.experimental import pallas as pl
from jax.experimental.pallas import tpu as pltpu

_VMEM_LIMIT = 32 * 1024 * 1024  # explicit scoped-VMEM budget (safe on v5e/v6e/v7x)


# --------------------------------------------------------------------------- in-kernel math
def _mxu(a, b):
    """MXU matmul: bf16 operands, f32 accumulation."""
    return jnp.dot(a.astype(jnp.bfloat16), b.astype(jnp.bfloat16),
                   preferred_element_type=jnp.float32)


def _mxu_t(a, b):
    """a @ b.T with bf16 operands / f32 accumulation (no materialised transpose)."""
    return jax.lax.dot_general(a.astype(jnp.bfloat16), b.astype(jnp.bfloat16),
                               (((1,), (1,)), ((), ())),
                               preferred_element_type=jnp.float32)


def _dotf(a, b):
    return jnp.dot(a, b, preferred_element_type=jnp.float32)


def _dotf_t(a, b):
    return jax.lax.dot_general(a, b, (((1,), (1,)), ((), ())),
                               preferred_element_type=jnp.float32)


def _softmax_lastdim(s):
    # f32 elementwise (v5e has no bf16 VPU); denominator reciprocal on the EUP slot.
    s = s - jnp.max(s, axis=-1, keepdims=True)
    p = jnp.exp(s)
    return p * pl.reciprocal(jnp.sum(p, axis=-1, keepdims=True), approx=True)


def _layernorm(x, g, b, eps):
    mu = jnp.mean(x, axis=-1, keepdims=True)
    var = jnp.mean(jnp.square(x - mu), axis=-1, keepdims=True)
    return (x - mu) * jax.lax.rsqrt(var + eps) * g + b


# --------------------------------------------------------------------------- cross-attn K/V precompute
def _cross_kv_kernel(memp_ref, mem_ref, w_ref, b_ref, kv_ref, *, d_model):
    D = d_model
    memp = memp_ref[0]                      # (S, D) bf16 = memory + pos
    mem = mem_ref[0]                        # (S, D) bf16
    w = w_ref[0]                            # (D, 2D) bf16 = [Wk | Wv]
    bia = b_ref[0]                          # (1, 2D) f32
    k = _mxu(memp, w[:, :D]) + bia[:, :D]
    v = _mxu(mem, w[:, D:]) + bia[:, D:]
    kv_ref[0, 0] = jnp.concatenate([k, v], axis=-1).astype(kv_ref.dtype)


def precompute_cross_kv(mem_pos, memory, kv_w, kv_b, *, d_model):
    """Memory is loop-invariant: project cross-attn K|V for every layer once, up front."""
    NL = kv_w.shape[0]
    B, S, D = memory.shape
    kernel = functools.partial(_cross_kv_kernel, d_model=D)
    return pl.pallas_call(
        kernel,
        out_shape=jax.ShapeDtypeStruct((NL, B, S, 2 * D), jnp.bfloat16),
        grid=(NL, B),
        in_specs=[
            pl.BlockSpec((1, S, D), lambda l, b: (b, 0, 0)),
            pl.BlockSpec((1, S, D), lambda l, b: (b, 0, 0)),
            pl.BlockSpec((1, D, 2 * D), lambda l, b: (l, 0, 0)),
            pl.BlockSpec((1, 1, 2 * D), lambda l, b: (l, 0, 0)),
        ],
        out_specs=pl.BlockSpec((1, 1, S, 2 * D), lambda l, b: (l, b, 0, 0)),
        compiler_params=pltpu.CompilerParams(
            dimension_semantics=("parallel", "parallel"),
            vmem_limit_bytes=_VMEM_LIMIT),
    )(mem_pos, memory, kv_w, kv_b)


# --------------------------------------------------------------------------- fused decoder layer
def _decoder_layer_kernel(*refs, d_model, eps, l_tiled):
    (tgtq_ref, refq_ref, kv_ref, f_ref, ph_ref, rp_w_ref, rp_b_ref,
     sa_w_ref, sa_b_ref, ca_w_ref, ca_b_ref,
     ffn_w1_ref, ffn_b1_ref, ffn_w2_ref, ffn_b2_ref, ln_ref) = refs[:16]
    out_ref, inter_ref = refs[-2:]

    D = d_model
    tq = tgtq_ref[0]                        # (tl, D) f32 query-row tile
    rq = refq_ref[0]                        # (tl, 4) f32 reference points
    F = f_ref[...]                          # (4, 2D)  sine basis (hoisted)
    ph = ph_ref[...]                        # (1, 2D)  sine phase
    ln = ln_ref[...]                        # (8, D): ln1_g,b, ln2_g,b, ln3_g,b, norm_g,b
    rp_w = rp_w_ref[...]
    rp_b = rp_b_ref[...]

    def query_pos(r):
        # query_sine_embed in-kernel: cos(r @ F + phase) == gen_sineembed_for_position(r)
        qse = jnp.cos(_dotf(r, F) + ph)
        h = jnp.maximum(_mxu(qse, rp_w[:2 * D]) + rp_b[0:1], 0.0)
        return _mxu(h, rp_w[2 * D:]) + rp_b[1:2]

    qp_q = query_pos(rq)                    # (tl, D)
    if l_tiled:
        tk = refs[16][0]                    # full-L tgt for self-attn keys/values
        qp_k = query_pos(refs[17][0])
    else:
        tk = tq
        qp_k = qp_q

    # ---- self-attention (single-head substitute); 1/sqrt(D) folded into Wq at init ----
    sa_w = sa_w_ref[...]                    # (D, 4D) bf16 = [Wq' | Wk | Wv | Wo]
    sa_b = sa_b_ref[...]                    # (1, 4D) f32
    q = _mxu(tq + qp_q, sa_w[:, :D]) + sa_b[:, :D]
    k = _mxu(tk + qp_k, sa_w[:, D:2 * D]) + sa_b[:, D:2 * D]
    v = _mxu(tk, sa_w[:, 2 * D:3 * D]) + sa_b[:, 2 * D:3 * D]
    attn = _mxu(_softmax_lastdim(_mxu_t(q, k)), v)
    x = _layernorm(tq + _mxu(attn, sa_w[:, 3 * D:]) + sa_b[:, 3 * D:],
                   ln[0:1], ln[1:2], eps)

    # ---- cross-attention; K|V precomputed outside (memory is loop-invariant) ----
    # TODO(synk): at production S (10-20k) tile S with an 'arbitrary' grid axis and an
    # online-softmax accumulator instead of one (tl, S) score block.
    ca_w = ca_w_ref[...]                    # (D, 2D) bf16 = [Wq' | Wo]
    ca_b = ca_b_ref[...]                    # (1, 2D) f32
    kv = kv_ref[0]                          # (S, 2D) bf16 = [K | V]
    qc = _mxu(x + qp_q, ca_w[:, :D]) + ca_b[:, :D]
    attn = _mxu(_softmax_lastdim(_mxu_t(qc, kv[:, :D])), kv[:, D:])
    x = _layernorm(x + _mxu(attn, ca_w[:, D:]) + ca_b[:, D:], ln[2:3], ln[3:4], eps)

    # ---- FFN ----
    h = jnp.maximum(_mxu(x, ffn_w1_ref[...]) + ffn_b1_ref[...], 0.0)
    x = _layernorm(x + _mxu(h, ffn_w2_ref[...]) + ffn_b2_ref[...], ln[4:5], ln[5:6], eps)

    out_ref[0] = x.astype(out_ref.dtype)
    # module-level `norm` fused here -> intermediate output
    inter_ref[0] = _layernorm(x, ln[6:7], ln[7:8], eps).astype(inter_ref.dtype)


def fused_decoder_layer(lp, shared, tgt, refs4, ca_kv, *, d_model, eps=1e-5):
    B, L, D = tgt.shape
    S = ca_kv.shape[1]
    Q4 = refs4.shape[-1]
    Dff = lp["ffn_w1"].shape[1]
    tl = L if L <= 128 else (128 if L % 128 == 0 else L)
    nlt = L // tl
    l_tiled = nlt > 1

    def cst(shape):
        return pl.BlockSpec(tuple(shape), lambda b, l: (0,) * len(shape))

    in_specs = [
        pl.BlockSpec((1, tl, D), lambda b, l: (b, l, 0)),     # tgt query tile
        pl.BlockSpec((1, tl, Q4), lambda b, l: (b, l, 0)),    # refpoint query tile
        pl.BlockSpec((1, S, 2 * D), lambda b, l: (b, 0, 0)),  # precomputed cross K|V
        cst(shared["sin_f"].shape), cst(shared["sin_p"].shape),
        cst(shared["rp_w"].shape), cst(shared["rp_b"].shape),
        cst(lp["sa_w"].shape), cst(lp["sa_b"].shape),
        cst(lp["ca_w"].shape), cst(lp["ca_b"].shape),
        cst(lp["ffn_w1"].shape), cst(lp["ffn_b1"].shape),
        cst(lp["ffn_w2"].shape), cst(lp["ffn_b2"].shape),
        cst(lp["ln"].shape),
    ]
    args = [tgt, refs4, ca_kv,
            shared["sin_f"], shared["sin_p"], shared["rp_w"], shared["rp_b"],
            lp["sa_w"], lp["sa_b"], lp["ca_w"], lp["ca_b"],
            lp["ffn_w1"], lp["ffn_b1"], lp["ffn_w2"], lp["ffn_b2"], lp["ln"]]
    if l_tiled:
        # full-L copies needed for self-attention keys/values when queries are tiled
        in_specs += [pl.BlockSpec((1, L, D), lambda b, l: (b, 0, 0)),
                     pl.BlockSpec((1, L, Q4), lambda b, l: (b, 0, 0))]
        args += [tgt, refs4]

    kernel = functools.partial(_decoder_layer_kernel, d_model=D, eps=eps, l_tiled=l_tiled)
    out, inter = pl.pallas_call(
        kernel,
        out_shape=(jax.ShapeDtypeStruct((B, L, D), jnp.float32),
                   jax.ShapeDtypeStruct((B, L, D), jnp.float32)),
        grid=(B, nlt),
        in_specs=in_specs,
        out_specs=(pl.BlockSpec((1, tl, D), lambda b, l: (b, l, 0)),
                   pl.BlockSpec((1, tl, D), lambda b, l: (b, l, 0))),
        compiler_params=pltpu.CompilerParams(
            dimension_semantics=("parallel", "parallel"),
            vmem_limit_bytes=_VMEM_LIMIT),
    )(*args)
    return out, inter


# --------------------------------------------------------------------------- fused MLP heads
def _mlp_kernel(*refs, num_layers):
    x = refs[0][...]
    o_ref = refs[-1]
    for i in range(num_layers):
        W = refs[1 + 2 * i][...]
        b = refs[2 + 2 * i][...]
        x = _mxu(x, W) + b
        if i < num_layers - 1:
            x = jnp.maximum(x, 0.0)
    o_ref[...] = x.astype(o_ref.dtype)


def pallas_mlp(x, layers, n_out):
    """Whole MLP in one pallas_call; bf16 weights (hoisted), f32 accumulation, final layer
    zero-padded to a 128-lane multiple so the HBM store is unmasked (lane-dense); row-tiled
    'parallel' grid so both v7x TensorCores are usable at large M."""
    lead = x.shape[:-1]
    Kin = x.shape[-1]
    x2 = x.reshape(-1, Kin)
    M = x2.shape[0]
    Npad = layers[-1][0].shape[1]
    tm = 256 if M % 256 == 0 else M
    args = [x2]
    in_specs = [pl.BlockSpec((tm, Kin), lambda i: (i, 0))]
    for (W, b) in layers:
        args += [W, b]
        in_specs += [pl.BlockSpec(W.shape, lambda i: (0, 0)),
                     pl.BlockSpec(b.shape, lambda i: (0, 0))]
    kernel = functools.partial(_mlp_kernel, num_layers=len(layers))
    y = pl.pallas_call(
        kernel,
        out_shape=jax.ShapeDtypeStruct((M, Npad), jnp.float32),
        grid=(M // tm,),
        in_specs=in_specs,
        out_specs=pl.BlockSpec((tm, Npad), lambda i: (i, 0)),
        compiler_params=pltpu.CompilerParams(dimension_semantics=("parallel",),
                                             vmem_limit_bytes=_VMEM_LIMIT),
    )(*args)
    return y[:, :n_out].reshape(lead + (n_out,))


# --------------------------------------------------------------------------- keypoint refinement
def _kpt_refine_kernel(x_ref, kv_ref, wsqk_ref, bsqk_ref, wsv_ref, bsv_ref,
                       wq_ref, bq_ref, wk_ref, bk_ref, wv_ref, bv_ref, o_ref,
                       *, d_model):
    D = d_model
    x = x_ref[0]                            # (N, 2) f32
    kv = kv_ref[0]                          # (N, 2) f32
    # stage 1: emb_SQ | emb_SK packed (aligned), emb_SV separate; sqrt(N) folded into SQ
    wsqk = wsqk_ref[...]
    bsqk = bsqk_ref[...]
    sq = _dotf(x, wsqk[:, :D]) + bsqk[:, :D]
    sk = _dotf(x, wsqk[:, D:]) + bsqk[:, D:]
    sv = _dotf(x, wsv_ref[...]) + bsv_ref[...]                 # (N, 2)
    x2 = _dotf(_softmax_lastdim(_dotf_t(sq, sk)), sv)          # (N, 2)
    # stage 2: emb_Q on (x2+kv), emb_K on kv, emb_V (zero-padded to 128 lanes) on kv
    q = _dotf(x2 + kv, wq_ref[...]) + bq_ref[...]              # sqrt(N) folded in
    k = _dotf(kv, wk_ref[...]) + bk_ref[...]
    vpad = _dotf(kv, wv_ref[...]) + bv_ref[...]                # (N, 128)
    o_ref[0] = _dotf(_softmax_lastdim(_dotf_t(q, k)), vpad).astype(o_ref.dtype)


def pallas_kpt_refine(x_xy, kv_xy, kr, *, d_model):
    B, N, _ = x_xy.shape
    kernel = functools.partial(_kpt_refine_kernel, d_model=d_model)

    def cst(a):
        return pl.BlockSpec(a.shape, lambda b: (0,) * a.ndim)

    out = pl.pallas_call(
        kernel,
        out_shape=jax.ShapeDtypeStruct((B, N, 128), jnp.float32),
        grid=(B,),
        in_specs=[pl.BlockSpec((1, N, 2), lambda b: (b, 0, 0)),
                  pl.BlockSpec((1, N, 2), lambda b: (b, 0, 0)),
                  cst(kr["w_sqk"]), cst(kr["b_sqk"]),
                  cst(kr["w_sv"]), cst(kr["b_sv"]),
                  cst(kr["w_q"]), cst(kr["b_q"]),
                  cst(kr["w_k"]), cst(kr["b_k"]),
                  cst(kr["w_v"]), cst(kr["b_v"])],
        out_specs=pl.BlockSpec((1, N, 128), lambda b: (b, 0, 0)),
        compiler_params=pltpu.CompilerParams(dimension_semantics=("parallel",),
                                             vmem_limit_bytes=_VMEM_LIMIT),
    )(x_xy, kv_xy, kr["w_sqk"], kr["b_sqk"], kr["w_sv"], kr["b_sv"],
      kr["w_q"], kr["b_q"], kr["w_k"], kr["b_k"], kr["w_v"], kr["b_v"])
    return out[..., :2]


# --------------------------------------------------------------------------- plain-JAX helpers
def inverse_sigmoid(x, eps=1e-3):
    x = jnp.clip(x, 0.0, 1.0)
    x1 = jnp.clip(x, eps, None)
    x2 = jnp.clip(1.0 - x, eps, None)
    return jnp.log(x1 / x2)


def make_sineembed_basis(d_model, query_dim):
    """cos(ref @ F + phase) reproduces gen_sineembed_for_position exactly
    (blocks ordered [y, x, w, h], interleaved sin/cos within each block)."""
    half = d_model // 2
    scale = 2.0 * math.pi
    j = jnp.arange(half, dtype=jnp.float32)
    dim_t = 10000.0 ** (2.0 * jnp.floor(j / 2.0) / half)
    freqs = scale / dim_t
    coord_of_block = [1, 0, 2, 3][:query_dim]           # y, x, w, h -> ref columns
    F = jnp.zeros((query_dim, query_dim * half), jnp.float32)
    for blk, col in enumerate(coord_of_block):
        F = F.at[col, blk * half:(blk + 1) * half].set(freqs)
    phase = jnp.tile(jnp.where(jnp.arange(half) % 2 == 0, -0.5 * math.pi, 0.0),
                     (query_dim,)).reshape(1, -1).astype(jnp.float32)
    return F, phase


# --------------------------------------------------------------------------- forward
def transformer_decoder_forward(params, cfg, tgt, memory, refpoints_unsigmoid, pos, x_boxes):
    """Inputs use the PyTorch (seq-first) convention: tgt (L,B,D), memory (S,B,D),
    pos (S,B,D), refpoints_unsigmoid (L,B,4), x_boxes (B,G,2K).
    Returns (intermediate list, ref_points list), batch-first, like the PyTorch module."""
    d_model = cfg["d_model"]
    K = cfg["num_body_points"]
    G = cfg["num_group"]
    nbd = cfg["num_box_decoder_layers"]
    num_layers = cfg["num_layers"]

    # one-time layout change to batch-first (kills per-layer transposes)
    output = jnp.swapaxes(tgt, 0, 1)                                     # (B, L, D)
    memory_b = jnp.swapaxes(memory, 0, 1)                                # (B, S, D)
    pos_b = jnp.swapaxes(pos, 0, 1)                                      # (B, S, D)
    reference_points = jax.nn.sigmoid(jnp.swapaxes(refpoints_unsigmoid, 0, 1))  # (B, L, 4)
    B = output.shape[0]

    # hoisted: mem+pos once, cross-attn K/V for every layer in one pallas_call
    ca_kv_all = precompute_cross_kv((memory_b + pos_b).astype(jnp.bfloat16),
                                    memory_b.astype(jnp.bfloat16),
                                    params["ca_kv_w"], params["ca_kv_b"],
                                    d_model=d_model)                     # (nl, B, S, 2D) bf16

    intermediate = []
    ref_points = [reference_points]
    kpt_idx = jnp.asarray([i for i in range(G * (K + 1)) if i % (K + 1) != 0], jnp.int32)
    # eval mode: effect_num_dn = 0, inter_select_number = num_group

    for layer_id in range(num_layers):
        # TODO(synk): the real conditional-cross-attn layer also consumes
        # query_sine_embed * query_pos_sine_scale(output); the substituted DETR-style layer
        # does not, so that dead MLP/scaling is skipped.
        output, normed = fused_decoder_layer(
            params["layers"][layer_id], params, output, reference_points,
            ca_kv_all[layer_id], d_model=d_model)
        intermediate.append(normed)

        if layer_id < nbd:
            ref_unsig = inverse_sigmoid(reference_points)
            delta_unsig = pallas_mlp(output, params["bbox_embed"][layer_id], n_out=4)
            new_reference_points = jax.nn.sigmoid(delta_unsig + ref_unsig)

        if layer_id == nbd - 1:
            Wc, bc = params["class_embed"][layer_id]
            class_unselected = jnp.dot(output, Wc) + bc                  # single linear -> XLA
            scores = jnp.max(class_unselected, axis=-1)                  # (B, L)
            _, topk = jax.lax.top_k(scores, G)                           # (B, G)

            nr_box = jnp.take_along_axis(
                new_reference_points, jnp.broadcast_to(topk[:, :, None], (B, G, 4)), axis=1)
            out_box = jnp.take_along_axis(
                output, jnp.broadcast_to(topk[:, :, None], (B, G, d_model)), axis=1)
            out_kpt = out_box[:, :, None, :] + params["keypoint_embed"][None, None]  # (B,G,K,d)

            pe_idx = -1 if K == 17 else 0
            delta_xy = pallas_mlp(out_kpt, params["pose_embed"][pe_idx], n_out=2)
            keypoint_xy = jax.nn.sigmoid(inverse_sigmoid(nr_box[:, :, None, :2]) + delta_xy)
            kw = jax.nn.sigmoid(params["hw"])[None, None]                # (1,1,K,2)
            keypoint_wh = kw * nr_box[:, :, None, 2:]
            nr_kpt = jnp.concatenate([keypoint_xy, keypoint_wh], axis=-1)  # (B,G,K,4)

            x_boxes_k = nr_kpt.reshape(B, G * K, 4)
            xb = x_boxes[:, :, :2 * K]
            x_boxes_xy = jnp.concatenate(
                [xb[:, :, 0::2][..., None], xb[:, :, 1::2][..., None]],
                axis=-1).reshape(B, -1, 2)                               # (B, G*K, 2)
            kv_xy = x_boxes_k[:, :, :2]

            kxy = pallas_kpt_refine(x_boxes_xy, kv_xy, params["kr"], d_model=d_model)
            nr_kpt = jnp.concatenate([kxy.reshape(B, G, K, 2), nr_kpt[..., 2:]], axis=-1)

            new_reference_points = jnp.concatenate(
                [nr_box[:, :, None, :], nr_kpt], axis=2).reshape(B, G * (K + 1), 4)
            output = jnp.concatenate(
                [out_box[:, :, None, :], out_kpt], axis=2).reshape(B, G * (K + 1), d_model)
            # tgt_mask = tgt_mask2 (masks are None in this synthetic setup)

        if layer_id >= nbd:
            ref_unsig = inverse_sigmoid(reference_points)                # (B, G*(K+1), 4)
            out_box = output[:, 0::K + 1]                                # (B, G, d)
            delta = pallas_mlp(out_box, params["bbox_embed"][layer_id], n_out=4)
            nr_box = jax.nn.sigmoid(delta + ref_unsig[:, 0::K + 1])

            out_kpt = jnp.take(output, kpt_idx, axis=1)                  # (B, G*K, d)
            # fused pose_embed | pose_hw_embed head: output columns = [dxy(2) | dhw(2)]
            delta_fused = pallas_mlp(out_kpt, params["pose_fused"][layer_id - nbd], n_out=4)
            nr_kpt = jax.nn.sigmoid(jnp.take(ref_unsig, kpt_idx, axis=1) + delta_fused)
            new_reference_points = jnp.concatenate(
                [nr_box[:, :, None, :], nr_kpt.reshape(B, G, K, 4)],
                axis=2).reshape(B, G * (K + 1), 4)

        reference_points = jax.lax.stop_gradient(new_reference_points)
        ref_points.append(new_reference_points)

    return intermediate, ref_points


# --------------------------------------------------------------------------- params (synthetic)
class KeyGen:
    def __init__(self, key):
        self.key = key

    def __call__(self):
        self.key, sub = jax.random.split(self.key)
        return sub


def init_linear(kg, fan_in, fan_out):
    bound = 1.0 / math.sqrt(fan_in)
    W = jax.random.uniform(kg(), (fan_in, fan_out), jnp.float32, -bound, bound)
    b = jax.random.uniform(kg(), (fan_out,), jnp.float32, -bound, bound)
    return W, b


def init_mlp(kg, in_dim, hidden, out_dim, num_layers):
    dims = [in_dim] + [hidden] * (num_layers - 1) + [out_dim]
    return [init_linear(kg, dims[i], dims[i + 1]) for i in range(len(dims) - 1)]


def pack_mlp(layers):
    """Hoisted once: bf16 weights, (1,N) f32 biases, final layer zero-padded to a multiple
    of 128 output lanes (lane-dense stores)."""
    packed = []
    n = len(layers)
    for i, (W, b) in enumerate(layers):
        W = W.astype(jnp.float32)
        b = b.reshape(1, -1).astype(jnp.float32)
        if i == n - 1:
            pad = (-W.shape[1]) % 128
            if pad:
                W = jnp.pad(W, ((0, 0), (0, pad)))
                b = jnp.pad(b, ((0, 0), (0, pad)))
        packed.append((W.astype(jnp.bfloat16), b))
    return packed


def fuse_parallel_mlps(mlp_a, mlp_b):
    """Two same-depth MLPs sharing their input -> one block-diagonal MLP whose output is
    concat(out_a, out_b) (single launch, lane-denser output)."""
    fused = []
    for i, ((Wa, ba), (Wb, bb)) in enumerate(zip(mlp_a, mlp_b)):
        if i == 0:
            W = jnp.concatenate([Wa, Wb], axis=1)
        else:
            top = jnp.concatenate([Wa, jnp.zeros((Wa.shape[0], Wb.shape[1]), Wa.dtype)], axis=1)
            bot = jnp.concatenate([jnp.zeros((Wb.shape[0], Wa.shape[1]), Wb.dtype), Wb], axis=1)
            W = jnp.concatenate([top, bot], axis=0)
        b = jnp.concatenate([ba, bb], axis=0)
        fused.append((W, b))
    return fused


def init_decoder_layer_packed(kg, d, dff, norm_g, norm_b):
    # TODO(synk): decoder_layer is externally injected in PyTorch; a standard
    # (non-deformable) single-head DETR-style layer is substituted here.
    inv_sqrt_d = 1.0 / math.sqrt(d)
    (Wq, bq), (Wk, bk), (Wv, bv), (Wo, bo) = [init_linear(kg, d, d) for _ in range(4)]
    sa_w = jnp.concatenate([Wq * inv_sqrt_d, Wk, Wv, Wo], axis=1).astype(jnp.bfloat16)
    sa_b = jnp.concatenate([bq * inv_sqrt_d, bk, bv, bo]).reshape(1, -1).astype(jnp.float32)

    (Wq2, bq2), (Wk2, bk2), (Wv2, bv2), (Wo2, bo2) = [init_linear(kg, d, d) for _ in range(4)]
    ca_w = jnp.concatenate([Wq2 * inv_sqrt_d, Wo2], axis=1).astype(jnp.bfloat16)
    ca_b = jnp.concatenate([bq2 * inv_sqrt_d, bo2]).reshape(1, -1).astype(jnp.float32)
    ca_kv_w = jnp.concatenate([Wk2, Wv2], axis=1).astype(jnp.bfloat16)          # (d, 2d)
    ca_kv_b = jnp.concatenate([bk2, bv2]).reshape(1, -1).astype(jnp.float32)    # (1, 2d)

    W1, b1 = init_linear(kg, d, dff)
    W2, b2 = init_linear(kg, dff, d)
    ones = jnp.ones((d,), jnp.float32)
    zeros = jnp.zeros((d,), jnp.float32)
    ln = jnp.stack([ones, zeros, ones, zeros, ones, zeros, norm_g, norm_b]).astype(jnp.float32)
    return dict(sa_w=sa_w, sa_b=sa_b, ca_w=ca_w, ca_b=ca_b,
                ca_kv_w=ca_kv_w, ca_kv_b=ca_kv_b,
                ffn_w1=W1.astype(jnp.bfloat16), ffn_b1=b1.reshape(1, -1).astype(jnp.float32),
                ffn_w2=W2.astype(jnp.bfloat16), ffn_b2=b2.reshape(1, -1).astype(jnp.float32),
                ln=ln)


def init_params(cfg, key):
    kg = KeyGen(key)
    d = cfg["d_model"]
    dff = cfg["dim_feedforward"]
    K = cfg["num_body_points"]
    G = cfg["num_group"]
    num_layers = cfg["num_layers"]
    nbd = cfg["num_box_decoder_layers"]
    n_pose = max(num_layers - nbd, 1)

    norm_g = jnp.ones((d,), jnp.float32)
    norm_b = jnp.zeros((d,), jnp.float32)

    # _get_clones uses deepcopy => all decoder layers share identical initial values
    layer = init_decoder_layer_packed(kg, d, dff, norm_g, norm_b)
    layers = [layer] * num_layers
    ca_kv_w = jnp.stack([lp["ca_kv_w"] for lp in layers])                # (nl, d, 2d)
    ca_kv_b = jnp.stack([lp["ca_kv_b"] for lp in layers])                # (nl, 1, 2d)

    (rW1, rb1), (rW2, rb2) = init_mlp(kg, cfg["query_dim"] // 2 * d, d, d, 2)
    rp_w = jnp.concatenate([rW1, rW2], axis=0).astype(jnp.bfloat16)      # (3d, d)
    rp_b = jnp.stack([rb1, rb2]).astype(jnp.float32)                     # (2, d)

    sin_f, sin_p = make_sineembed_basis(d, cfg["query_dim"])

    bbox_embed = [pack_mlp(init_mlp(kg, d, d, 4, 3)) for _ in range(num_layers)]
    class_embed = []
    for _ in range(num_layers):
        Wc, bc = init_linear(kg, d, cfg["num_classes"])
        class_embed.append((Wc, bc))
    pose_raw = [init_mlp(kg, d, d, 2, 3) for _ in range(n_pose)]
    pose_hw_raw = [init_mlp(kg, d, d, 2, 3) for _ in range(n_pose)]
    pose_embed = [pack_mlp(m) for m in pose_raw]
    pose_fused = [pack_mlp(fuse_parallel_mlps(a, b)) for a, b in zip(pose_raw, pose_hw_raw)]

    # keypoint-refinement attentions; sqrt(N)=sqrt(G*K) scale folded into SQ/Q at init.
    # TODO(synk): the reference scales by q.shape[1]**0.5 which is the point count G*K
    # under the (bs, G*K, d) layout used here.
    s = math.sqrt(float(G * K))
    W_Q, b_Q = init_linear(kg, 2, d)
    W_K, b_K = init_linear(kg, 2, d)
    W_V, b_V = init_linear(kg, 2, 2)
    W_SQ, b_SQ = init_linear(kg, 2, d)
    W_SK, b_SK = init_linear(kg, 2, d)
    W_SV, b_SV = init_linear(kg, 2, 2)
    kr = dict(
        w_sqk=jnp.concatenate([W_SQ * s, W_SK], axis=1).astype(jnp.float32),
        b_sqk=jnp.concatenate([b_SQ * s, b_SK]).reshape(1, -1).astype(jnp.float32),
        w_sv=W_SV.astype(jnp.float32),
        b_sv=b_SV.reshape(1, -1).astype(jnp.float32),
        w_q=(W_Q * s).astype(jnp.float32),
        b_q=(b_Q * s).reshape(1, -1).astype(jnp.float32),
        w_k=W_K.astype(jnp.float32),
        b_k=b_K.reshape(1, -1).astype(jnp.float32),
        w_v=jnp.pad(W_V, ((0, 0), (0, 126))).astype(jnp.float32),        # lane-dense V output
        b_v=jnp.pad(b_V.reshape(1, -1), ((0, 0), (0, 126))).astype(jnp.float32),
    )

    return dict(
        layers=layers, ca_kv_w=ca_kv_w, ca_kv_b=ca_kv_b,
        rp_w=rp_w, rp_b=rp_b, sin_f=sin_f, sin_p=sin_p,
        bbox_embed=bbox_embed, class_embed=class_embed,
        pose_embed=pose_embed, pose_fused=pose_fused, kr=kr,
        hw=jax.random.normal(kg(), (K, 2), jnp.float32),
        keypoint_embed=jax.random.normal(kg(), (K, d), jnp.float32) * 0.1,
    )


# --------------------------------------------------------------------------- main
if __name__ == "__main__":
    cfg = dict(
        d_model=32, query_dim=4, num_layers=3, num_box_decoder_layers=2,
        num_body_points=3, num_group=2, num_classes=2, dim_feedforward=64,
    )
    nq, bs, S_mem = 10, 2, 16
    d = cfg["d_model"]
    K = cfg["num_body_points"]
    G = cfg["num_group"]

    key = jax.random.PRNGKey(0)
    k_tgt, k_mem, k_pos, k_ref, k_xb, k_par = jax.random.split(key, 6)
    tgt = jax.random.normal(k_tgt, (nq, bs, d), jnp.float32)
    memory = jax.random.normal(k_mem, (S_mem, bs, d), jnp.float32)
    pos = jax.random.normal(k_pos, (S_mem, bs, d), jnp.float32)
    refpoints_unsigmoid = jax.random.normal(k_ref, (nq, bs, 4), jnp.float32)
    x_boxes = jax.random.uniform(k_xb, (bs, G, 2 * K), jnp.float32)

    params = init_params(cfg, k_par)

    @jax.jit
    def run(params, tgt, memory, refpoints_unsigmoid, pos, x_boxes):
        return transformer_decoder_forward(params, cfg, tgt, memory,
                                           refpoints_unsigmoid, pos, x_boxes)

    intermediate, ref_points = run(params, tgt, memory, refpoints_unsigmoid, pos, x_boxes)

    for arr in list(intermediate) + list(ref_points):
        jax.block_until_ready(arr)

    print("KERNEL_OK")
</pallas_src>

<mosaic_0001>
module attributes {stable_mosaic.version = 11 : i64} {
  func.func @_cross_kv_kernel(%arg0: i32, %arg1: i32, %arg2: memref<1x16x32xbf16, #tpu.memory_space<vmem>>, %arg3: memref<1x16x32xbf16, #tpu.memory_space<vmem>>, %arg4: memref<1x32x64xbf16, #tpu.memory_space<vmem>>, %arg5: memref<1x1x64xf32, #tpu.memory_space<vmem>>, %arg6: memref<1x1x16x64xbf16, #tpu.memory_space<vmem>>) attributes {dimension_semantics = [#tpu.dimension_semantics<parallel>, #tpu.dimension_semantics<parallel>], iteration_bounds = array<i64: 3, 2>, scalar_prefetch = 0 : i64, scratch_operands = 0 : i64, tpu.core_type = #tpu.core_type<tc>, window_params = [{transform_indices = @transform_0, window_bounds = array<i64: 1, 16, 32>}, {transform_indices = @transform_1, window_bounds = array<i64: 1, 16, 32>}, {transform_indices = @transform_2, window_bounds = array<i64: 1, 32, 64>}, {transform_indices = @transform_3, window_bounds = array<i64: 1, 1, 64>}, {transform_indices = @transform_4, window_bounds = array<i64: 1, 1, 16, 64>}]} {
    %c0 = arith.constant 0 : index
    %c0_0 = arith.constant 0 : index
    %c0_1 = arith.constant 0 : index
    %0 = vector.load %arg2[%c0, %c0_0, %c0_1] : memref<1x16x32xbf16, #tpu.memory_space<vmem>>, vector<1x16x32xbf16>
    %1 = vector.shape_cast %0 : vector<1x16x32xbf16> to vector<16x32xbf16>
    %c0_2 = arith.constant 0 : index
    %c0_3 = arith.constant 0 : index
    %c0_4 = arith.constant 0 : index
    %2 = vector.load %arg3[%c0_2, %c0_3, %c0_4] : memref<1x16x32xbf16, #tpu.memory_space<vmem>>, vector<1x16x32xbf16>
    %3 = vector.shape_cast %2 : vector<1x16x32xbf16> to vector<16x32xbf16>
    %c0_5 = arith.constant 0 : index
    %c0_6 = arith.constant 0 : index
    %c0_7 = arith.constant 0 : index
    %4 = vector.load %arg4[%c0_5, %c0_6, %c0_7] : memref<1x32x64xbf16, #tpu.memory_space<vmem>>, vector<1x32x64xbf16>
    %5 = vector.shape_cast %4 : vector<1x32x64xbf16> to vector<32x64xbf16>
    %c0_8 = arith.constant 0 : index
    %c0_9 = arith.constant 0 : index
    %c0_10 = arith.constant 0 : index
    %6 = vector.load %arg5[%c0_8, %c0_9, %c0_10] : memref<1x1x64xf32, #tpu.memory_space<vmem>>, vector<1x1x64xf32>
    %7 = vector.shape_cast %6 : vector<1x1x64xf32> to vector<1x64xf32>
    %8 = vector.extract_strided_slice %5 {offsets = [0, 0], sizes = [32, 32], strides = [1, 1]} : vector<32x64xbf16> to vector<32x32xbf16>
    %cst = arith.constant dense<0.000000e+00> : vector<16x32xf32>
    %9 = tpu.matmul %1, %8, %cst {dimension_numbers = #tpu.dot_dimension_numbers<[1], [0], [0], [1], [0, 0, 1, 1], [], []>} : vector<16x32xbf16>, vector<32x32xbf16>, vector<16x32xf32> -> vector<16x32xf32>
    %10 = vector.extract_strided_slice %7 {offsets = [0, 0], sizes = [1, 32], strides = [1, 1]} : vector<1x64xf32> to vector<1x32xf32>
    %11 = vector.broadcast %10 : vector<1x32xf32> to vector<16x32xf32>
    %12 = arith.addf %9, %11 : vector<16x32xf32>
    %13 = vector.extract_strided_slice %5 {offsets = [0, 32], sizes = [32, 32], strides = [1, 1]} : vector<32x64xbf16> to vector<32x32xbf16>
    %cst_11 = arith.constant dense<0.000000e+00> : vector<16x32xf32>
    %14 = tpu.matmul %3, %13, %cst_11 {dimension_numbers = #tpu.dot_dimension_numbers<[1], [0], [0], [1], [0, 0, 1, 1], [], []>} : vector<16x32xbf16>, vector<32x32xbf16>, vector<16x32xf32> -> vector<16x32xf32>
    %15 = vector.extract_strided_slice %7 {offsets = [0, 32], sizes = [1, 32], strides = [1, 1]} : vector<1x64xf32> to vector<1x32xf32>
    %16 = vector.broadcast %15 : vector<1x32xf32> to vector<16x32xf32>
    %17 = arith.addf %14, %16 : vector<16x32xf32>
    %18 = tpu.concatenate %12, %17 in 1 : vector<16x32xf32>, vector<16x32xf32> -> vector<16x64xf32>
    %19 = arith.truncf %18 : vector<16x64xf32> to vector<16x64xbf16>
    %c0_12 = arith.constant 0 : index
    %c0_13 = arith.constant 0 : index
    %c0_14 = arith.constant 0 : index
    %c0_15 = arith.constant 0 : index
    %20 = vector.load %arg6[%c0_12, %c0_13, %c0_14, %c0_15] : memref<1x1x16x64xbf16, #tpu.memory_space<vmem>>, vector<1x1x16x64xbf16>
    %21 = vector.shape_cast %20 : vector<1x1x16x64xbf16> to vector<16x64xbf16>
    %22 = vector.shape_cast %19 : vector<16x64xbf16> to vector<1x1x16x64xbf16>
    tpu.vector_store %arg6[%c0_12, %c0_13, %c0_14, %c0_15], %22 {strides = array<i32>} : memref<1x1x16x64xbf16, #tpu.memory_space<vmem>>, vector<1x1x16x64xbf16>,
    return
  }
  func.func @transform_0(%arg0: i32, %arg1: i32) -> (i32, i32, i32) {
    %c0_i32 = arith.constant 0 : i32
    %c0_i32_0 = arith.constant 0 : i32
    %c0_i32_1 = arith.constant 0 : i32
    return %arg1, %c0_i32, %c0_i32_0 : i32, i32, i32
  }
  func.func @transform_1(%arg0: i32, %arg1: i32) -> (i32, i32, i32) {
    %c0_i32 = arith.constant 0 : i32
    %c0_i32_0 = arith.constant 0 : i32
    %c0_i32_1 = arith.constant 0 : i32
    return %arg1, %c0_i32, %c0_i32_0 : i32, i32, i32
  }
  func.func @transform_2(%arg0: i32, %arg1: i32) -> (i32, i32, i32) {
    %c0_i32 = arith.constant 0 : i32
    %c0_i32_0 = arith.constant 0 : i32
    %c0_i32_1 = arith.constant 0 : i32
    return %arg0, %c0_i32, %c0_i32_0 : i32, i32, i32
  }
  func.func @transform_3(%arg0: i32, %arg1: i32) -> (i32, i32, i32) {
    %c0_i32 = arith.constant 0 : i32
    %c0_i32_0 = arith.constant 0 : i32
    %c0_i32_1 = arith.constant 0 : i32
    return %arg0, %c0_i32, %c0_i32_0 : i32, i32, i32
  }
  func.func @transform_4(%arg0: i32, %arg1: i32) -> (i32, i32, i32, i32) {
    %c0_i32 = arith.constant 0 : i32
    %c0_i32_0 = arith.constant 0 : i32
    %c0_i32_1 = arith.constant 0 : i32
    return %arg0, %arg1, %c0_i32, %c0_i32_0 : i32, i32, i32, i32
  }
}

module attributes {stable_mosaic.version = 11 : i64} {
  func.func @_mlp_kernel(%arg0: i32, %arg1: memref<20x32xf32, #tpu.memory_space<vmem>>, %arg2: memref<32x32xbf16, #tpu.memory_space<vmem>>, %arg3: memref<1x32xf32, #tpu.memory_space<vmem>>, %arg4: memref<32x32xbf16, #tpu.memory_space<vmem>>, %arg5: memref<1x32xf32, #tpu.memory_space<vmem>>, %arg6: memref<32x128xbf16, #tpu.memory_space<vmem>>, %arg7: memref<1x128xf32, #tpu.memory_space<vmem>>, %arg8: memref<20x128xf32, #tpu.memory_space<vmem>>) attributes {dimension_semantics = [#tpu.dimension_semantics<parallel>], iteration_bounds = array<i64: 1>, scalar_prefetch = 0 : i64, scratch_operands = 0 : i64, tpu.core_type = #tpu.core_type<tc>, window_params = [{transform_indices = @transform_0, window_bounds = array<i64: 20, 32>}, {pipeline_mode = #tpu.pipeline_mode<synchronous>, transform_indices = @transform_1, window_bounds = array<i64: 32, 32>}, {pipeline_mode = #tpu.pipeline_mode<synchronous>, transform_indices = @transform_2, window_bounds = array<i64: 1, 32>}, {pipeline_mode = #tpu.pipeline_mode<synchronous>, transform_indices = @transform_3, window_bounds = array<i64: 32, 32>}, {pipeline_mode = #tpu.pipeline_mode<synchronous>, transform_indices = @transform_4, window_bounds = array<i64: 1, 32>}, {pipeline_mode = #tpu.pipeline_mode<synchronous>, transform_indices = @transform_5, window_bounds = array<i64: 32, 128>}, {pipeline_mode = #tpu.pipeline_mode<synchronous>, transform_indices = @transform_6, window_bounds = array<i64: 1, 128>}, {transform_indices = @transform_7, window_bounds = array<i64: 20, 128>}]} {
    %c0 = arith.constant 0 : index
    %c0_0 = arith.constant 0 : index
    %0 = vector.load %arg1[%c0, %c0_0] : memref<20x32xf32, #tpu.memory_space<vmem>>, vector<20x32xf32>
    %c0_1 = arith.constant 0 : index
    %c0_2 = arith.constant 0 : index
    %1 = vector.load %arg2[%c0_1, %c0_2] : memref<32x32xbf16, #tpu.memory_space<vmem>>, vector<32x32xbf16>
    %c0_3 = arith.constant 0 : index
    %c0_4 = arith.constant 0 : index
    %2 = vector.load %arg3[%c0_3, %c0_4] : memref<1x32xf32, #tpu.memory_space<vmem>>, vector<1x32xf32>
    %3 = arith.truncf %0 : vector<20x32xf32> to vector<20x32xbf16>
    %cst = arith.constant dense<0.000000e+00> : vector<20x32xf32>
    %4 = tpu.matmul %3, %1, %cst {dimension_numbers = #tpu.dot_dimension_numbers<[1], [0], [0], [1], [0, 0, 1, 1], [], []>} : vector<20x32xbf16>, vector<32x32xbf16>, vector<20x32xf32> -> vector<20x32xf32>
    %5 = vector.broadcast %2 : vector<1x32xf32> to vector<20x32xf32>
    %6 = arith.addf %4, %5 : vector<20x32xf32>
    %cst_5 = arith.constant 0.000000e+00 : f32
    %7 = vector.broadcast %cst_5 : f32 to vector<20x32xf32>
    %8 = arith.maximumf %6, %7 : vector<20x32xf32>
    %c0_6 = arith.constant 0 : index
    %c0_7 = arith.constant 0 : index
    %9 = vector.load %arg4[%c0_6, %c0_7] : memref<32x32xbf16, #tpu.memory_space<vmem>>, vector<32x32xbf16>
    %c0_8 = arith.constant 0 : index
    %c0_9 = arith.constant 0 : index
    %10 = vector.load %arg5[%c0_8, %c0_9] : memref<1x32xf32, #tpu.memory_space<vmem>>, vector<1x32xf32>
    %11 = arith.truncf %8 : vector<20x32xf32> to vector<20x32xbf16>
    %cst_10 = arith.constant dense<0.000000e+00> : vector<20x32xf32>
    %12 = tpu.matmul %11, %9, %cst_10 {dimension_numbers = #tpu.dot_dimension_numbers<[1], [0], [0], [1], [0, 0, 1, 1], [], []>} : vector<20x32xbf16>, vector<32x32xbf16>, vector<20x32xf32> -> vector<20x32xf32>
    %13 = vector.broadcast %10 : vector<1x32xf32> to vector<20x32xf32>
    %14 = arith.addf %12, %13 : vector<20x32xf32>
    %cst_11 = arith.constant 0.000000e+00 : f32
    %15 = vector.broadcast %cst_11 : f32 to vector<20x32xf32>
    %16 = arith.maximumf %14, %15 : vector<20x32xf32>
    %c0_12 = arith.constant 0 : index
    %c0_13 = arith.constant 0 : index
    %17 = vector.load %arg6[%c0_12, %c0_13] : memref<32x128xbf16, #tpu.memory_space<vmem>>, vector<32x128xbf16>
    %c0_14 = arith.constant 0 : index
    %c0_15 = arith.constant 0 : index
    %18 = vector.load %arg7[%c0_14, %c0_15] : memref<1x128xf32, #tpu.memory_space<vmem>>, vector<1x128xf32>
    %19 = arith.truncf %16 : vector<20x32xf32> to vector<20x32xbf16>
    %cst_16 = arith.constant dense<0.000000e+00> : vector<20x128xf32>
    %20 = tpu.matmul %19, %17, %cst_16 {dimension_numbers = #tpu.dot_dimension_numbers<[1], [0], [0], [1], [0, 0, 1, 1], [], []>} : vector<20x32xbf16>, vector<32x128xbf16>, vector<20x128xf32> -> vector<20x128xf32>
    %21 = vector.broadcast %18 : vector<1x128xf32> to vector<20x128xf32>
    %22 = arith.addf %20, %21 : vector<20x128xf32>
    %c0_17 = arith.constant 0 : index
    %c0_18 = arith.constant 0 : index
    %23 = vector.load %arg8[%c0_17, %c0_18] : memref<20x128xf32, #tpu.memory_space<vmem>>, vector<20x128xf32>
    tpu.vector_store %arg8[%c0_17, %c0_18], %22 {strides = array<i32>} : memref<20x128xf32, #tpu.memory_space<vmem>>, vector<20x128xf32>,
    return
  }
  func.func @transform_0(%arg0: i32) -> (i32, i32) {
    %c0_i32 = arith.constant 0 : i32
    %c0_i32_0 = arith.constant 0 : i32
    return %arg0, %c0_i32 : i32, i32
  }
  func.func @transform_1(%arg0: i32) -> (i32, i32) {
    %c0_i32 = arith.constant 0 : i32
    %c0_i32_0 = arith.constant 0 : i32
    %c0_i32_1 = arith.constant 0 : i32
    return %c0_i32, %c0_i32_0 : i32, i32
  }
  func.func @transform_2(%arg0: i32) -> (i32, i32) {
    %c0_i32 = arith.constant 0 : i32
    %c0_i32_0 = arith.constant 0 : i32
    %c0_i32_1 = arith.constant 0 : i32
    return %c0_i32, %c0_i32_0 : i32, i32
  }
  func.func @transform_3(%arg0: i32) -> (i32, i32) {
    %c0_i32 = arith.constant 0 : i32
    %c0_i32_0 = arith.constant 0 : i32
    %c0_i32_1 = arith.constant 0 : i32
    return %c0_i32, %c0_i32_0 : i32, i32
  }
  func.func @transform_4(%arg0: i32) -> (i32, i32) {
    %c0_i32 = arith.constant 0 : i32
    %c0_i32_0 = arith.constant 0 : i32
    %c0_i32_1 = arith.constant 0 : i32
    return %c0_i32, %c0_i32_0 : i32, i32
  }
  func.func @transform_5(%arg0: i32) -> (i32, i32) {
    %c0_i32 = arith.constant 0 : i32
    %c0_i32_0 = arith.constant 0 : i32
    %c0_i32_1 = arith.constant 0 : i32
    return %c0_i32, %c0_i32_0 : i32, i32
  }
  func.func @transform_6(%arg0: i32) -> (i32, i32) {
    %c0_i32 = arith.constant 0 : i32
    %c0_i32_0 = arith.constant 0 : i32
    %c0_i32_1 = arith.constant 0 : i32
    return %c0_i32, %c0_i32_0 : i32, i32
  }
  func.func @transform_7(%arg0: i32) -> (i32, i32) {
    %c0_i32 = arith.constant 0 : i32
    %c0_i32_0 = arith.constant 0 : i32
    return %arg0, %c0_i32 : i32, i32
  }
}

module attributes {stable_mosaic.version = 11 : i64} {
  func.func @_decoder_layer_kernel(%arg0: i32, %arg1: i32, %arg2: memref<1x10x32xf32, #tpu.memory_space<vmem>>, %arg3: memref<1x10x4xf32, #tpu.memory_space<vmem>>, %arg4: memref<1x16x64xbf16, #tpu.memory_space<vmem>>, %arg5: memref<4x64xf32, #tpu.memory_space<vmem>>, %arg6: memref<1x64xf32, #tpu.memory_space<vmem>>, %arg7: memref<96x32xbf16, #tpu.memory_space<vmem>>, %arg8: memref<2x32xf32, #tpu.memory_space<vmem>>, %arg9: memref<32x128xbf16, #tpu.memory_space<vmem>>, %arg10: memref<1x128xf32, #tpu.memory_space<vmem>>, %arg11: memref<32x64xbf16, #tpu.memory_space<vmem>>, %arg12: memref<1x64xf32, #tpu.memory_space<vmem>>, %arg13: memref<32x64xbf16, #tpu.memory_space<vmem>>, %arg14: memref<1x64xf32, #tpu.memory_space<vmem>>, %arg15: memref<64x32xbf16, #tpu.memory_space<vmem>>, %arg16: memref<1x32xf32, #tpu.memory_space<vmem>>, %arg17: memref<8x32xf32, #tpu.memory_space<vmem>>, %arg18: memref<1x10x32xf32, #tpu.memory_space<vmem>>, %arg19: memref<1x10x32xf32, #tpu.memory_space<vmem>>) attributes {dimension_semantics = [#tpu.dimension_semantics<parallel>, #tpu.dimension_semantics<parallel>], iteration_bounds = array<i64: 2, 1>, scalar_prefetch = 0 : i64, scratch_operands = 0 : i64, tpu.core_type = #tpu.core_type<tc>, window_params = [{transform_indices = @transform_0, window_bounds = array<i64: 1, 10, 32>}, {transform_indices = @transform_1, window_bounds = array<i64: 1, 10, 4>}, {transform_indices = @transform_2, window_bounds = array<i64: 1, 16, 64>}, {pipeline_mode = #tpu.pipeline_mode<synchronous>, transform_indices = @transform_3, window_bounds = array<i64: 4, 64>}, {pipeline_mode = #tpu.pipeline_mode<synchronous>, transform_indices = @transform_4, window_bounds = array<i64: 1, 64>}, {pipeline_mode = #tpu.pipeline_mode<synchronous>, transform_indices = @transform_5, window_bounds = array<i64: 96, 32>}, {pipeline_mode = #tpu.pipeline_mode<synchronous>, transform_indices = @transform_6, window_bounds = array<i64: 2, 32>}, {pipeline_mode = #tpu.pipeline_mode<synchronous>, transform_indices = @transform_7, window_bounds = array<i64: 32, 128>}, {pipeline_mode = #tpu.pipeline_mode<synchronous>, transform_indices = @transform_8, window_bounds = array<i64: 1, 128>}, {pipeline_mode = #tpu.pipeline_mode<synchronous>, transform_indices = @transform_9, window_bounds = array<i64: 32, 64>}, {pipeline_mode = #tpu.pipeline_mode<synchronous>, transform_indices = @transform_10, window_bounds = array<i64: 1, 64>}, {pipeline_mode = #tpu.pipeline_mode<synchronous>, transform_indices = @transform_11, window_bounds = array<i64: 32, 64>}, {pipeline_mode = #tpu.pipeline_mode<synchronous>, transform_indices = @transform_12, window_bounds = array<i64: 1, 64>}, {pipeline_mode = #tpu.pipeline_mode<synchronous>, transform_indices = @transform_13, window_bounds = array<i64: 64, 32>}, {pipeline_mode = #tpu.pipeline_mode<synchronous>, transform_indices = @transform_14, window_bounds = array<i64: 1, 32>}, {pipeline_mode = #tpu.pipeline_mode<synchronous>, transform_indices = @transform_15, window_bounds = array<i64: 8, 32>}, {transform_indices = @transform_16, window_bounds = array<i64: 1, 10, 32>}, {transform_indices = @transform_17, window_bounds = array<i64: 1, 10, 32>}]} {
    %c0 = arith.constant 0 : index
    %c0_0 = arith.constant 0 : index
    %c0_1 = arith.constant 0 : index
    %0 = vector.load %arg2[%c0, %c0_0, %c0_1] : memref<1x10x32xf32, #tpu.memory_space<vmem>>, vector<1x10x32xf32>
    %1 = vector.shape_cast %0 : vector<1x10x32xf32> to vector<10x32xf32>
    %c0_2 = arith.constant 0 : index
    %c0_3 = arith.constant 0 : index
    %c0_4 = arith.constant 0 : index
    %2 = vector.load %arg3[%c0_2, %c0_3, %c0_4] : memref<1x10x4xf32, #tpu.memory_space<vmem>>, vector<1x10x4xf32>
    %3 = vector.shape_cast %2 : vector<1x10x4xf32> to vector<10x4xf32>
    %c0_5 = arith.constant 0 : index
    %c0_6 = arith.constant 0 : index
    %4 = vector.load %arg5[%c0_5, %c0_6] : memref<4x64xf32, #tpu.memory_space<vmem>>, vector<4x64xf32>
    %c0_7 = arith.constant 0 : index
    %c0_8 = arith.constant 0 : index
    %5 = vector.load %arg6[%c0_7, %c0_8] : memref<1x64xf32, #tpu.memory_space<vmem>>, vector<1x64xf32>
    %c0_9 = arith.constant 0 : index
    %c0_10 = arith.constant 0 : index
    %6 = vector.load %arg17[%c0_9, %c0_10] : memref<8x32xf32, #tpu.memory_space<vmem>>, vector<8x32xf32>
    %c0_11 = arith.constant 0 : index
    %c0_12 = arith.constant 0 : index
    %7 = vector.load %arg7[%c0_11, %c0_12] : memref<96x32xbf16, #tpu.memory_space<vmem>>, vector<96x32xbf16>
    %c0_13 = arith.constant 0 : index
    %c0_14 = arith.constant 0 : index
    %8 = vector.load %arg8[%c0_13, %c0_14] : memref<2x32xf32, #tpu.memory_space<vmem>>, vector<2x32xf32>
    %cst = arith.constant dense<0.000000e+00> : vector<10x64xf32>
    %9 = tpu.matmul %3, %4, %cst {dimension_numbers = #tpu.dot_dimension_numbers<[1], [0], [0], [1], [0, 0, 1, 1], [], []>} : vector<10x4xf32>, vector<4x64xf32>, vector<10x64xf32> -> vector<10x64xf32>
    %10 = vector.broadcast %5 : vector<1x64xf32> to vector<10x64xf32>
    %11 = arith.addf %9, %10 : vector<10x64xf32>
    %12 = math.cos %11 : vector<10x64xf32>
    %13 = vector.extract_strided_slice %7 {offsets = [0, 0], sizes = [64, 32], strides = [1, 1]} : vector<96x32xbf16> to vector<64x32xbf16>
    %14 = arith.truncf %12 : vector<10x64xf32> to vector<10x64xbf16>
    %cst_15 = arith.constant dense<0.000000e+00> : vector<10x32xf32>
    %15 = tpu.matmul %14, %13, %cst_15 {dimension_numbers = #tpu.dot_dimension_numbers<[1], [0], [0], [1], [0, 0, 1, 1], [], []>} : vector<10x64xbf16>, vector<64x32xbf16>, vector<10x32xf32> -> vector<10x32xf32>
    %16 = vector.extract_strided_slice %8 {offsets = [0, 0], sizes = [1, 32], strides = [1, 1]} : vector<2x32xf32> to vector<1x32xf32>
    %17 = vector.broadcast %16 : vector<1x32xf32> to vector<10x32xf32>
    %18 = arith.addf %15, %17 : vector<10x32xf32>
    %cst_16 = arith.constant 0.000000e+00 : f32
    %19 = vector.broadcast %cst_16 : f32 to vector<10x32xf32>
    %20 = arith.maximumf %18, %19 : vector<10x32xf32>
    %21 = vector.extract_strided_slice %7 {offsets = [64, 0], sizes = [32, 32], strides = [1, 1]} : vector<96x32xbf16> to vector<32x32xbf16>
    %22 = arith.truncf %20 : vector<10x32xf32> to vector<10x32xbf16>
    %cst_17 = arith.constant dense<0.000000e+00> : vector<10x32xf32>
    %23 = tpu.matmul %22, %21, %cst_17 {dimension_numbers = #tpu.dot_dimension_numbers<[1], [0], [0], [1], [0, 0, 1, 1], [], []>} : vector<10x32xbf16>, vector<32x32xbf16>, vector<10x32xf32> -> vector<10x32xf32>
    %24 = vector.extract_strided_slice %8 {offsets = [1, 0], sizes = [1, 32], strides = [1, 1]} : vector<2x32xf32> to vector<1x32xf32>
    %25 = vector.broadcast %24 : vector<1x32xf32> to vector<10x32xf32>
    %26 = arith.addf %23, %25 : vector<10x32xf32>
    %c0_18 = arith.constant 0 : index
    %c0_19 = arith.constant 0 : index
    %27 = vector.load %arg9[%c0_18, %c0_19] : memref<32x128xbf16, #tpu.memory_space<vmem>>, vector<32x128xbf16>
    %c0_20 = arith.constant 0 : index
    %c0_21 = arith.constant 0 : index
    %28 = vector.load %arg10[%c0_20, %c0_21] : memref<1x128xf32, #tpu.memory_space<vmem>>, vector<1x128xf32>
    %29 = arith.addf %1, %26 : vector<10x32xf32>
    %30 = vector.extract_strided_slice %27 {offsets = [0, 0], sizes = [32, 32], strides = [1, 1]} : vector<32x128xbf16> to vector<32x32xbf16>
    %31 = arith.truncf %29 : vector<10x32xf32> to vector<10x32xbf16>
    %cst_22 = arith.constant dense<0.000000e+00> : vector<10x32xf32>
    %32 = tpu.matmul %31, %30, %cst_22 {dimension_numbers = #tpu.dot_dimension_numbers<[1], [0], [0], [1], [0, 0, 1, 1], [], []>} : vector<10x32xbf16>, vector<32x32xbf16>, vector<10x32xf32> -> vector<10x32xf32>
    %33 = vector.extract_strided_slice %28 {offsets = [0, 0], sizes = [1, 32], strides = [1, 1]} : vector<1x128xf32> to vector<1x32xf32>
    %34 = vector.broadcast %33 : vector<1x32xf32> to vector<10x32xf32>
    %35 = arith.addf %32, %34 : vector<10x32xf32>
    %36 = arith.addf %1, %26 : vector<10x32xf32>
    %37 = vector.extract_strided_slice %27 {offsets = [0, 32], sizes = [32, 32], strides = [1, 1]} : vector<32x128xbf16> to vector<32x32xbf16>
    %38 = arith.truncf %36 : vector<10x32xf32> to vector<10x32xbf16>
    %cst_23 = arith.constant dense<0.000000e+00> : vector<10x32xf32>
    %39 = tpu.matmul %38, %37, %cst_23 {dimension_numbers = #tpu.dot_dimension_numbers<[1], [0], [0], [1], [0, 0, 1, 1], [], []>} : vector<10x32xbf16>, vector<32x32xbf16>, vector<10x32xf32> -> vector<10x32xf32>
    %40 = vector.extract_strided_slice %28 {offsets = [0, 32], sizes = [1, 32], strides = [1, 1]} : vector<1x128xf32> to vector<1x32xf32>
    %41 = vector.broadcast %40 : vector<1x32xf32> to vector<10x32xf32>
    %42 = arith.addf %39, %41 : vector<10x32xf32>
    %43 = vector.extract_strided_slice %27 {offsets = [0, 64], sizes = [32, 32], strides = [1, 1]} : vector<32x128xbf16> to vector<32x32xbf16>
    %44 = arith.truncf %1 : vector<10x32xf32> to vector<10x32xbf16>
    %cst_24 = arith.constant dense<0.000000e+00> : vector<10x32xf32>
    %45 = tpu.matmul %44, %43, %cst_24 {dimension_numbers = #tpu.dot_dimension_numbers<[1], [0], [0], [1], [0, 0, 1, 1], [], []>} : vector<10x32xbf16>, vector<32x32xbf16>, vector<10x32xf32> -> vector<10x32xf32>
    %46 = vector.extract_strided_slice %28 {offsets = [0, 64], sizes = [1, 32], strides = [1, 1]} : vector<1x128xf32> to vector<1x32xf32>
    %47 = vector.broadcast %46 : vector<1x32xf32> to vector<10x32xf32>
    %48 = arith.addf %45, %47 : vector<10x32xf32>
    %49 = arith.truncf %35 : vector<10x32xf32> to vector<10x32xbf16>
    %50 = arith.truncf %42 : vector<10x32xf32> to vector<10x32xbf16>
    %cst_25 = arith.constant dense<0.000000e+00> : vector<10x10xf32>
    %51 = tpu.matmul %49, %50, %cst_25 {dimension_numbers = #tpu.dot_dimension_numbers<[1], [1], [0], [0], [0, 0, 1, 0], [], []>} : vector<10x32xbf16>, vector<10x32xbf16>, vector<10x10xf32> -> vector<10x10xf32>
    %cst_26 = arith.constant dense<0xFF800000> : vector<10xf32>
    %52 = vector.multi_reduction <maximumf>, %51, %cst_26 [1] : vector<10x10xf32> to vector<10xf32>
    %53 = vector.shape_cast %52 : vector<10xf32> to vector<10x1xf32>
    %54 = vector.broadcast %53 : vector<10x1xf32> to vector<10x10xf32>
    %55 = arith.subf %51, %54 : vector<10x10xf32>
    %56 = math.exp %55 : vector<10x10xf32>
    %cst_27 = arith.constant dense<0.000000e+00> : vector<10xf32>
    %57 = vector.multi_reduction <add>, %56, %cst_27 [1] : vector<10x10xf32> to vector<10xf32>
    %58 = vector.shape_cast %57 : vector<10xf32> to vector<10x1xf32>
    %59 = tpu.reciprocal %58 {approx = true} : vector<10x1xf32> -> vector<10x1xf32>
    %60 = vector.broadcast %59 : vector<10x1xf32> to vector<10x10xf32>
    %61 = arith.mulf %56, %60 : vector<10x10xf32>
    %62 = arith.truncf %61 : vector<10x10xf32> to vector<10x10xbf16>
    %63 = arith.truncf %48 : vector<10x32xf32> to vector<10x32xbf16>
    %cst_28 = arith.constant dense<0.000000e+00> : vector<10x32xf32>
    %64 = tpu.matmul %62, %63, %cst_28 {dimension_numbers = #tpu.dot_dimension_numbers<[1], [0], [0], [1], [0, 0, 1, 1], [], []>} : vector<10x10xbf16>, vector<10x32xbf16>, vector<10x32xf32> -> vector<10x32xf32>
    %65 = vector.extract_strided_slice %27 {offsets = [0, 96], sizes = [32, 32], strides = [1, 1]} : vector<32x128xbf16> to vector<32x32xbf16>
    %66 = arith.truncf %64 : vector<10x32xf32> to vector<10x32xbf16>
    %cst_29 = arith.constant dense<0.000000e+00> : vector<10x32xf32>
    %67 = tpu.matmul %66, %65, %cst_29 {dimension_numbers = #tpu.dot_dimension_numbers<[1], [0], [0], [1], [0, 0, 1, 1], [], []>} : vector<10x32xbf16>, vector<32x32xbf16>, vector<10x32xf32> -> vector<10x32xf32>
    %68 = arith.addf %1, %67 : vector<10x32xf32>
    %69 = vector.extract_strided_slice %28 {offsets = [0, 96], sizes = [1, 32], strides = [1, 1]} : vector<1x128xf32> to vector<1x32xf32>
    %70 = vector.broadcast %69 : vector<1x32xf32> to vector<10x32xf32>
    %71 = arith.addf %68, %70 : vector<10x32xf32>
    %72 = vector.extract_strided_slice %6 {offsets = [0, 0], sizes = [1, 32], strides = [1, 1]} : vector<8x32xf32> to vector<1x32xf32>
    %73 = vector.extract_strided_slice %6 {offsets = [1, 0], sizes = [1, 32], strides = [1, 1]} : vector<8x32xf32> to vector<1x32xf32>
    %cst_30 = arith.constant dense<0.000000e+00> : vector<10xf32>
    %74 = vector.multi_reduction <add>, %71, %cst_30 [1] : vector<10x32xf32> to vector<10xf32>
    %75 = vector.shape_cast %74 : vector<10xf32> to vector<10x1xf32>
    %cst_31 = arith.constant 3.200000e+01 : f32
    %76 = vector.broadcast %cst_31 : f32 to vector<10x1xf32>
    %77 = arith.divf %75, %76 : vector<10x1xf32>
    %78 = vector.broadcast %77 : vector<10x1xf32> to vector<10x32xf32>
    %79 = arith.subf %71, %78 : vector<10x32xf32>
    %80 = arith.mulf %79, %79 : vector<10x32xf32>
    %cst_32 = arith.constant dense<0.000000e+00> : vector<10xf32>
    %81 = vector.multi_reduction <add>, %80, %cst_32 [1] : vector<10x32xf32> to vector<10xf32>
    %82 = vector.shape_cast %81 : vector<10xf32> to vector<10x1xf32>
    %cst_33 = arith.constant 3.200000e+01 : f32
    %83 = vector.broadcast %cst_33 : f32 to vector<10x1xf32>
    %84 = arith.divf %82, %83 : vector<10x1xf32>
    %85 = vector.broadcast %77 : vector<10x1xf32> to vector<10x32xf32>
    %86 = arith.subf %71, %85 : vector<10x32xf32>
    %cst_34 = arith.constant 9.99999974E-6 : f32
    %87 = vector.broadcast %cst_34 : f32 to vector<10x1xf32>
    %88 = arith.addf %84, %87 : vector<10x1xf32>
    %89 = math.rsqrt %88 : vector<10x1xf32>
    %90 = vector.broadcast %89 : vector<10x1xf32> to vector<10x32xf32>
    %91 = arith.mulf %86, %90 : vector<10x32xf32>
    %92 = vector.broadcast %72 : vector<1x32xf32> to vector<10x32xf32>
    %93 = arith.mulf %91, %92 : vector<10x32xf32>
    %94 = vector.broadcast %73 : vector<1x32xf32> to vector<10x32xf32>
    %95 = arith.addf %93, %94 : vector<10x32xf32>
    %c0_35 = arith.constant 0 : index
    %c0_36 = arith.constant 0 : index
    %96 = vector.load %arg11[%c0_35, %c0_36] : memref<32x64xbf16, #tpu.memory_space<vmem>>, vector<32x64xbf16>
    %c0_37 = arith.constant 0 : index
    %c0_38 = arith.constant 0 : index
    %97 = vector.load %arg12[%c0_37, %c0_38] : memref<1x64xf32, #tpu.memory_space<vmem>>, vector<1x64xf32>
    %c0_39 = arith.constant 0 : index
    %c0_40 = arith.constant 0 : index
    %c0_41 = arith.constant 0 : index
    %98 = vector.load %arg4[%c0_39, %c0_40, %c0_41] : memref<1x16x64xbf16, #tpu.memory_space<vmem>>, vector<1x16x64xbf16>
    %99 = vector.shape_cast %98 : vector<1x16x64xbf16> to vector<16x64xbf16>
    %100 = arith.addf %95, %26 : vector<10x32xf32>
    %101 = vector.extract_strided_slice %96 {offsets = [0, 0], sizes = [32, 32], strides = [1, 1]} : vector<32x64xbf16> to vector<32x32xbf16>
    %102 = arith.truncf %100 : vector<10x32xf32> to vector<10x32xbf16>
    %cst_42 = arith.constant dense<0.000000e+00> : vector<10x32xf32>
    %103 = tpu.matmul %102, %101, %cst_42 {dimension_numbers = #tpu.dot_dimension_numbers<[1], [0], [0], [1], [0, 0, 1, 1], [], []>} : vector<10x32xbf16>, vector<32x32xbf16>, vector<10x32xf32> -> vector<10x32xf32>
    %104 = vector.extract_strided_slice %97 {offsets = [0, 0], sizes = [1, 32], strides = [1, 1]} : vector<1x64xf32> to vector<1x32xf32>
    %105 = vector.broadcast %104 : vector<1x32xf32> to vector<10x32xf32>
    %106 = arith.addf %103, %105 : vector<10x32xf32>
    %107 = vector.extract_strided_slice %99 {offsets = [0, 0], sizes = [16, 32], strides = [1, 1]} : vector<16x64xbf16> to vector<16x32xbf16>
    %108 = arith.truncf %106 : vector<10x32xf32> to vector<10x32xbf16>
    %cst_43 = arith.constant dense<0.000000e+00> : vector<10x16xf32>
    %109 = tpu.matmul %108, %107, %cst_43 {dimension_numbers = #tpu.dot_dimension_numbers<[1], [1], [0], [0], [0, 0, 1, 0], [], []>} : vector<10x32xbf16>, vector<16x32xbf16>, vector<10x16xf32> -> vector<10x16xf32>
    %cst_44 = arith.constant dense<0xFF800000> : vector<10xf32>
    %110 = vector.multi_reduction <maximumf>, %109, %cst_44 [1] : vector<10x16xf32> to vector<10xf32>
    %111 = vector.shape_cast %110 : vector<10xf32> to vector<10x1xf32>
    %112 = vector.broadcast %111 : vector<10x1xf32> to vector<10x16xf32>
    %113 = arith.subf %109, %112 : vector<10x16xf32>
    %114 = math.exp %113 : vector<10x16xf32>
    %cst_45 = arith.constant dense<0.000000e+00> : vector<10xf32>
    %115 = vector.multi_reduction <add>, %114, %cst_45 [1] : vector<10x16xf32> to vector<10xf32>
    %116 = vector.shape_cast %115 : vector<10xf32> to vector<10x1xf32>
    %117 = tpu.reciprocal %116 {approx = true} : vector<10x1xf32> -> vector<10x1xf32>
    %118 = vector.broadcast %117 : vector<10x1xf32> to vector<10x16xf32>
    %119 = arith.mulf %114, %118 : vector<10x16xf32>
    %120 = vector.extract_strided_slice %99 {offsets = [0, 32], sizes = [16, 32], strides = [1, 1]} : vector<16x64xbf16> to vector<16x32xbf16>
    %121 = arith.truncf %119 : vector<10x16xf32> to vector<10x16xbf16>
    %cst_46 = arith.constant dense<0.000000e+00> : vector<10x32xf32>
    %122 = tpu.matmul %121, %120, %cst_46 {dimension_numbers = #tpu.dot_dimension_numbers<[1], [0], [0], [1], [0, 0, 1, 1], [], []>} : vector<10x16xbf16>, vector<16x32xbf16>, vector<10x32xf32> -> vector<10x32xf32>
    %123 = vector.extract_strided_slice %96 {offsets = [0, 32], sizes = [32, 32], strides = [1, 1]} : vector<32x64xbf16> to vector<32x32xbf16>
    %124 = arith.truncf %122 : vector<10x32xf32> to vector<10x32xbf16>
    %cst_47 = arith.constant dense<0.000000e+00> : vector<10x32xf32>
    %125 = tpu.matmul %124, %123, %cst_47 {dimension_numbers = #tpu.dot_dimension_numbers<[1], [0], [0], [1], [0, 0, 1, 1], [], []>} : vector<10x32xbf16>, vector<32x32xbf16>, vector<10x32xf32> -> vector<10x32xf32>
    %126 = arith.addf %95, %125 : vector<10x32xf32>
    %127 = vector.extract_strided_slice %97 {offsets = [0, 32], sizes = [1, 32], strides = [1, 1]} : vector<1x64xf32> to vector<1x32xf32>
    %128 = vector.broadcast %127 : vector<1x32xf32> to vector<10x32xf32>
    %129 = arith.addf %126, %128 : vector<10x32xf32>
    %130 = vector.extract_strided_slice %6 {offsets = [2, 0], sizes = [1, 32], strides = [1, 1]} : vector<8x32xf32> to vector<1x32xf32>
    %131 = vector.extract_strided_slice %6 {offsets = [3, 0], sizes = [1, 32], strides = [1, 1]} : vector<8x32xf32> to vector<1x32xf32>
    %cst_48 = arith.constant dense<0.000000e+00> : vector<10xf32>
    %132 = vector.multi_reduction <add>, %129, %cst_48 [1] : vector<10x32xf32> to vector<10xf32>
    %133 = vector.shape_cast %132 : vector<10xf32> to vector<10x1xf32>
    %cst_49 = arith.constant 3.200000e+01 : f32
    %134 = vector.broadcast %cst_49 : f32 to vector<10x1xf32>
    %135 = arith.divf %133, %134 : vector<10x1xf32>
    %136 = vector.broadcast %135 : vector<10x1xf32> to vector<10x32xf32>
    %137 = arith.subf %129, %136 : vector<10x32xf32>
    %138 = arith.mulf %137, %137 : vector<10x32xf32>
    %cst_50 = arith.constant dense<0.000000e+00> : vector<10xf32>
    %139 = vector.multi_reduction <add>, %138, %cst_50 [1] : vector<10x32xf32> to vector<10xf32>
    %140 = vector.shape_cast %139 : vector<10xf32> to vector<10x1xf32>
    %cst_51 = arith.constant 3.200000e+01 : f32
    %141 = vector.broadcast %cst_51 : f32 to vector<10x1xf32>
    %142 = arith.divf %140, %141 : vector<10x1xf32>
    %143 = vector.broadcast %135 : vector<10x1xf32> to vector<10x32xf32>
    %144 = arith.subf %129, %143 : vector<10x32xf32>
    %cst_52 = arith.constant 9.99999974E-6 : f32
    %145 = vector.broadcast %cst_52 : f32 to vector<10x1xf32>
    %146 = arith.addf %142, %145 : vector<10x1xf32>
    %147 = math.rsqrt %146 : vector<10x1xf32>
    %148 = vector.broadcast %147 : vector<10x1xf32> to vector<10x32xf32>
    %149 = arith.mulf %144, %148 : vector<10x32xf32>
    %150 = vector.broadcast %130 : vector<1x32xf32> to vector<10x32xf32>
    %151 = arith.mulf %149, %150 : vector<10x32xf32>
    %152 = vector.broadcast %131 : vector<1x32xf32> to vector<10x32xf32>
    %153 = arith.addf %151, %152 : vector<10x32xf32>
    %c0_53 = arith.constant 0 : index
    %c0_54 = arith.constant 0 : index
    %154 = vector.load %arg13[%c0_53, %c0_54] : memref<32x64xbf16, #tpu.memory_space<vmem>>, vector<32x64xbf16>
    %155 = arith.truncf %153 : vector<10x32xf32> to vector<10x32xbf16>
    %cst_55 = arith.constant dense<0.000000e+00> : vector<10x64xf32>
    %156 = tpu.matmul %155, %154, %cst_55 {dimension_numbers = #tpu.dot_dimension_numbers<[1], [0], [0], [1], [0, 0, 1, 1], [], []>} : vector<10x32xbf16>, vector<32x64xbf16>, vector<10x64xf32> -> vector<10x64xf32>
    %c0_56 = arith.constant 0 : index
    %c0_57 = arith.constant 0 : index
    %157 = vector.load %arg14[%c0_56, %c0_57] : memref<1x64xf32, #tpu.memory_space<vmem>>, vector<1x64xf32>
    %158 = vector.broadcast %157 : vector<1x64xf32> to vector<10x64xf32>
    %159 = arith.addf %156, %158 : vector<10x64xf32>
    %cst_58 = arith.constant 0.000000e+00 : f32
    %160 = vector.broadcast %cst_58 : f32 to vector<10x64xf32>
    %161 = arith.maximumf %159, %160 : vector<10x64xf32>
    %c0_59 = arith.constant 0 : index
    %c0_60 = arith.constant 0 : index
    %162 = vector.load %arg15[%c0_59, %c0_60] : memref<64x32xbf16, #tpu.memory_space<vmem>>, vector<64x32xbf16>
    %163 = arith.truncf %161 : vector<10x64xf32> to vector<10x64xbf16>
    %cst_61 = arith.constant dense<0.000000e+00> : vector<10x32xf32>
    %164 = tpu.matmul %163, %162, %cst_61 {dimension_numbers = #tpu.dot_dimension_numbers<[1], [0], [0], [1], [0, 0, 1, 1], [], []>} : vector<10x64xbf16>, vector<64x32xbf16>, vector<10x32xf32> -> vector<10x32xf32>
    %165 = arith.addf %153, %164 : vector<10x32xf32>
    %c0_62 = arith.constant 0 : index
    %c0_63 = arith.constant 0 : index
    %166 = vector.load %arg16[%c0_62, %c0_63] : memref<1x32xf32, #tpu.memory_space<vmem>>, vector<1x32xf32>
    %167 = vector.broadcast %166 : vector<1x32xf32> to vector<10x32xf32>
    %168 = arith.addf %165, %167 : vector<10x32xf32>
    %169 = vector.extract_strided_slice %6 {offsets = [4, 0], sizes = [1, 32], strides = [1, 1]} : vector<8x32xf32> to vector<1x32xf32>
    %170 = vector.extract_strided_slice %6 {offsets = [5, 0], sizes = [1, 32], strides = [1, 1]} : vector<8x32xf32> to vector<1x32xf32>
    %cst_64 = arith.constant dense<0.000000e+00> : vector<10xf32>
    %171 = vector.multi_reduction <add>, %168, %cst_64 [1] : vector<10x32xf32> to vector<10xf32>
    %172 = vector.shape_cast %171 : vector<10xf32> to vector<10x1xf32>
    %cst_65 = arith.constant 3.200000e+01 : f32
    %173 = vector.broadcast %cst_65 : f32 to vector<10x1xf32>
    %174 = arith.divf %172, %173 : vector<10x1xf32>
    %175 = vector.broadcast %174 : vector<10x1xf32> to vector<10x32xf32>
    %176 = arith.subf %168, %175 : vector<10x32xf32>
    %177 = arith.mulf %176, %176 : vector<10x32xf32>
    %cst_66 = arith.constant dense<0.000000e+00> : vector<10xf32>
    %178 = vector.multi_reduction <add>, %177, %cst_66 [1] : vector<10x32xf32> to vector<10xf32>
    %179 = vector.shape_cast %178 : vector<10xf32> to vector<10x1xf32>
    %cst_67 = arith.constant 3.200000e+01 : f32
    %180 = vector.broadcast %cst_67 : f32 to vector<10x1xf32>
    %181 = arith.divf %179, %180 : vector<10x1xf32>
    %182 = vector.broadcast %174 : vector<10x1xf32> to vector<10x32xf32>
    %183 = arith.subf %168, %182 : vector<10x32xf32>
    %cst_68 = arith.constant 9.99999974E-6 : f32
    %184 = vector.broadcast %cst_68 : f32 to vector<10x1xf32>
    %185 = arith.addf %181, %184 : vector<10x1xf32>
    %186 = math.rsqrt %185 : vector<10x1xf32>
    %187 = vector.broadcast %186 : vector<10x1xf32> to vector<10x32xf32>
    %188 = arith.mulf %183, %187 : vector<10x32xf32>
    %189 = vector.broadcast %169 : vector<1x32xf32> to vector<10x32xf32>
    %190 = arith.mulf %188, %189 : vector<10x32xf32>
    %191 = vector.broadcast %170 : vector<1x32xf32> to vector<10x32xf32>
    %192 = arith.addf %190, %191 : vector<10x32xf32>
    %c0_69 = arith.constant 0 : index
    %c0_70 = arith.constant 0 : index
    %c0_71 = arith.constant 0 : index
    %193 = vector.load %arg18[%c0_69, %c0_70, %c0_71] : memref<1x10x32xf32, #tpu.memory_space<vmem>>, vector<1x10x32xf32>
    %194 = vector.shape_cast %193 : vector<1x10x32xf32> to vector<10x32xf32>
    %195 = vector.shape_cast %192 : vector<10x32xf32> to vector<1x10x32xf32>
    tpu.vector_store %arg18[%c0_69, %c0_70, %c0_71], %195 {strides = array<i32>} : memref<1x10x32xf32, #tpu.memory_space<vmem>>, vector<1x10x32xf32>,
    %196 = vector.extract_strided_slice %6 {offsets = [6, 0], sizes = [1, 32], strides = [1, 1]} : vector<8x32xf32> to vector<1x32xf32>
    %197 = vector.extract_strided_slice %6 {offsets = [7, 0], sizes = [1, 32], strides = [1, 1]} : vector<8x32xf32> to vector<1x32xf32>
    %cst_72 = arith.constant dense<0.000000e+00> : vector<10xf32>
    %198 = vector.multi_reduction <add>, %192, %cst_72 [1] : vector<10x32xf32> to vector<10xf32>
    %199 = vector.shape_cast %198 : vector<10xf32> to vector<10x1xf32>
    %cst_73 = arith.constant 3.200000e+01 : f32
    %200 = vector.broadcast %cst_73 : f32 to vector<10x1xf32>
    %201 = arith.divf %199, %200 : vector<10x1xf32>
    %202 = vector.broadcast %201 : vector<10x1xf32> to vector<10x32xf32>
    %203 = arith.subf %192, %202 : vector<10x32xf32>
    %204 = arith.mulf %203, %203 : vector<10x32xf32>
    %cst_74 = arith.constant dense<0.000000e+00> : vector<10xf32>
    %205 = vector.multi_reduction <add>, %204, %cst_74 [1] : vector<10x32xf32> to vector<10xf32>
    %206 = vector.shape_cast %205 : vector<10xf32> to vector<10x1xf32>
    %cst_75 = arith.constant 3.200000e+01 : f32
    %207 = vector.broadcast %cst_75 : f32 to vector<10x1xf32>
    %208 = arith.divf %206, %207 : vector<10x1xf32>
    %209 = vector.broadcast %201 : vector<10x1xf32> to vector<10x32xf32>
    %210 = arith.subf %192, %209 : vector<10x32xf32>
    %cst_76 = arith.constant 9.99999974E-6 : f32
    %211 = vector.broadcast %cst_76 : f32 to vector<10x1xf32>
    %212 = arith.addf %208, %211 : vector<10x1xf32>
    %213 = math.rsqrt %212 : vector<10x1xf32>
    %214 = vector.broadcast %213 : vector<10x1xf32> to vector<10x32xf32>
    %215 = arith.mulf %210, %214 : vector<10x32xf32>
    %216 = vector.broadcast %196 : vector<1x32xf32> to vector<10x32xf32>
    %217 = arith.mulf %215, %216 : vector<10x32xf32>
    %218 = vector.broadcast %197 : vector<1x32xf32> to vector<10x32xf32>
    %219 = arith.addf %217, %218 : vector<10x32xf32>
    %c0_77 = arith.constant 0 : index
    %c0_78 = arith.constant 0 : index
    %c0_79 = arith.constant 0 : index
    %220 = vector.load %arg19[%c0_77, %c0_78, %c0_79] : memref<1x10x32xf32, #tpu.memory_space<vmem>>, vector<1x10x32xf32>
    %221 = vector.shape_cast %220 : vector<1x10x32xf32> to vector<10x32xf32>
    %222 = vector.shape_cast %219 : vector<10x32xf32> to vector<1x10x32xf32>
    tpu.vector_store %arg19[%c0_77, %c0_78, %c0_79], %222 {strides = array<i32>} : memref<1x10x32xf32, #tpu.memory_space<vmem>>, vector<1x10x32xf32>,
    return
  }
  func.func @transform_0(%arg0: i32, %arg1: i32) -> (i32, i32, i32) {
    %c0_i32 = arith.constant 0 : i32
    %c0_i32_0 = arith.constant 0 : i32
    return %arg0, %arg1, %c0_i32 : i32, i32, i32
  }
  func.func @transform_1(%arg0: i32, %arg1: i32) -> (i32, i32, i32) {
    %c0_i32 = arith.constant 0 : i32
    %c0_i32_0 = arith.constant 0 : i32
    return %arg0, %arg1, %c0_i32 : i32, i32, i32
  }
  func.func @transform_2(%arg0: i32, %arg1: i32) -> (i32, i32, i32) {
    %c0_i32 = arith.constant 0 : i32
    %c0_i32_0 = arith.constant 0 : i32
    %c0_i32_1 = arith.constant 0 : i32
    return %arg0, %c0_i32, %c0_i32_0 : i32, i32, i32
  }
  func.func @transform_3(%arg0: i32, %arg1: i32) -> (i32, i32) {
    %c0_i32 = arith.constant 0 : i32
    %c0_i32_0 = arith.constant 0 : i32
    %c0_i32_1 = arith.constant 0 : i32
    return %c0_i32, %c0_i32_0 : i32, i32
  }
  func.func @transform_4(%arg0: i32, %arg1: i32) -> (i32, i32) {
    %c0_i32 = arith.constant 0 : i32
    %c0_i32_0 = arith.constant 0 : i32
    %c0_i32_1 = arith.constant 0 : i32
    return %c0_i32, %c0_i32_0 : i32, i32
  }
  func.func @transform_5(%arg0: i32, %arg1: i32) -> (i32, i32) {
    %c0_i32 = arith.constant 0 : i32
    %c0_i32_0 = arith.constant 0 : i32
    %c0_i32_1 = arith.constant 0 : i32
    return %c0_i32, %c0_i32_0 : i32, i32
  }
  func.func @transform_6(%arg0: i32, %arg1: i32) -> (i32, i32) {
    %c0_i32 = arith.constant 0 : i32
    %c0_i32_0 = arith.constant 0 : i32
    %c0_i32_1 = arith.constant 0 : i32
    return %c0_i32, %c0_i32_0 : i32, i32
  }
  func.func @transform_7(%arg0: i32, %arg1: i32) -> (i32, i32) {
    %c0_i32 = arith.constant 0 : i32
    %c0_i32_0 = arith.constant 0 : i32
    %c0_i32_1 = arith.constant 0 : i32
    return %c0_i32, %c0_i32_0 : i32, i32
  }
  func.func @transform_8(%arg0: i32, %arg1: i32) -> (i32, i32) {
    %c0_i32 = arith.constant 0 : i32
    %c0_i32_0 = arith.constant 0 : i32
    %c0_i32_1 = arith.constant 0 : i32
    return %c0_i32, %c0_i32_0 : i32, i32
  }
  func.func @transform_9(%arg0: i32, %arg1: i32) -> (i32, i32) {
    %c0_i32 = arith.constant 0 : i32
    %c0_i32_0 = arith.constant 0 : i32
    %c0_i32_1 = arith.constant 0 : i32
    return %c0_i32, %c0_i32_0 : i32, i32
  }
  func.func @transform_10(%arg0: i32, %arg1: i32) -> (i32, i32) {
    %c0_i32 = arith.constant 0 : i32
    %c0_i32_0 = arith.constant 0 : i32
    %c0_i32_1 = arith.constant 0 : i32
    return %c0_i32, %c0_i32_0 : i32, i32
  }
  func.func @transform_11(%arg0: i32, %arg1: i32) -> (i32, i32) {
    %c0_i32 = arith.constant 0 : i32
    %c0_i32_0 = arith.constant 0 : i32
    %c0_i32_1 = arith.constant 0 : i32
    return %c0_i32, %c0_i32_0 : i32, i32
  }
  func.func @transform_12(%arg0: i32, %arg1: i32) -> (i32, i32) {
    %c0_i32 = arith.constant 0 : i32
    %c0_i32_0 = arith.constant 0 : i32
    %c0_i32_1 = arith.constant 0 : i32
    return %c0_i32, %c0_i32_0 : i32, i32
  }
  func.func @transform_13(%arg0: i32, %arg1: i32) -> (i32, i32) {
    %c0_i32 = arith.constant 0 : i32
    %c0_i32_0 = arith.constant 0 : i32
    %c0_i32_1 = arith.constant 0 : i32
    return %c0_i32, %c0_i32_0 : i32, i32
  }
  func.func @transform_14(%arg0: i32, %arg1: i32) -> (i32, i32) {
    %c0_i32 = arith.constant 0 : i32
    %c0_i32_0 = arith.constant 0 : i32
    %c0_i32_1 = arith.constant 0 : i32
    return %c0_i32, %c0_i32_0 : i32, i32
  }
  func.func @transform_15(%arg0: i32, %arg1: i32) -> (i32, i32) {
    %c0_i32 = arith.constant 0 : i32
    %c0_i32_0 = arith.constant 0 : i32
    %c0_i32_1 = arith.constant 0 : i32
    return %c0_i32, %c0_i32_0 : i32, i32
  }
  func.func @transform_16(%arg0: i32, %arg1: i32) -> (i32, i32, i32) {
    %c0_i32 = arith.constant 0 : i32
    %c0_i32_0 = arith.constant 0 : i32
    return %arg0, %arg1, %c0_i32 : i32, i32, i32
  }
  func.func @transform_17(%arg0: i32, %arg1: i32) -> (i32, i32, i32) {
    %c0_i32 = arith.constant 0 : i32
    %c0_i32_0 = arith.constant 0 : i32
    return %arg0, %arg1, %c0_i32 : i32, i32, i32
  }
}

module attributes {stable_mosaic.version = 11 : i64} {
  func.func @_kpt_refine_kernel(%arg0: i32, %arg1: memref<1x6x2xf32, #tpu.memory_space<vmem>>, %arg2: memref<1x6x2xf32, #tpu.memory_space<vmem>>, %arg3: memref<2x64xf32, #tpu.memory_space<vmem>>, %arg4: memref<1x64xf32, #tpu.memory_space<vmem>>, %arg5: memref<2x2xf32, #tpu.memory_space<vmem>>, %arg6: memref<1x2xf32, #tpu.memory_space<vmem>>, %arg7: memref<2x32xf32, #tpu.memory_space<vmem>>, %arg8: memref<1x32xf32, #tpu.memory_space<vmem>>, %arg9: memref<2x32xf32, #tpu.memory_space<vmem>>, %arg10: memref<1x32xf32, #tpu.memory_space<vmem>>, %arg11: memref<2x128xf32, #tpu.memory_space<vmem>>, %arg12: memref<1x128xf32, #tpu.memory_space<vmem>>, %arg13: memref<1x6x128xf32, #tpu.memory_space<vmem>>) attributes {dimension_semantics = [#tpu.dimension_semantics<parallel>], iteration_bounds = array<i64: 2>, scalar_prefetch = 0 : i64, scratch_operands = 0 : i64, tpu.core_type = #tpu.core_type<tc>, window_params = [{transform_indices = @transform_0, window_bounds = array<i64: 1, 6, 2>}, {transform_indices = @transform_1, window_bounds = array<i64: 1, 6, 2>}, {pipeline_mode = #tpu.pipeline_mode<synchronous>, transform_indices = @transform_2, window_bounds = array<i64: 2, 64>}, {pipeline_mode = #tpu.pipeline_mode<synchronous>, transform_indices = @transform_3, window_bounds = array<i64: 1, 64>}, {pipeline_mode = #tpu.pipeline_mode<synchronous>, transform_indices = @transform_4, window_bounds = array<i64: 2, 2>}, {pipeline_mode = #tpu.pipeline_mode<synchronous>, transform_indices = @transform_5, window_bounds = array<i64: 1, 2>}, {pipeline_mode = #tpu.pipeline_mode<synchronous>, transform_indices = @transform_6, window_bounds = array<i64: 2, 32>}, {pipeline_mode = #tpu.pipeline_mode<synchronous>, transform_indices = @transform_7, window_bounds = array<i64: 1, 32>}, {pipeline_mode = #tpu.pipeline_mode<synchronous>, transform_indices = @transform_8, window_bounds = array<i64: 2, 32>}, {pipeline_mode = #tpu.pipeline_mode<synchronous>, transform_indices = @transform_9, window_bounds = array<i64: 1, 32>}, {pipeline_mode = #tpu.pipeline_mode<synchronous>, transform_indices = @transform_10, window_bounds = array<i64: 2, 128>}, {pipeline_mode = #tpu.pipeline_mode<synchronous>, transform_indices = @transform_11, window_bounds = array<i64: 1, 128>}, {transform_indices = @transform_12, window_bounds = array<i64: 1, 6, 128>}]} {
    %c0 = arith.constant 0 : index
    %c0_0 = arith.constant 0 : index
    %c0_1 = arith.constant 0 : index
    %0 = vector.load %arg1[%c0, %c0_0, %c0_1] : memref<1x6x2xf32, #tpu.memory_space<vmem>>, vector<1x6x2xf32>
    %1 = vector.shape_cast %0 : vector<1x6x2xf32> to vector<6x2xf32>
    %c0_2 = arith.constant 0 : index
    %c0_3 = arith.constant 0 : index
    %c0_4 = arith.constant 0 : index
    %2 = vector.load %arg2[%c0_2, %c0_3, %c0_4] : memref<1x6x2xf32, #tpu.memory_space<vmem>>, vector<1x6x2xf32>
    %3 = vector.shape_cast %2 : vector<1x6x2xf32> to vector<6x2xf32>
    %c0_5 = arith.constant 0 : index
    %c0_6 = arith.constant 0 : index
    %4 = vector.load %arg3[%c0_5, %c0_6] : memref<2x64xf32, #tpu.memory_space<vmem>>, vector<2x64xf32>
    %c0_7 = arith.constant 0 : index
    %c0_8 = arith.constant 0 : index
    %5 = vector.load %arg4[%c0_7, %c0_8] : memref<1x64xf32, #tpu.memory_space<vmem>>, vector<1x64xf32>
    %6 = vector.extract_strided_slice %4 {offsets = [0, 0], sizes = [2, 32], strides = [1, 1]} : vector<2x64xf32> to vector<2x32xf32>
    %cst = arith.constant dense<0.000000e+00> : vector<6x32xf32>
    %7 = tpu.matmul %1, %6, %cst {dimension_numbers = #tpu.dot_dimension_numbers<[1], [0], [0], [1], [0, 0, 1, 1], [], []>} : vector<6x2xf32>, vector<2x32xf32>, vector<6x32xf32> -> vector<6x32xf32>
    %8 = vector.extract_strided_slice %5 {offsets = [0, 0], sizes = [1, 32], strides = [1, 1]} : vector<1x64xf32> to vector<1x32xf32>
    %9 = vector.broadcast %8 : vector<1x32xf32> to vector<6x32xf32>
    %10 = arith.addf %7, %9 : vector<6x32xf32>
    %11 = vector.extract_strided_slice %4 {offsets = [0, 32], sizes = [2, 32], strides = [1, 1]} : vector<2x64xf32> to vector<2x32xf32>
    %cst_9 = arith.constant dense<0.000000e+00> : vector<6x32xf32>
    %12 = tpu.matmul %1, %11, %cst_9 {dimension_numbers = #tpu.dot_dimension_numbers<[1], [0], [0], [1], [0, 0, 1, 1], [], []>} : vector<6x2xf32>, vector<2x32xf32>, vector<6x32xf32> -> vector<6x32xf32>
    %13 = vector.extract_strided_slice %5 {offsets = [0, 32], sizes = [1, 32], strides = [1, 1]} : vector<1x64xf32> to vector<1x32xf32>
    %14 = vector.broadcast %13 : vector<1x32xf32> to vector<6x32xf32>
    %15 = arith.addf %12, %14 : vector<6x32xf32>
    %c0_10 = arith.constant 0 : index
    %c0_11 = arith.constant 0 : index
    %16 = vector.load %arg5[%c0_10, %c0_11] : memref<2x2xf32, #tpu.memory_space<vmem>>, vector<2x2xf32>
    %cst_12 = arith.constant dense<0.000000e+00> : vector<6x2xf32>
    %17 = tpu.matmul %1, %16, %cst_12 {dimension_numbers = #tpu.dot_dimension_numbers<[1], [0], [0], [1], [0, 0, 1, 1], [], []>} : vector<6x2xf32>, vector<2x2xf32>, vector<6x2xf32> -> vector<6x2xf32>
    %c0_13 = arith.constant 0 : index
    %c0_14 = arith.constant 0 : index
    %18 = vector.load %arg6[%c0_13, %c0_14] : memref<1x2xf32, #tpu.memory_space<vmem>>, vector<1x2xf32>
    %19 = vector.broadcast %18 : vector<1x2xf32> to vector<6x2xf32>
    %20 = arith.addf %17, %19 : vector<6x2xf32>
    %cst_15 = arith.constant dense<0.000000e+00> : vector<6x6xf32>
    %21 = tpu.matmul %10, %15, %cst_15 {dimension_numbers = #tpu.dot_dimension_numbers<[1], [1], [0], [0], [0, 0, 1, 0], [], []>} : vector<6x32xf32>, vector<6x32xf32>, vector<6x6xf32> -> vector<6x6xf32>
    %cst_16 = arith.constant dense<0xFF800000> : vector<6xf32>
    %22 = vector.multi_reduction <maximumf>, %21, %cst_16 [1] : vector<6x6xf32> to vector<6xf32>
    %23 = vector.shape_cast %22 : vector<6xf32> to vector<6x1xf32>
    %24 = vector.broadcast %23 : vector<6x1xf32> to vector<6x6xf32>
    %25 = arith.subf %21, %24 : vector<6x6xf32>
    %26 = math.exp %25 : vector<6x6xf32>
    %cst_17 = arith.constant dense<0.000000e+00> : vector<6xf32>
    %27 = vector.multi_reduction <add>, %26, %cst_17 [1] : vector<6x6xf32> to vector<6xf32>
    %28 = vector.shape_cast %27 : vector<6xf32> to vector<6x1xf32>
    %29 = tpu.reciprocal %28 {approx = true} : vector<6x1xf32> -> vector<6x1xf32>
    %30 = vector.broadcast %29 : vector<6x1xf32> to vector<6x6xf32>
    %31 = arith.mulf %26, %30 : vector<6x6xf32>
    %cst_18 = arith.constant dense<0.000000e+00> : vector<6x2xf32>
    %32 = tpu.matmul %31, %20, %cst_18 {dimension_numbers = #tpu.dot_dimension_numbers<[1], [0], [0], [1], [0, 0, 1, 1], [], []>} : vector<6x6xf32>, vector<6x2xf32>, vector<6x2xf32> -> vector<6x2xf32>
    %33 = arith.addf %32, %3 : vector<6x2xf32>
    %c0_19 = arith.constant 0 : index
    %c0_20 = arith.constant 0 : index
    %34 = vector.load %arg7[%c0_19, %c0_20] : memref<2x32xf32, #tpu.memory_space<vmem>>, vector<2x32xf32>
    %cst_21 = arith.constant dense<0.000000e+00> : vector<6x32xf32>
    %35 = tpu.matmul %33, %34, %cst_21 {dimension_numbers = #tpu.dot_dimension_numbers<[1], [0], [0], [1], [0, 0, 1, 1], [], []>} : vector<6x2xf32>, vector<2x32xf32>, vector<6x32xf32> -> vector<6x32xf32>
    %c0_22 = arith.constant 0 : index
    %c0_23 = arith.constant 0 : index
    %36 = vector.load %arg8[%c0_22, %c0_23] : memref<1x32xf32, #tpu.memory_space<vmem>>, vector<1x32xf32>
    %37 = vector.broadcast %36 : vector<1x32xf32> to vector<6x32xf32>
    %38 = arith.addf %35, %37 : vector<6x32xf32>
    %c0_24 = arith.constant 0 : index
    %c0_25 = arith.constant 0 : index
    %39 = vector.load %arg9[%c0_24, %c0_25] : memref<2x32xf32, #tpu.memory_space<vmem>>, vector<2x32xf32>
    %cst_26 = arith.constant dense<0.000000e+00> : vector<6x32xf32>
    %40 = tpu.matmul %3, %39, %cst_26 {dimension_numbers = #tpu.dot_dimension_numbers<[1], [0], [0], [1], [0, 0, 1, 1], [], []>} : vector<6x2xf32>, vector<2x32xf32>, vector<6x32xf32> -> vector<6x32xf32>
    %c0_27 = arith.constant 0 : index
    %c0_28 = arith.constant 0 : index
    %41 = vector.load %arg10[%c0_27, %c0_28] : memref<1x32xf32, #tpu.memory_space<vmem>>, vector<1x32xf32>
    %42 = vector.broadcast %41 : vector<1x32xf32> to vector<6x32xf32>
    %43 = arith.addf %40, %42 : vector<6x32xf32>
    %c0_29 = arith.constant 0 : index
    %c0_30 = arith.constant 0 : index
    %44 = vector.load %arg11[%c0_29, %c0_30] : memref<2x128xf32, #tpu.memory_space<vmem>>, vector<2x128xf32>
    %cst_31 = arith.constant dense<0.000000e+00> : vector<6x128xf32>
    %45 = tpu.matmul %3, %44, %cst_31 {dimension_numbers = #tpu.dot_dimension_numbers<[1], [0], [0], [1], [0, 0, 1, 1], [], []>} : vector<6x2xf32>, vector<2x128xf32>, vector<6x128xf32> -> vector<6x128xf32>
    %c0_32 = arith.constant 0 : index
    %c0_33 = arith.constant 0 : index
    %46 = vector.load %arg12[%c0_32, %c0_33] : memref<1x128xf32, #tpu.memory_space<vmem>>, vector<1x128xf32>
    %47 = vector.broadcast %46 : vector<1x128xf32> to vector<6x128xf32>
    %48 = arith.addf %45, %47 : vector<6x128xf32>
    %cst_34 = arith.constant dense<0.000000e+00> : vector<6x6xf32>
    %49 = tpu.matmul %38, %43, %cst_34 {dimension_numbers = #tpu.dot_dimension_numbers<[1], [1], [0], [0], [0, 0, 1, 0], [], []>} : vector<6x32xf32>, vector<6x32xf32>, vector<6x6xf32> -> vector<6x6xf32>
    %cst_35 = arith.constant dense<0xFF800000> : vector<6xf32>
    %50 = vector.multi_reduction <maximumf>, %49, %cst_35 [1] : vector<6x6xf32> to vector<6xf32>
    %51 = vector.shape_cast %50 : vector<6xf32> to vector<6x1xf32>
    %52 = vector.broadcast %51 : vector<6x1xf32> to vector<6x6xf32>
    %53 = arith.subf %49, %52 : vector<6x6xf32>
    %54 = math.exp %53 : vector<6x6xf32>
    %cst_36 = arith.constant dense<0.000000e+00> : vector<6xf32>
    %55 = vector.multi_reduction <add>, %54, %cst_36 [1] : vector<6x6xf32> to vector<6xf32>
    %56 = vector.shape_cast %55 : vector<6xf32> to vector<6x1xf32>
    %57 = tpu.reciprocal %56 {approx = true} : vector<6x1xf32> -> vector<6x1xf32>
    %58 = vector.broadcast %57 : vector<6x1xf32> to vector<6x6xf32>
    %59 = arith.mulf %54, %58 : vector<6x6xf32>
    %cst_37 = arith.constant dense<0.000000e+00> : vector<6x128xf32>
    %60 = tpu.matmul %59, %48, %cst_37 {dimension_numbers = #tpu.dot_dimension_numbers<[1], [0], [0], [1], [0, 0, 1, 1], [], []>} : vector<6x6xf32>, vector<6x128xf32>, vector<6x128xf32> -> vector<6x128xf32>
    %c0_38 = arith.constant 0 : index
    %c0_39 = arith.constant 0 : index
    %c0_40 = arith.constant 0 : index
    %61 = vector.load %arg13[%c0_38, %c0_39, %c0_40] : memref<1x6x128xf32, #tpu.memory_space<vmem>>, vector<1x6x128xf32>
    %62 = vector.shape_cast %61 : vector<1x6x128xf32> to vector<6x128xf32>
    %63 = vector.shape_cast %60 : vector<6x128xf32> to vector<1x6x128xf32>
    tpu.vector_store %arg13[%c0_38, %c0_39, %c0_40], %63 {strides = array<i32>} : memref<1x6x128xf32, #tpu.memory_space<vmem>>, vector<1x6x128xf32>,
    return
  }
  func.func @transform_0(%arg0: i32) -> (i32, i32, i32) {
    %c0_i32 = arith.constant 0 : i32
    %c0_i32_0 = arith.constant 0 : i32
    %c0_i32_1 = arith.constant 0 : i32
    return %arg0, %c0_i32, %c0_i32_0 : i32, i32, i32
  }
  func.func @transform_1(%arg0: i32) -> (i32, i32, i32) {
    %c0_i32 = arith.constant 0 : i32
    %c0_i32_0 = arith.constant 0 : i32
    %c0_i32_1 = arith.constant 0 : i32
    return %arg0, %c0_i32, %c0_i32_0 : i32, i32, i32
  }
  func.func @transform_2(%arg0: i32) -> (i32, i32) {
    %c0_i32 = arith.constant 0 : i32
    %c0_i32_0 = arith.constant 0 : i32
    %c0_i32_1 = arith.constant 0 : i32
    return %c0_i32, %c0_i32_0 : i32, i32
  }
  func.func @transform_3(%arg0: i32) -> (i32, i32) {
    %c0_i32 = arith.constant 0 : i32
    %c0_i32_0 = arith.constant 0 : i32
    %c0_i32_1 = arith.constant 0 : i32
    return %c0_i32, %c0_i32_0 : i32, i32
  }
  func.func @transform_4(%arg0: i32) -> (i32, i32) {
    %c0_i32 = arith.constant 0 : i32
    %c0_i32_0 = arith.constant 0 : i32
    %c0_i32_1 = arith.constant 0 : i32
    return %c0_i32, %c0_i32_0 : i32, i32
  }
  func.func @transform_5(%arg0: i32) -> (i32, i32) {
    %c0_i32 = arith.constant 0 : i32
    %c0_i32_0 = arith.constant 0 : i32
    %c0_i32_1 = arith.constant 0 : i32
    return %c0_i32, %c0_i32_0 : i32, i32
  }
  func.func @transform_6(%arg0: i32) -> (i32, i32) {
    %c0_i32 = arith.constant 0 : i32
    %c0_i32_0 = arith.constant 0 : i32
    %c0_i32_1 = arith.constant 0 : i32
    return %c0_i32, %c0_i32_0 : i32, i32
  }
  func.func @transform_7(%arg0: i32) -> (i32, i32) {
    %c0_i32 = arith.constant 0 : i32
    %c0_i32_0 = arith.constant 0 : i32
    %c0_i32_1 = arith.constant 0 : i32
    return %c0_i32, %c0_i32_0 : i32, i32
  }
  func.func @transform_8(%arg0: i32) -> (i32, i32) {
    %c0_i32 = arith.constant 0 : i32
    %c0_i32_0 = arith.constant 0 : i32
    %c0_i32_1 = arith.constant 0 : i32
    return %c0_i32, %c0_i32_0 : i32, i32
  }
  func.func @transform_9(%arg0: i32) -> (i32, i32) {
    %c0_i32 = arith.constant 0 : i32
    %c0_i32_0 = arith.constant 0 : i32
    %c0_i32_1 = arith.constant 0 : i32
    return %c0_i32, %c0_i32_0 : i32, i32
  }
  func.func @transform_10(%arg0: i32) -> (i32, i32) {
    %c0_i32 = arith.constant 0 : i32
    %c0_i32_0 = arith.constant 0 : i32
    %c0_i32_1 = arith.constant 0 : i32
    return %c0_i32, %c0_i32_0 : i32, i32
  }
  func.func @transform_11(%arg0: i32) -> (i32, i32) {
    %c0_i32 = arith.constant 0 : i32
    %c0_i32_0 = arith.constant 0 : i32
    %c0_i32_1 = arith.constant 0 : i32
    return %c0_i32, %c0_i32_0 : i32, i32
  }
  func.func @transform_12(%arg0: i32) -> (i32, i32, i32) {
    %c0_i32 = arith.constant 0 : i32
    %c0_i32_0 = arith.constant 0 : i32
    %c0_i32_1 = arith.constant 0 : i32
    return %arg0, %c0_i32, %c0_i32_0 : i32, i32, i32
  }
}

module attributes {stable_mosaic.version = 11 : i64} {
  func.func @_mlp_kernel(%arg0: i32, %arg1: memref<12x32xf32, #tpu.memory_space<vmem>>, %arg2: memref<32x32xbf16, #tpu.memory_space<vmem>>, %arg3: memref<1x32xf32, #tpu.memory_space<vmem>>, %arg4: memref<32x32xbf16, #tpu.memory_space<vmem>>, %arg5: memref<1x32xf32, #tpu.memory_space<vmem>>, %arg6: memref<32x128xbf16, #tpu.memory_space<vmem>>, %arg7: memref<1x128xf32, #tpu.memory_space<vmem>>, %arg8: memref<12x128xf32, #tpu.memory_space<vmem>>) attributes {dimension_semantics = [#tpu.dimension_semantics<parallel>], iteration_bounds = array<i64: 1>, scalar_prefetch = 0 : i64, scratch_operands = 0 : i64, tpu.core_type = #tpu.core_type<tc>, window_params = [{transform_indices = @transform_0, window_bounds = array<i64: 12, 32>}, {pipeline_mode = #tpu.pipeline_mode<synchronous>, transform_indices = @transform_1, window_bounds = array<i64: 32, 32>}, {pipeline_mode = #tpu.pipeline_mode<synchronous>, transform_indices = @transform_2, window_bounds = array<i64: 1, 32>}, {pipeline_mode = #tpu.pipeline_mode<synchronous>, transform_indices = @transform_3, window_bounds = array<i64: 32, 32>}, {pipeline_mode = #tpu.pipeline_mode<synchronous>, transform_indices = @transform_4, window_bounds = array<i64: 1, 32>}, {pipeline_mode = #tpu.pipeline_mode<synchronous>, transform_indices = @transform_5, window_bounds = array<i64: 32, 128>}, {pipeline_mode = #tpu.pipeline_mode<synchronous>, transform_indices = @transform_6, window_bounds = array<i64: 1, 128>}, {transform_indices = @transform_7, window_bounds = array<i64: 12, 128>}]} {
    %c0 = arith.constant 0 : index
    %c0_0 = arith.constant 0 : index
    %0 = vector.load %arg1[%c0, %c0_0] : memref<12x32xf32, #tpu.memory_space<vmem>>, vector<12x32xf32>
    %c0_1 = arith.constant 0 : index
    %c0_2 = arith.constant 0 : index
    %1 = vector.load %arg2[%c0_1, %c0_2] : memref<32x32xbf16, #tpu.memory_space<vmem>>, vector<32x32xbf16>
    %c0_3 = arith.constant 0 : index
    %c0_4 = arith.constant 0 : index
    %2 = vector.load %arg3[%c0_3, %c0_4] : memref<1x32xf32, #tpu.memory_space<vmem>>, vector<1x32xf32>
    %3 = arith.truncf %0 : vector<12x32xf32> to vector<12x32xbf16>
    %cst = arith.constant dense<0.000000e+00> : vector<12x32xf32>
    %4 = tpu.matmul %3, %1, %cst {dimension_numbers = #tpu.dot_dimension_numbers<[1], [0], [0], [1], [0, 0, 1, 1], [], []>} : vector<12x32xbf16>, vector<32x32xbf16>, vector<12x32xf32> -> vector<12x32xf32>
    %5 = vector.broadcast %2 : vector<1x32xf32> to vector<12x32xf32>
    %6 = arith.addf %4, %5 : vector<12x32xf32>
    %cst_5 = arith.constant 0.000000e+00 : f32
    %7 = vector.broadcast %cst_5 : f32 to vector<12x32xf32>
    %8 = arith.maximumf %6, %7 : vector<12x32xf32>
    %c0_6 = arith.constant 0 : index
    %c0_7 = arith.constant 0 : index
    %9 = vector.load %arg4[%c0_6, %c0_7] : memref<32x32xbf16, #tpu.memory_space<vmem>>, vector<32x32xbf16>
    %c0_8 = arith.constant 0 : index
    %c0_9 = arith.constant 0 : index
    %10 = vector.load %arg5[%c0_8, %c0_9] : memref<1x32xf32, #tpu.memory_space<vmem>>, vector<1x32xf32>
    %11 = arith.truncf %8 : vector<12x32xf32> to vector<12x32xbf16>
    %cst_10 = arith.constant dense<0.000000e+00> : vector<12x32xf32>
    %12 = tpu.matmul %11, %9, %cst_10 {dimension_numbers = #tpu.dot_dimension_numbers<[1], [0], [0], [1], [0, 0, 1, 1], [], []>} : vector<12x32xbf16>, vector<32x32xbf16>, vector<12x32xf32> -> vector<12x32xf32>
    %13 = vector.broadcast %10 : vector<1x32xf32> to vector<12x32xf32>
    %14 = arith.addf %12, %13 : vector<12x32xf32>
    %cst_11 = arith.constant 0.000000e+00 : f32
    %15 = vector.broadcast %cst_11 : f32 to vector<12x32xf32>
    %16 = arith.maximumf %14, %15 : vector<12x32xf32>
    %c0_12 = arith.constant 0 : index
    %c0_13 = arith.constant 0 : index
    %17 = vector.load %arg6[%c0_12, %c0_13] : memref<32x128xbf16, #tpu.memory_space<vmem>>, vector<32x128xbf16>
    %c0_14 = arith.constant 0 : index
    %c0_15 = arith.constant 0 : index
    %18 = vector.load %arg7[%c0_14, %c0_15] : memref<1x128xf32, #tpu.memory_space<vmem>>, vector<1x128xf32>
    %19 = arith.truncf %16 : vector<12x32xf32> to vector<12x32xbf16>
    %cst_16 = arith.constant dense<0.000000e+00> : vector<12x128xf32>
    %20 = tpu.matmul %19, %17, %cst_16 {dimension_numbers = #tpu.dot_dimension_numbers<[1], [0], [0], [1], [0, 0, 1, 1], [], []>} : vector<12x32xbf16>, vector<32x128xbf16>, vector<12x128xf32> -> vector<12x128xf32>
    %21 = vector.broadcast %18 : vector<1x128xf32> to vector<12x128xf32>
    %22 = arith.addf %20, %21 : vector<12x128xf32>
    %c0_17 = arith.constant 0 : index
    %c0_18 = arith.constant 0 : index
    %23 = vector.load %arg8[%c0_17, %c0_18] : memref<12x128xf32, #tpu.memory_space<vmem>>, vector<12x128xf32>
    tpu.vector_store %arg8[%c0_17, %c0_18], %22 {strides = array<i32>} : memref<12x128xf32, #tpu.memory_space<vmem>>, vector<12x128xf32>,
    return
  }
  func.func @transform_0(%arg0: i32) -> (i32, i32) {
    %c0_i32 = arith.constant 0 : i32
    %c0_i32_0 = arith.constant 0 : i32
    return %arg0, %c0_i32 : i32, i32
  }
  func.func @transform_1(%arg0: i32) -> (i32, i32) {
    %c0_i32 = arith.constant 0 : i32
    %c0_i32_0 = arith.constant 0 : i32
    %c0_i32_1 = arith.constant 0 : i32
    return %c0_i32, %c0_i32_0 : i32, i32
  }
  func.func @transform_2(%arg0: i32) -> (i32, i32) {
    %c0_i32 = arith.constant 0 : i32
    %c0_i32_0 = arith.constant 0 : i32
    %c0_i32_1 = arith.constant 0 : i32
    return %c0_i32, %c0_i32_0 : i32, i32
  }
  func.func @transform_3(%arg0: i32) -> (i32, i32) {
    %c0_i32 = arith.constant 0 : i32
    %c0_i32_0 = arith.constant 0 : i32
    %c0_i32_1 = arith.constant 0 : i32
    return %c0_i32, %c0_i32_0 : i32, i32
  }
  func.func @transform_4(%arg0: i32) -> (i32, i32) {
    %c0_i32 = arith.constant 0 : i32
    %c0_i32_0 = arith.constant 0 : i32
    %c0_i32_1 = arith.constant 0 : i32
    return %c0_i32, %c0_i32_0 : i32, i32
  }
  func.func @transform_5(%arg0: i32) -> (i32, i32) {
    %c0_i32 = arith.constant 0 : i32
    %c0_i32_0 = arith.constant 0 : i32
    %c0_i32_1 = arith.constant 0 : i32
    return %c0_i32, %c0_i32_0 : i32, i32
  }
  func.func @transform_6(%arg0: i32) -> (i32, i32) {
    %c0_i32 = arith.constant 0 : i32
    %c0_i32_0 = arith.constant 0 : i32
    %c0_i32_1 = arith.constant 0 : i32
    return %c0_i32, %c0_i32_0 : i32, i32
  }
  func.func @transform_7(%arg0: i32) -> (i32, i32) {
    %c0_i32 = arith.constant 0 : i32
    %c0_i32_0 = arith.constant 0 : i32
    return %arg0, %c0_i32 : i32, i32
  }
}

module attributes {stable_mosaic.version = 11 : i64} {
  func.func @_decoder_layer_kernel(%arg0: i32, %arg1: i32, %arg2: memref<1x8x32xf32, #tpu.memory_space<vmem>>, %arg3: memref<1x8x4xf32, #tpu.memory_space<vmem>>, %arg4: memref<1x16x64xbf16, #tpu.memory_space<vmem>>, %arg5: memref<4x64xf32, #tpu.memory_space<vmem>>, %arg6: memref<1x64xf32, #tpu.memory_space<vmem>>, %arg7: memref<96x32xbf16, #tpu.memory_space<vmem>>, %arg8: memref<2x32xf32, #tpu.memory_space<vmem>>, %arg9: memref<32x128xbf16, #tpu.memory_space<vmem>>, %arg10: memref<1x128xf32, #tpu.memory_space<vmem>>, %arg11: memref<32x64xbf16, #tpu.memory_space<vmem>>, %arg12: memref<1x64xf32, #tpu.memory_space<vmem>>, %arg13: memref<32x64xbf16, #tpu.memory_space<vmem>>, %arg14: memref<1x64xf32, #tpu.memory_space<vmem>>, %arg15: memref<64x32xbf16, #tpu.memory_space<vmem>>, %arg16: memref<1x32xf32, #tpu.memory_space<vmem>>, %arg17: memref<8x32xf32, #tpu.memory_space<vmem>>, %arg18: memref<1x8x32xf32, #tpu.memory_space<vmem>>, %arg19: memref<1x8x32xf32, #tpu.memory_space<vmem>>) attributes {dimension_semantics = [#tpu.dimension_semantics<parallel>, #tpu.dimension_semantics<parallel>], iteration_bounds = array<i64: 2, 1>, scalar_prefetch = 0 : i64, scratch_operands = 0 : i64, tpu.core_type = #tpu.core_type<tc>, window_params = [{transform_indices = @transform_0, window_bounds = array<i64: 1, 8, 32>}, {transform_indices = @transform_1, window_bounds = array<i64: 1, 8, 4>}, {transform_indices = @transform_2, window_bounds = array<i64: 1, 16, 64>}, {pipeline_mode = #tpu.pipeline_mode<synchronous>, transform_indices = @transform_3, window_bounds = array<i64: 4, 64>}, {pipeline_mode = #tpu.pipeline_mode<synchronous>, transform_indices = @transform_4, window_bounds = array<i64: 1, 64>}, {pipeline_mode = #tpu.pipeline_mode<synchronous>, transform_indices = @transform_5, window_bounds = array<i64: 96, 32>}, {pipeline_mode = #tpu.pipeline_mode<synchronous>, transform_indices = @transform_6, window_bounds = array<i64: 2, 32>}, {pipeline_mode = #tpu.pipeline_mode<synchronous>, transform_indices = @transform_7, window_bounds = array<i64: 32, 128>}, {pipeline_mode = #tpu.pipeline_mode<synchronous>, transform_indices = @transform_8, window_bounds = array<i64: 1, 128>}, {pipeline_mode = #tpu.pipeline_mode<synchronous>, transform_indices = @transform_9, window_bounds = array<i64: 32, 64>}, {pipeline_mode = #tpu.pipeline_mode<synchronous>, transform_indices = @transform_10, window_bounds = array<i64: 1, 64>}, {pipeline_mode = #tpu.pipeline_mode<synchronous>, transform_indices = @transform_11, window_bounds = array<i64: 32, 64>}, {pipeline_mode = #tpu.pipeline_mode<synchronous>, transform_indices = @transform_12, window_bounds = array<i64: 1, 64>}, {pipeline_mode = #tpu.pipeline_mode<synchronous>, transform_indices = @transform_13, window_bounds = array<i64: 64, 32>}, {pipeline_mode = #tpu.pipeline_mode<synchronous>, transform_indices = @transform_14, window_bounds = array<i64: 1, 32>}, {pipeline_mode = #tpu.pipeline_mode<synchronous>, transform_indices = @transform_15, window_bounds = array<i64: 8, 32>}, {transform_indices = @transform_16, window_bounds = array<i64: 1, 8, 32>}, {transform_indices = @transform_17, window_bounds = array<i64: 1, 8, 32>}]} {
    %c0 = arith.constant 0 : index
    %c0_0 = arith.constant 0 : index
    %c0_1 = arith.constant 0 : index
    %0 = vector.load %arg2[%c0, %c0_0, %c0_1] : memref<1x8x32xf32, #tpu.memory_space<vmem>>, vector<1x8x32xf32>
    %1 = vector.shape_cast %0 : vector<1x8x32xf32> to vector<8x32xf32>
    %c0_2 = arith.constant 0 : index
    %c0_3 = arith.constant 0 : index
    %c0_4 = arith.constant 0 : index
    %2 = vector.load %arg3[%c0_2, %c0_3, %c0_4] : memref<1x8x4xf32, #tpu.memory_space<vmem>>, vector<1x8x4xf32>
    %3 = vector.shape_cast %2 : vector<1x8x4xf32> to vector<8x4xf32>
    %c0_5 = arith.constant 0 : index
    %c0_6 = arith.constant 0 : index
    %4 = vector.load %arg5[%c0_5, %c0_6] : memref<4x64xf32, #tpu.memory_space<vmem>>, vector<4x64xf32>
    %c0_7 = arith.constant 0 : index
    %c0_8 = arith.constant 0 : index
    %5 = vector.load %arg6[%c0_7, %c0_8] : memref<1x64xf32, #tpu.memory_space<vmem>>, vector<1x64xf32>
    %c0_9 = arith.constant 0 : index
    %c0_10 = arith.constant 0 : index
    %6 = vector.load %arg17[%c0_9, %c0_10] : memref<8x32xf32, #tpu.memory_space<vmem>>, vector<8x32xf32>
    %c0_11 = arith.constant 0 : index
    %c0_12 = arith.constant 0 : index
    %7 = vector.load %arg7[%c0_11, %c0_12] : memref<96x32xbf16, #tpu.memory_space<vmem>>, vector<96x32xbf16>
    %c0_13 = arith.constant 0 : index
    %c0_14 = arith.constant 0 : index
    %8 = vector.load %arg8[%c0_13, %c0_14] : memref<2x32xf32, #tpu.memory_space<vmem>>, vector<2x32xf32>
    %cst = arith.constant dense<0.000000e+00> : vector<8x64xf32>
    %9 = tpu.matmul %3, %4, %cst {dimension_numbers = #tpu.dot_dimension_numbers<[1], [0], [0], [1], [0, 0, 1, 1], [], []>} : vector<8x4xf32>, vector<4x64xf32>, vector<8x64xf32> -> vector<8x64xf32>
    %10 = vector.broadcast %5 : vector<1x64xf32> to vector<8x64xf32>
    %11 = arith.addf %9, %10 : vector<8x64xf32>
    %12 = math.cos %11 : vector<8x64xf32>
    %13 = vector.extract_strided_slice %7 {offsets = [0, 0], sizes = [64, 32], strides = [1, 1]} : vector<96x32xbf16> to vector<64x32xbf16>
    %14 = arith.truncf %12 : vector<8x64xf32> to vector<8x64xbf16>
    %cst_15 = arith.constant dense<0.000000e+00> : vector<8x32xf32>
    %15 = tpu.matmul %14, %13, %cst_15 {dimension_numbers = #tpu.dot_dimension_numbers<[1], [0], [0], [1], [0, 0, 1, 1], [], []>} : vector<8x64xbf16>, vector<64x32xbf16>, vector<8x32xf32> -> vector<8x32xf32>
    %16 = vector.extract_strided_slice %8 {offsets = [0, 0], sizes = [1, 32], strides = [1, 1]} : vector<2x32xf32> to vector<1x32xf32>
    %17 = vector.broadcast %16 : vector<1x32xf32> to vector<8x32xf32>
    %18 = arith.addf %15, %17 : vector<8x32xf32>
    %cst_16 = arith.constant 0.000000e+00 : f32
    %19 = vector.broadcast %cst_16 : f32 to vector<8x32xf32>
    %20 = arith.maximumf %18, %19 : vector<8x32xf32>
    %21 = vector.extract_strided_slice %7 {offsets = [64, 0], sizes = [32, 32], strides = [1, 1]} : vector<96x32xbf16> to vector<32x32xbf16>
    %22 = arith.truncf %20 : vector<8x32xf32> to vector<8x32xbf16>
    %cst_17 = arith.constant dense<0.000000e+00> : vector<8x32xf32>
    %23 = tpu.matmul %22, %21, %cst_17 {dimension_numbers = #tpu.dot_dimension_numbers<[1], [0], [0], [1], [0, 0, 1, 1], [], []>} : vector<8x32xbf16>, vector<32x32xbf16>, vector<8x32xf32> -> vector<8x32xf32>
    %24 = vector.extract_strided_slice %8 {offsets = [1, 0], sizes = [1, 32], strides = [1, 1]} : vector<2x32xf32> to vector<1x32xf32>
    %25 = vector.broadcast %24 : vector<1x32xf32> to vector<8x32xf32>
    %26 = arith.addf %23, %25 : vector<8x32xf32>
    %c0_18 = arith.constant 0 : index
    %c0_19 = arith.constant 0 : index
    %27 = vector.load %arg9[%c0_18, %c0_19] : memref<32x128xbf16, #tpu.memory_space<vmem>>, vector<32x128xbf16>
    %c0_20 = arith.constant 0 : index
    %c0_21 = arith.constant 0 : index
    %28 = vector.load %arg10[%c0_20, %c0_21] : memref<1x128xf32, #tpu.memory_space<vmem>>, vector<1x128xf32>
    %29 = arith.addf %1, %26 : vector<8x32xf32>
    %30 = vector.extract_strided_slice %27 {offsets = [0, 0], sizes = [32, 32], strides = [1, 1]} : vector<32x128xbf16> to vector<32x32xbf16>
    %31 = arith.truncf %29 : vector<8x32xf32> to vector<8x32xbf16>
    %cst_22 = arith.constant dense<0.000000e+00> : vector<8x32xf32>
    %32 = tpu.matmul %31, %30, %cst_22 {dimension_numbers = #tpu.dot_dimension_numbers<[1], [0], [0], [1], [0, 0, 1, 1], [], []>} : vector<8x32xbf16>, vector<32x32xbf16>, vector<8x32xf32> -> vector<8x32xf32>
    %33 = vector.extract_strided_slice %28 {offsets = [0, 0], sizes = [1, 32], strides = [1, 1]} : vector<1x128xf32> to vector<1x32xf32>
    %34 = vector.broadcast %33 : vector<1x32xf32> to vector<8x32xf32>
    %35 = arith.addf %32, %34 : vector<8x32xf32>
    %36 = arith.addf %1, %26 : vector<8x32xf32>
    %37 = vector.extract_strided_slice %27 {offsets = [0, 32], sizes = [32, 32], strides = [1, 1]} : vector<32x128xbf16> to vector<32x32xbf16>
    %38 = arith.truncf %36 : vector<8x32xf32> to vector<8x32xbf16>
    %cst_23 = arith.constant dense<0.000000e+00> : vector<8x32xf32>
    %39 = tpu.matmul %38, %37, %cst_23 {dimension_numbers = #tpu.dot_dimension_numbers<[1], [0], [0], [1], [0, 0, 1, 1], [], []>} : vector<8x32xbf16>, vector<32x32xbf16>, vector<8x32xf32> -> vector<8x32xf32>
    %40 = vector.extract_strided_slice %28 {offsets = [0, 32], sizes = [1, 32], strides = [1, 1]} : vector<1x128xf32> to vector<1x32xf32>
    %41 = vector.broadcast %40 : vector<1x32xf32> to vector<8x32xf32>
    %42 = arith.addf %39, %41 : vector<8x32xf32>
    %43 = vector.extract_strided_slice %27 {offsets = [0, 64], sizes = [32, 32], strides = [1, 1]} : vector<32x128xbf16> to vector<32x32xbf16>
    %44 = arith.truncf %1 : vector<8x32xf32> to vector<8x32xbf16>
    %cst_24 = arith.constant dense<0.000000e+00> : vector<8x32xf32>
    %45 = tpu.matmul %44, %43, %cst_24 {dimension_numbers = #tpu.dot_dimension_numbers<[1], [0], [0], [1], [0, 0, 1, 1], [], []>} : vector<8x32xbf16>, vector<32x32xbf16>, vector<8x32xf32> -> vector<8x32xf32>
    %46 = vector.extract_strided_slice %28 {offsets = [0, 64], sizes = [1, 32], strides = [1, 1]} : vector<1x128xf32> to vector<1x32xf32>
    %47 = vector.broadcast %46 : vector<1x32xf32> to vector<8x32xf32>
    %48 = arith.addf %45, %47 : vector<8x32xf32>
    %49 = arith.truncf %35 : vector<8x32xf32> to vector<8x32xbf16>
    %50 = arith.truncf %42 : vector<8x32xf32> to vector<8x32xbf16>
    %cst_25 = arith.constant dense<0.000000e+00> : vector<8x8xf32>
    %51 = tpu.matmul %49, %50, %cst_25 {dimension_numbers = #tpu.dot_dimension_numbers<[1], [1], [0], [0], [0, 0, 1, 0], [], []>} : vector<8x32xbf16>, vector<8x32xbf16>, vector<8x8xf32> -> vector<8x8xf32>
    %cst_26 = arith.constant dense<0xFF800000> : vector<8xf32>
    %52 = vector.multi_reduction <maximumf>, %51, %cst_26 [1] : vector<8x8xf32> to vector<8xf32>
    %53 = vector.shape_cast %52 : vector<8xf32> to vector<8x1xf32>
    %54 = vector.broadcast %53 : vector<8x1xf32> to vector<8x8xf32>
    %55 = arith.subf %51, %54 : vector<8x8xf32>
    %56 = math.exp %55 : vector<8x8xf32>
    %cst_27 = arith.constant dense<0.000000e+00> : vector<8xf32>
    %57 = vector.multi_reduction <add>, %56, %cst_27 [1] : vector<8x8xf32> to vector<8xf32>
    %58 = vector.shape_cast %57 : vector<8xf32> to vector<8x1xf32>
    %59 = tpu.reciprocal %58 {approx = true} : vector<8x1xf32> -> vector<8x1xf32>
    %60 = vector.broadcast %59 : vector<8x1xf32> to vector<8x8xf32>
    %61 = arith.mulf %56, %60 : vector<8x8xf32>
    %62 = arith.truncf %61 : vector<8x8xf32> to vector<8x8xbf16>
    %63 = arith.truncf %48 : vector<8x32xf32> to vector<8x32xbf16>
    %cst_28 = arith.constant dense<0.000000e+00> : vector<8x32xf32>
    %64 = tpu.matmul %62, %63, %cst_28 {dimension_numbers = #tpu.dot_dimension_numbers<[1], [0], [0], [1], [0, 0, 1, 1], [], []>} : vector<8x8xbf16>, vector<8x32xbf16>, vector<8x32xf32> -> vector<8x32xf32>
    %65 = vector.extract_strided_slice %27 {offsets = [0, 96], sizes = [32, 32], strides = [1, 1]} : vector<32x128xbf16> to vector<32x32xbf16>
    %66 = arith.truncf %64 : vector<8x32xf32> to vector<8x32xbf16>
    %cst_29 = arith.constant dense<0.000000e+00> : vector<8x32xf32>
    %67 = tpu.matmul %66, %65, %cst_29 {dimension_numbers = #tpu.dot_dimension_numbers<[1], [0], [0], [1], [0, 0, 1, 1], [], []>} : vector<8x32xbf16>, vector<32x32xbf16>, vector<8x32xf32> -> vector<8x32xf32>
    %68 = arith.addf %1, %67 : vector<8x32xf32>
    %69 = vector.extract_strided_slice %28 {offsets = [0, 96], sizes = [1, 32], strides = [1, 1]} : vector<1x128xf32> to vector<1x32xf32>
    %70 = vector.broadcast %69 : vector<1x32xf32> to vector<8x32xf32>
    %71 = arith.addf %68, %70 : vector<8x32xf32>
    %72 = vector.extract_strided_slice %6 {offsets = [0, 0], sizes = [1, 32], strides = [1, 1]} : vector<8x32xf32> to vector<1x32xf32>
    %73 = vector.extract_strided_slice %6 {offsets = [1, 0], sizes = [1, 32], strides = [1, 1]} : vector<8x32xf32> to vector<1x32xf32>
    %cst_30 = arith.constant dense<0.000000e+00> : vector<8xf32>
    %74 = vector.multi_reduction <add>, %71, %cst_30 [1] : vector<8x32xf32> to vector<8xf32>
    %75 = vector.shape_cast %74 : vector<8xf32> to vector<8x1xf32>
    %cst_31 = arith.constant 3.200000e+01 : f32
    %76 = vector.broadcast %cst_31 : f32 to vector<8x1xf32>
    %77 = arith.divf %75, %76 : vector<8x1xf32>
    %78 = vector.broadcast %77 : vector<8x1xf32> to vector<8x32xf32>
    %79 = arith.subf %71, %78 : vector<8x32xf32>
    %80 = arith.mulf %79, %79 : vector<8x32xf32>
    %cst_32 = arith.constant dense<0.000000e+00> : vector<8xf32>
    %81 = vector.multi_reduction <add>, %80, %cst_32 [1] : vector<8x32xf32> to vector<8xf32>
    %82 = vector.shape_cast %81 : vector<8xf32> to vector<8x1xf32>
    %cst_33 = arith.constant 3.200000e+01 : f32
    %83 = vector.broadcast %cst_33 : f32 to vector<8x1xf32>
    %84 = arith.divf %82, %83 : vector<8x1xf32>
    %85 = vector.broadcast %77 : vector<8x1xf32> to vector<8x32xf32>
    %86 = arith.subf %71, %85 : vector<8x32xf32>
    %cst_34 = arith.constant 9.99999974E-6 : f32
    %87 = vector.broadcast %cst_34 : f32 to vector<8x1xf32>
    %88 = arith.addf %84, %87 : vector<8x1xf32>
    %89 = math.rsqrt %88 : vector<8x1xf32>
    %90 = vector.broadcast %89 : vector<8x1xf32> to vector<8x32xf32>
    %91 = arith.mulf %86, %90 : vector<8x32xf32>
    %92 = vector.broadcast %72 : vector<1x32xf32> to vector<8x32xf32>
    %93 = arith.mulf %91, %92 : vector<8x32xf32>
    %94 = vector.broadcast %73 : vector<1x32xf32> to vector<8x32xf32>
    %95 = arith.addf %93, %94 : vector<8x32xf32>
    %c0_35 = arith.constant 0 : index
    %c0_36 = arith.constant 0 : index
    %96 = vector.load %arg11[%c0_35, %c0_36] : memref<32x64xbf16, #tpu.memory_space<vmem>>, vector<32x64xbf16>
    %c0_37 = arith.constant 0 : index
    %c0_38 = arith.constant 0 : index
    %97 = vector.load %arg12[%c0_37, %c0_38] : memref<1x64xf32, #tpu.memory_space<vmem>>, vector<1x64xf32>
    %c0_39 = arith.constant 0 : index
    %c0_40 = arith.constant 0 : index
    %c0_41 = arith.constant 0 : index
    %98 = vector.load %arg4[%c0_39, %c0_40, %c0_41] : memref<1x16x64xbf16, #tpu.memory_space<vmem>>, vector<1x16x64xbf16>
    %99 = vector.shape_cast %98 : vector<1x16x64xbf16> to vector<16x64xbf16>
    %100 = arith.addf %95, %26 : vector<8x32xf32>
    %101 = vector.extract_strided_slice %96 {offsets = [0, 0], sizes = [32, 32], strides = [1, 1]} : vector<32x64xbf16> to vector<32x32xbf16>
    %102 = arith.truncf %100 : vector<8x32xf32> to vector<8x32xbf16>
    %cst_42 = arith.constant dense<0.000000e+00> : vector<8x32xf32>
    %103 = tpu.matmul %102, %101, %cst_42 {dimension_numbers = #tpu.dot_dimension_numbers<[1], [0], [0], [1], [0, 0, 1, 1], [], []>} : vector<8x32xbf16>, vector<32x32xbf16>, vector<8x32xf32> -> vector<8x32xf32>
    %104 = vector.extract_strided_slice %97 {offsets = [0, 0], sizes = [1, 32], strides = [1, 1]} : vector<1x64xf32> to vector<1x32xf32>
    %105 = vector.broadcast %104 : vector<1x32xf32> to vector<8x32xf32>
    %106 = arith.addf %103, %105 : vector<8x32xf32>
    %107 = vector.extract_strided_slice %99 {offsets = [0, 0], sizes = [16, 32], strides = [1, 1]} : vector<16x64xbf16> to vector<16x32xbf16>
    %108 = arith.truncf %106 : vector<8x32xf32> to vector<8x32xbf16>
    %cst_43 = arith.constant dense<0.000000e+00> : vector<8x16xf32>
    %109 = tpu.matmul %108, %107, %cst_43 {dimension_numbers = #tpu.dot_dimension_numbers<[1], [1], [0], [0], [0, 0, 1, 0], [], []>} : vector<8x32xbf16>, vector<16x32xbf16>, vector<8x16xf32> -> vector<8x16xf32>
    %cst_44 = arith.constant dense<0xFF800000> : vector<8xf32>
    %110 = vector.multi_reduction <maximumf>, %109, %cst_44 [1] : vector<8x16xf32> to vector<8xf32>
    %111 = vector.shape_cast %110 : vector<8xf32> to vector<8x1xf32>
    %112 = vector.broadcast %111 : vector<8x1xf32> to vector<8x16xf32>
    %113 = arith.subf %109, %112 : vector<8x16xf32>
    %114 = math.exp %113 : vector<8x16xf32>
    %cst_45 = arith.constant dense<0.000000e+00> : vector<8xf32>
    %115 = vector.multi_reduction <add>, %114, %cst_45 [1] : vector<8x16xf32> to vector<8xf32>
    %116 = vector.shape_cast %115 : vector<8xf32> to vector<8x1xf32>
    %117 = tpu.reciprocal %116 {approx = true} : vector<8x1xf32> -> vector<8x1xf32>
    %118 = vector.broadcast %117 : vector<8x1xf32> to vector<8x16xf32>
    %119 = arith.mulf %114, %118 : vector<8x16xf32>
    %120 = vector.extract_strided_slice %99 {offsets = [0, 32], sizes = [16, 32], strides = [1, 1]} : vector<16x64xbf16> to vector<16x32xbf16>
    %121 = arith.truncf %119 : vector<8x16xf32> to vector<8x16xbf16>
    %cst_46 = arith.constant dense<0.000000e+00> : vector<8x32xf32>
    %122 = tpu.matmul %121, %120, %cst_46 {dimension_numbers = #tpu.dot_dimension_numbers<[1], [0], [0], [1], [0, 0, 1, 1], [], []>} : vector<8x16xbf16>, vector<16x32xbf16>, vector<8x32xf32> -> vector<8x32xf32>
    %123 = vector.extract_strided_slice %96 {offsets = [0, 32], sizes = [32, 32], strides = [1, 1]} : vector<32x64xbf16> to vector<32x32xbf16>
    %124 = arith.truncf %122 : vector<8x32xf32> to vector<8x32xbf16>
    %cst_47 = arith.constant dense<0.000000e+00> : vector<8x32xf32>
    %125 = tpu.matmul %124, %123, %cst_47 {dimension_numbers = #tpu.dot_dimension_numbers<[1], [0], [0], [1], [0, 0, 1, 1], [], []>} : vector<8x32xbf16>, vector<32x32xbf16>, vector<8x32xf32> -> vector<8x32xf32>
    %126 = arith.addf %95, %125 : vector<8x32xf32>
    %127 = vector.extract_strided_slice %97 {offsets = [0, 32], sizes = [1, 32], strides = [1, 1]} : vector<1x64xf32> to vector<1x32xf32>
    %128 = vector.broadcast %127 : vector<1x32xf32> to vector<8x32xf32>
    %129 = arith.addf %126, %128 : vector<8x32xf32>
    %130 = vector.extract_strided_slice %6 {offsets = [2, 0], sizes = [1, 32], strides = [1, 1]} : vector<8x32xf32> to vector<1x32xf32>
    %131 = vector.extract_strided_slice %6 {offsets = [3, 0], sizes = [1, 32], strides = [1, 1]} : vector<8x32xf32> to vector<1x32xf32>
    %cst_48 = arith.constant dense<0.000000e+00> : vector<8xf32>
    %132 = vector.multi_reduction <add>, %129, %cst_48 [1] : vector<8x32xf32> to vector<8xf32>
    %133 = vector.shape_cast %132 : vector<8xf32> to vector<8x1xf32>
    %cst_49 = arith.constant 3.200000e+01 : f32
    %134 = vector.broadcast %cst_49 : f32 to vector<8x1xf32>
    %135 = arith.divf %133, %134 : vector<8x1xf32>
    %136 = vector.broadcast %135 : vector<8x1xf32> to vector<8x32xf32>
    %137 = arith.subf %129, %136 : vector<8x32xf32>
    %138 = arith.mulf %137, %137 : vector<8x32xf32>
    %cst_50 = arith.constant dense<0.000000e+00> : vector<8xf32>
    %139 = vector.multi_reduction <add>, %138, %cst_50 [1] : vector<8x32xf32> to vector<8xf32>
    %140 = vector.shape_cast %139 : vector<8xf32> to vector<8x1xf32>
    %cst_51 = arith.constant 3.200000e+01 : f32
    %141 = vector.broadcast %cst_51 : f32 to vector<8x1xf32>
    %142 = arith.divf %140, %141 : vector<8x1xf32>
    %143 = vector.broadcast %135 : vector<8x1xf32> to vector<8x32xf32>
    %144 = arith.subf %129, %143 : vector<8x32xf32>
    %cst_52 = arith.constant 9.99999974E-6 : f32
    %145 = vector.broadcast %cst_52 : f32 to vector<8x1xf32>
    %146 = arith.addf %142, %145 : vector<8x1xf32>
    %147 = math.rsqrt %146 : vector<8x1xf32>
    %148 = vector.broadcast %147 : vector<8x1xf32> to vector<8x32xf32>
    %149 = arith.mulf %144, %148 : vector<8x32xf32>
    %150 = vector.broadcast %130 : vector<1x32xf32> to vector<8x32xf32>
    %151 = arith.mulf %149, %150 : vector<8x32xf32>
    %152 = vector.broadcast %131 : vector<1x32xf32> to vector<8x32xf32>
    %153 = arith.addf %151, %152 : vector<8x32xf32>
    %c0_53 = arith.constant 0 : index
    %c0_54 = arith.constant 0 : index
    %154 = vector.load %arg13[%c0_53, %c0_54] : memref<32x64xbf16, #tpu.memory_space<vmem>>, vector<32x64xbf16>
    %155 = arith.truncf %153 : vector<8x32xf32> to vector<8x32xbf16>
    %cst_55 = arith.constant dense<0.000000e+00> : vector<8x64xf32>
    %156 = tpu.matmul %155, %154, %cst_55 {dimension_numbers = #tpu.dot_dimension_numbers<[1], [0], [0], [1], [0, 0, 1, 1], [], []>} : vector<8x32xbf16>, vector<32x64xbf16>, vector<8x64xf32> -> vector<8x64xf32>
    %c0_56 = arith.constant 0 : index
    %c0_57 = arith.constant 0 : index
    %157 = vector.load %arg14[%c0_56, %c0_57] : memref<1x64xf32, #tpu.memory_space<vmem>>, vector<1x64xf32>
    %158 = vector.broadcast %157 : vector<1x64xf32> to vector<8x64xf32>
    %159 = arith.addf %156, %158 : vector<8x64xf32>
    %cst_58 = arith.constant 0.000000e+00 : f32
    %160 = vector.broadcast %cst_58 : f32 to vector<8x64xf32>
    %161 = arith.maximumf %159, %160 : vector<8x64xf32>
    %c0_59 = arith.constant 0 : index
    %c0_60 = arith.constant 0 : index
    %162 = vector.load %arg15[%c0_59, %c0_60] : memref<64x32xbf16, #tpu.memory_space<vmem>>, vector<64x32xbf16>
    %163 = arith.truncf %161 : vector<8x64xf32> to vector<8x64xbf16>
    %cst_61 = arith.constant dense<0.000000e+00> : vector<8x32xf32>
    %164 = tpu.matmul %163, %162, %cst_61 {dimension_numbers = #tpu.dot_dimension_numbers<[1], [0], [0], [1], [0, 0, 1, 1], [], []>} : vector<8x64xbf16>, vector<64x32xbf16>, vector<8x32xf32> -> vector<8x32xf32>
    %165 = arith.addf %153, %164 : vector<8x32xf32>
    %c0_62 = arith.constant 0 : index
    %c0_63 = arith.constant 0 : index
    %166 = vector.load %arg16[%c0_62, %c0_63] : memref<1x32xf32, #tpu.memory_space<vmem>>, vector<1x32xf32>
    %167 = vector.broadcast %166 : vector<1x32xf32> to vector<8x32xf32>
    %168 = arith.addf %165, %167 : vector<8x32xf32>
    %169 = vector.extract_strided_slice %6 {offsets = [4, 0], sizes = [1, 32], strides = [1, 1]} : vector<8x32xf32> to vector<1x32xf32>
    %170 = vector.extract_strided_slice %6 {offsets = [5, 0], sizes = [1, 32], strides = [1, 1]} : vector<8x32xf32> to vector<1x32xf32>
    %cst_64 = arith.constant dense<0.000000e+00> : vector<8xf32>
    %171 = vector.multi_reduction <add>, %168, %cst_64 [1] : vector<8x32xf32> to vector<8xf32>
    %172 = vector.shape_cast %171 : vector<8xf32> to vector<8x1xf32>
    %cst_65 = arith.constant 3.200000e+01 : f32
    %173 = vector.broadcast %cst_65 : f32 to vector<8x1xf32>
    %174 = arith.divf %172, %173 : vector<8x1xf32>
    %175 = vector.broadcast %174 : vector<8x1xf32> to vector<8x32xf32>
    %176 = arith.subf %168, %175 : vector<8x32xf32>
    %177 = arith.mulf %176, %176 : vector<8x32xf32>
    %cst_66 = arith.constant dense<0.000000e+00> : vector<8xf32>
    %178 = vector.multi_reduction <add>, %177, %cst_66 [1] : vector<8x32xf32> to vector<8xf32>
    %179 = vector.shape_cast %178 : vector<8xf32> to vector<8x1xf32>
    %cst_67 = arith.constant 3.200000e+01 : f32
    %180 = vector.broadcast %cst_67 : f32 to vector<8x1xf32>
    %181 = arith.divf %179, %180 : vector<8x1xf32>
    %182 = vector.broadcast %174 : vector<8x1xf32> to vector<8x32xf32>
    %183 = arith.subf %168, %182 : vector<8x32xf32>
    %cst_68 = arith.constant 9.99999974E-6 : f32
    %184 = vector.broadcast %cst_68 : f32 to vector<8x1xf32>
    %185 = arith.addf %181, %184 : vector<8x1xf32>
    %186 = math.rsqrt %185 : vector<8x1xf32>
    %187 = vector.broadcast %186 : vector<8x1xf32> to vector<8x32xf32>
    %188 = arith.mulf %183, %187 : vector<8x32xf32>
    %189 = vector.broadcast %169 : vector<1x32xf32> to vector<8x32xf32>
    %190 = arith.mulf %188, %189 : vector<8x32xf32>
    %191 = vector.broadcast %170 : vector<1x32xf32> to vector<8x32xf32>
    %192 = arith.addf %190, %191 : vector<8x32xf32>
    %c0_69 = arith.constant 0 : index
    %c0_70 = arith.constant 0 : index
    %c0_71 = arith.constant 0 : index
    %193 = vector.load %arg18[%c0_69, %c0_70, %c0_71] : memref<1x8x32xf32, #tpu.memory_space<vmem>>, vector<1x8x32xf32>
    %194 = vector.shape_cast %193 : vector<1x8x32xf32> to vector<8x32xf32>
    %195 = vector.shape_cast %192 : vector<8x32xf32> to vector<1x8x32xf32>
    tpu.vector_store %arg18[%c0_69, %c0_70, %c0_71], %195 {strides = array<i32>} : memref<1x8x32xf32, #tpu.memory_space<vmem>>, vector<1x8x32xf32>,
    %196 = vector.extract_strided_slice %6 {offsets = [6, 0], sizes = [1, 32], strides = [1, 1]} : vector<8x32xf32> to vector<1x32xf32>
    %197 = vector.extract_strided_slice %6 {offsets = [7, 0], sizes = [1, 32], strides = [1, 1]} : vector<8x32xf32> to vector<1x32xf32>
    %cst_72 = arith.constant dense<0.000000e+00> : vector<8xf32>
    %198 = vector.multi_reduction <add>, %192, %cst_72 [1] : vector<8x32xf32> to vector<8xf32>
    %199 = vector.shape_cast %198 : vector<8xf32> to vector<8x1xf32>
    %cst_73 = arith.constant 3.200000e+01 : f32
    %200 = vector.broadcast %cst_73 : f32 to vector<8x1xf32>
    %201 = arith.divf %199, %200 : vector<8x1xf32>
    %202 = vector.broadcast %201 : vector<8x1xf32> to vector<8x32xf32>
    %203 = arith.subf %192, %202 : vector<8x32xf32>
    %204 = arith.mulf %203, %203 : vector<8x32xf32>
    %cst_74 = arith.constant dense<0.000000e+00> : vector<8xf32>
    %205 = vector.multi_reduction <add>, %204, %cst_74 [1] : vector<8x32xf32> to vector<8xf32>
    %206 = vector.shape_cast %205 : vector<8xf32> to vector<8x1xf32>
    %cst_75 = arith.constant 3.200000e+01 : f32
    %207 = vector.broadcast %cst_75 : f32 to vector<8x1xf32>
    %208 = arith.divf %206, %207 : vector<8x1xf32>
    %209 = vector.broadcast %201 : vector<8x1xf32> to vector<8x32xf32>
    %210 = arith.subf %192, %209 : vector<8x32xf32>
    %cst_76 = arith.constant 9.99999974E-6 : f32
    %211 = vector.broadcast %cst_76 : f32 to vector<8x1xf32>
    %212 = arith.addf %208, %211 : vector<8x1xf32>
    %213 = math.rsqrt %212 : vector<8x1xf32>
    %214 = vector.broadcast %213 : vector<8x1xf32> to vector<8x32xf32>
    %215 = arith.mulf %210, %214 : vector<8x32xf32>
    %216 = vector.broadcast %196 : vector<1x32xf32> to vector<8x32xf32>
    %217 = arith.mulf %215, %216 : vector<8x32xf32>
    %218 = vector.broadcast %197 : vector<1x32xf32> to vector<8x32xf32>
    %219 = arith.addf %217, %218 : vector<8x32xf32>
    %c0_77 = arith.constant 0 : index
    %c0_78 = arith.constant 0 : index
    %c0_79 = arith.constant 0 : index
    %220 = vector.load %arg19[%c0_77, %c0_78, %c0_79] : memref<1x8x32xf32, #tpu.memory_space<vmem>>, vector<1x8x32xf32>
    %221 = vector.shape_cast %220 : vector<1x8x32xf32> to vector<8x32xf32>
    %222 = vector.shape_cast %219 : vector<8x32xf32> to vector<1x8x32xf32>
    tpu.vector_store %arg19[%c0_77, %c0_78, %c0_79], %222 {strides = array<i32>} : memref<1x8x32xf32, #tpu.memory_space<vmem>>, vector<1x8x32xf32>,
    return
  }
  func.func @transform_0(%arg0: i32, %arg1: i32) -> (i32, i32, i32) {
    %c0_i32 = arith.constant 0 : i32
    %c0_i32_0 = arith.constant 0 : i32
    return %arg0, %arg1, %c0_i32 : i32, i32, i32
  }
  func.func @transform_1(%arg0: i32, %arg1: i32) -> (i32, i32, i32) {
    %c0_i32 = arith.constant 0 : i32
    %c0_i32_0 = arith.constant 0 : i32
    return %arg0, %arg1, %c0_i32 : i32, i32, i32
  }
  func.func @transform_2(%arg0: i32, %arg1: i32) -> (i32, i32, i32) {
    %c0_i32 = arith.constant 0 : i32
    %c0_i32_0 = arith.constant 0 : i32
    %c0_i32_1 = arith.constant 0 : i32
    return %arg0, %c0_i32, %c0_i32_0 : i32, i32, i32
  }
  func.func @transform_3(%arg0: i32, %arg1: i32) -> (i32, i32) {
    %c0_i32 = arith.constant 0 : i32
    %c0_i32_0 = arith.constant 0 : i32
    %c0_i32_1 = arith.constant 0 : i32
    return %c0_i32, %c0_i32_0 : i32, i32
  }
  func.func @transform_4(%arg0: i32, %arg1: i32) -> (i32, i32) {
    %c0_i32 = arith.constant 0 : i32
    %c0_i32_0 = arith.constant 0 : i32
    %c0_i32_1 = arith.constant 0 : i32
    return %c0_i32, %c0_i32_0 : i32, i32
  }
  func.func @transform_5(%arg0: i32, %arg1: i32) -> (i32, i32) {
    %c0_i32 = arith.constant 0 : i32
    %c0_i32_0 = arith.constant 0 : i32
    %c0_i32_1 = arith.constant 0 : i32
    return %c0_i32, %c0_i32_0 : i32, i32
  }
  func.func @transform_6(%arg0: i32, %arg1: i32) -> (i32, i32) {
    %c0_i32 = arith.constant 0 : i32
    %c0_i32_0 = arith.constant 0 : i32
    %c0_i32_1 = arith.constant 0 : i32
    return %c0_i32, %c0_i32_0 : i32, i32
  }
  func.func @transform_7(%arg0: i32, %arg1: i32) -> (i32, i32) {
    %c0_i32 = arith.constant 0 : i32
    %c0_i32_0 = arith.constant 0 : i32
    %c0_i32_1 = arith.constant 0 : i32
    return %c0_i32, %c0_i32_0 : i32, i32
  }
  func.func @transform_8(%arg0: i32, %arg1: i32) -> (i32, i32) {
    %c0_i32 = arith.constant 0 : i32
    %c0_i32_0 = arith.constant 0 : i32
    %c0_i32_1 = arith.constant 0 : i32
    return %c0_i32, %c0_i32_0 : i32, i32
  }
  func.func @transform_9(%arg0: i32, %arg1: i32) -> (i32, i32) {
    %c0_i32 = arith.constant 0 : i32
    %c0_i32_0 = arith.constant 0 : i32
    %c0_i32_1 = arith.constant 0 : i32
    return %c0_i32, %c0_i32_0 : i32, i32
  }
  func.func @transform_10(%arg0: i32, %arg1: i32) -> (i32, i32) {
    %c0_i32 = arith.constant 0 : i32
    %c0_i32_0 = arith.constant 0 : i32
    %c0_i32_1 = arith.constant 0 : i32
    return %c0_i32, %c0_i32_0 : i32, i32
  }
  func.func @transform_11(%arg0: i32, %arg1: i32) -> (i32, i32) {
    %c0_i32 = arith.constant 0 : i32
    %c0_i32_0 = arith.constant 0 : i32
    %c0_i32_1 = arith.constant 0 : i32
    return %c0_i32, %c0_i32_0 : i32, i32
  }
  func.func @transform_12(%arg0: i32, %arg1: i32) -> (i32, i32) {
    %c0_i32 = arith.constant 0 : i32
    %c0_i32_0 = arith.constant 0 : i32
    %c0_i32_1 = arith.constant 0 : i32
    return %c0_i32, %c0_i32_0 : i32, i32
  }
  func.func @transform_13(%arg0: i32, %arg1: i32) -> (i32, i32) {
    %c0_i32 = arith.constant 0 : i32
    %c0_i32_0 = arith.constant 0 : i32
    %c0_i32_1 = arith.constant 0 : i32
    return %c0_i32, %c0_i32_0 : i32, i32
  }
  func.func @transform_14(%arg0: i32, %arg1: i32) -> (i32, i32) {
    %c0_i32 = arith.constant 0 : i32
    %c0_i32_0 = arith.constant 0 : i32
    %c0_i32_1 = arith.constant 0 : i32
    return %c0_i32, %c0_i32_0 : i32, i32
  }
  func.func @transform_15(%arg0: i32, %arg1: i32) -> (i32, i32) {
    %c0_i32 = arith.constant 0 : i32
    %c0_i32_0 = arith.constant 0 : i32
    %c0_i32_1 = arith.constant 0 : i32
    return %c0_i32, %c0_i32_0 : i32, i32
  }
  func.func @transform_16(%arg0: i32, %arg1: i32) -> (i32, i32, i32) {
    %c0_i32 = arith.constant 0 : i32
    %c0_i32_0 = arith.constant 0 : i32
    return %arg0, %arg1, %c0_i32 : i32, i32, i32
  }
  func.func @transform_17(%arg0: i32, %arg1: i32) -> (i32, i32, i32) {
    %c0_i32 = arith.constant 0 : i32
    %c0_i32_0 = arith.constant 0 : i32
    return %arg0, %arg1, %c0_i32 : i32, i32, i32
  }
}

module attributes {stable_mosaic.version = 11 : i64} {
  func.func @_mlp_kernel(%arg0: i32, %arg1: memref<4x32xf32, #tpu.memory_space<vmem>>, %arg2: memref<32x32xbf16, #tpu.memory_space<vmem>>, %arg3: memref<1x32xf32, #tpu.memory_space<vmem>>, %arg4: memref<32x32xbf16, #tpu.memory_space<vmem>>, %arg5: memref<1x32xf32, #tpu.memory_space<vmem>>, %arg6: memref<32x128xbf16, #tpu.memory_space<vmem>>, %arg7: memref<1x128xf32, #tpu.memory_space<vmem>>, %arg8: memref<4x128xf32, #tpu.memory_space<vmem>>) attributes {dimension_semantics = [#tpu.dimension_semantics<parallel>], iteration_bounds = array<i64: 1>, scalar_prefetch = 0 : i64, scratch_operands = 0 : i64, tpu.core_type = #tpu.core_type<tc>, window_params = [{transform_indices = @transform_0, window_bounds = array<i64: 4, 32>}, {pipeline_mode = #tpu.pipeline_mode<synchronous>, transform_indices = @transform_1, window_bounds = array<i64: 32, 32>}, {pipeline_mode = #tpu.pipeline_mode<synchronous>, transform_indices = @transform_2, window_bounds = array<i64: 1, 32>}, {pipeline_mode = #tpu.pipeline_mode<synchronous>, transform_indices = @transform_3, window_bounds = array<i64: 32, 32>}, {pipeline_mode = #tpu.pipeline_mode<synchronous>, transform_indices = @transform_4, window_bounds = array<i64: 1, 32>}, {pipeline_mode = #tpu.pipeline_mode<synchronous>, transform_indices = @transform_5, window_bounds = array<i64: 32, 128>}, {pipeline_mode = #tpu.pipeline_mode<synchronous>, transform_indices = @transform_6, window_bounds = array<i64: 1, 128>}, {transform_indices = @transform_7, window_bounds = array<i64: 4, 128>}]} {
    %c0 = arith.constant 0 : index
    %c0_0 = arith.constant 0 : index
    %0 = vector.load %arg1[%c0, %c0_0] : memref<4x32xf32, #tpu.memory_space<vmem>>, vector<4x32xf32>
    %c0_1 = arith.constant 0 : index
    %c0_2 = arith.constant 0 : index
    %1 = vector.load %arg2[%c0_1, %c0_2] : memref<32x32xbf16, #tpu.memory_space<vmem>>, vector<32x32xbf16>
    %c0_3 = arith.constant 0 : index
    %c0_4 = arith.constant 0 : index
    %2 = vector.load %arg3[%c0_3, %c0_4] : memref<1x32xf32, #tpu.memory_space<vmem>>, vector<1x32xf32>
    %3 = arith.truncf %0 : vector<4x32xf32> to vector<4x32xbf16>
    %cst = arith.constant dense<0.000000e+00> : vector<4x32xf32>
    %4 = tpu.matmul %3, %1, %cst {dimension_numbers = #tpu.dot_dimension_numbers<[1], [0], [0], [1], [0, 0, 1, 1], [], []>} : vector<4x32xbf16>, vector<32x32xbf16>, vector<4x32xf32> -> vector<4x32xf32>
    %5 = vector.broadcast %2 : vector<1x32xf32> to vector<4x32xf32>
    %6 = arith.addf %4, %5 : vector<4x32xf32>
    %cst_5 = arith.constant 0.000000e+00 : f32
    %7 = vector.broadcast %cst_5 : f32 to vector<4x32xf32>
    %8 = arith.maximumf %6, %7 : vector<4x32xf32>
    %c0_6 = arith.constant 0 : index
    %c0_7 = arith.constant 0 : index
    %9 = vector.load %arg4[%c0_6, %c0_7] : memref<32x32xbf16, #tpu.memory_space<vmem>>, vector<32x32xbf16>
    %c0_8 = arith.constant 0 : index
    %c0_9 = arith.constant 0 : index
    %10 = vector.load %arg5[%c0_8, %c0_9] : memref<1x32xf32, #tpu.memory_space<vmem>>, vector<1x32xf32>
    %11 = arith.truncf %8 : vector<4x32xf32> to vector<4x32xbf16>
    %cst_10 = arith.constant dense<0.000000e+00> : vector<4x32xf32>
    %12 = tpu.matmul %11, %9, %cst_10 {dimension_numbers = #tpu.dot_dimension_numbers<[1], [0], [0], [1], [0, 0, 1, 1], [], []>} : vector<4x32xbf16>, vector<32x32xbf16>, vector<4x32xf32> -> vector<4x32xf32>
    %13 = vector.broadcast %10 : vector<1x32xf32> to vector<4x32xf32>
    %14 = arith.addf %12, %13 : vector<4x32xf32>
    %cst_11 = arith.constant 0.000000e+00 : f32
    %15 = vector.broadcast %cst_11 : f32 to vector<4x32xf32>
    %16 = arith.maximumf %14, %15 : vector<4x32xf32>
    %c0_12 = arith.constant 0 : index
    %c0_13 = arith.constant 0 : index
    %17 = vector.load %arg6[%c0_12, %c0_13] : memref<32x128xbf16, #tpu.memory_space<vmem>>, vector<32x128xbf16>
    %c0_14 = arith.constant 0 : index
    %c0_15 = arith.constant 0 : index
    %18 = vector.load %arg7[%c0_14, %c0_15] : memref<1x128xf32, #tpu.memory_space<vmem>>, vector<1x128xf32>
    %19 = arith.truncf %16 : vector<4x32xf32> to vector<4x32xbf16>
    %cst_16 = arith.constant dense<0.000000e+00> : vector<4x128xf32>
    %20 = tpu.matmul %19, %17, %cst_16 {dimension_numbers = #tpu.dot_dimension_numbers<[1], [0], [0], [1], [0, 0, 1, 1], [], []>} : vector<4x32xbf16>, vector<32x128xbf16>, vector<4x128xf32> -> vector<4x128xf32>
    %21 = vector.broadcast %18 : vector<1x128xf32> to vector<4x128xf32>
    %22 = arith.addf %20, %21 : vector<4x128xf32>
    %c0_17 = arith.constant 0 : index
    %c0_18 = arith.constant 0 : index
    %23 = vector.load %arg8[%c0_17, %c0_18] : memref<4x128xf32, #tpu.memory_space<vmem>>, vector<4x128xf32>
    tpu.vector_store %arg8[%c0_17, %c0_18], %22 {strides = array<i32>} : memref<4x128xf32, #tpu.memory_space<vmem>>, vector<4x128xf32>,
    return
  }
  func.func @transform_0(%arg0: i32) -> (i32, i32) {
    %c0_i32 = arith.constant 0 : i32
    %c0_i32_0 = arith.constant 0 : i32
    return %arg0, %c0_i32 : i32, i32
  }
  func.func @transform_1(%arg0: i32) -> (i32, i32) {
    %c0_i32 = arith.constant 0 : i32
    %c0_i32_0 = arith.constant 0 : i32
    %c0_i32_1 = arith.constant 0 : i32
    return %c0_i32, %c0_i32_0 : i32, i32
  }
  func.func @transform_2(%arg0: i32) -> (i32, i32) {
    %c0_i32 = arith.constant 0 : i32
    %c0_i32_0 = arith.constant 0 : i32
    %c0_i32_1 = arith.constant 0 : i32
    return %c0_i32, %c0_i32_0 : i32, i32
  }
  func.func @transform_3(%arg0: i32) -> (i32, i32) {
    %c0_i32 = arith.constant 0 : i32
    %c0_i32_0 = arith.constant 0 : i32
    %c0_i32_1 = arith.constant 0 : i32
    return %c0_i32, %c0_i32_0 : i32, i32
  }
  func.func @transform_4(%arg0: i32) -> (i32, i32) {
    %c0_i32 = arith.constant 0 : i32
    %c0_i32_0 = arith.constant 0 : i32
    %c0_i32_1 = arith.constant 0 : i32
    return %c0_i32, %c0_i32_0 : i32, i32
  }
  func.func @transform_5(%arg0: i32) -> (i32, i32) {
    %c0_i32 = arith.constant 0 : i32
    %c0_i32_0 = arith.constant 0 : i32
    %c0_i32_1 = arith.constant 0 : i32
    return %c0_i32, %c0_i32_0 : i32, i32
  }
  func.func @transform_6(%arg0: i32) -> (i32, i32) {
    %c0_i32 = arith.constant 0 : i32
    %c0_i32_0 = arith.constant 0 : i32
    %c0_i32_1 = arith.constant 0 : i32
    return %c0_i32, %c0_i32_0 : i32, i32
  }
  func.func @transform_7(%arg0: i32) -> (i32, i32) {
    %c0_i32 = arith.constant 0 : i32
    %c0_i32_0 = arith.constant 0 : i32
    return %arg0, %c0_i32 : i32, i32
  }
}

module attributes {stable_mosaic.version = 11 : i64} {
  func.func @_mlp_kernel(%arg0: i32, %arg1: memref<12x32xf32, #tpu.memory_space<vmem>>, %arg2: memref<32x64xbf16, #tpu.memory_space<vmem>>, %arg3: memref<1x64xf32, #tpu.memory_space<vmem>>, %arg4: memref<64x64xbf16, #tpu.memory_space<vmem>>, %arg5: memref<1x64xf32, #tpu.memory_space<vmem>>, %arg6: memref<64x128xbf16, #tpu.memory_space<vmem>>, %arg7: memref<1x128xf32, #tpu.memory_space<vmem>>, %arg8: memref<12x128xf32, #tpu.memory_space<vmem>>) attributes {dimension_semantics = [#tpu.dimension_semantics<parallel>], iteration_bounds = array<i64: 1>, scalar_prefetch = 0 : i64, scratch_operands = 0 : i64, tpu.core_type = #tpu.core_type<tc>, window_params = [{transform_indices = @transform_0, window_bounds = array<i64: 12, 32>}, {pipeline_mode = #tpu.pipeline_mode<synchronous>, transform_indices = @transform_1, window_bounds = array<i64: 32, 64>}, {pipeline_mode = #tpu.pipeline_mode<synchronous>, transform_indices = @transform_2, window_bounds = array<i64: 1, 64>}, {pipeline_mode = #tpu.pipeline_mode<synchronous>, transform_indices = @transform_3, window_bounds = array<i64: 64, 64>}, {pipeline_mode = #tpu.pipeline_mode<synchronous>, transform_indices = @transform_4, window_bounds = array<i64: 1, 64>}, {pipeline_mode = #tpu.pipeline_mode<synchronous>, transform_indices = @transform_5, window_bounds = array<i64: 64, 128>}, {pipeline_mode = #tpu.pipeline_mode<synchronous>, transform_indices = @transform_6, window_bounds = array<i64: 1, 128>}, {transform_indices = @transform_7, window_bounds = array<i64: 12, 128>}]} {
    %c0 = arith.constant 0 : index
    %c0_0 = arith.constant 0 : index
    %0 = vector.load %arg1[%c0, %c0_0] : memref<12x32xf32, #tpu.memory_space<vmem>>, vector<12x32xf32>
    %c0_1 = arith.constant 0 : index
    %c0_2 = arith.constant 0 : index
    %1 = vector.load %arg2[%c0_1, %c0_2] : memref<32x64xbf16, #tpu.memory_space<vmem>>, vector<32x64xbf16>
    %c0_3 = arith.constant 0 : index
    %c0_4 = arith.constant 0 : index
    %2 = vector.load %arg3[%c0_3, %c0_4] : memref<1x64xf32, #tpu.memory_space<vmem>>, vector<1x64xf32>
    %3 = arith.truncf %0 : vector<12x32xf32> to vector<12x32xbf16>
    %cst = arith.constant dense<0.000000e+00> : vector<12x64xf32>
    %4 = tpu.matmul %3, %1, %cst {dimension_numbers = #tpu.dot_dimension_numbers<[1], [0], [0], [1], [0, 0, 1, 1], [], []>} : vector<12x32xbf16>, vector<32x64xbf16>, vector<12x64xf32> -> vector<12x64xf32>
    %5 = vector.broadcast %2 : vector<1x64xf32> to vector<12x64xf32>
    %6 = arith.addf %4, %5 : vector<12x64xf32>
    %cst_5 = arith.constant 0.000000e+00 : f32
    %7 = vector.broadcast %cst_5 : f32 to vector<12x64xf32>
    %8 = arith.maximumf %6, %7 : vector<12x64xf32>
    %c0_6 = arith.constant 0 : index
    %c0_7 = arith.constant 0 : index
    %9 = vector.load %arg4[%c0_6, %c0_7] : memref<64x64xbf16, #tpu.memory_space<vmem>>, vector<64x64xbf16>
    %c0_8 = arith.constant 0 : index
    %c0_9 = arith.constant 0 : index
    %10 = vector.load %arg5[%c0_8, %c0_9] : memref<1x64xf32, #tpu.memory_space<vmem>>, vector<1x64xf32>
    %11 = arith.truncf %8 : vector<12x64xf32> to vector<12x64xbf16>
    %cst_10 = arith.constant dense<0.000000e+00> : vector<12x64xf32>
    %12 = tpu.matmul %11, %9, %cst_10 {dimension_numbers = #tpu.dot_dimension_numbers<[1], [0], [0], [1], [0, 0, 1, 1], [], []>} : vector<12x64xbf16>, vector<64x64xbf16>, vector<12x64xf32> -> vector<12x64xf32>
    %13 = vector.broadcast %10 : vector<1x64xf32> to vector<12x64xf32>
    %14 = arith.addf %12, %13 : vector<12x64xf32>
    %cst_11 = arith.constant 0.000000e+00 : f32
    %15 = vector.broadcast %cst_11 : f32 to vector<12x64xf32>
    %16 = arith.maximumf %14, %15 : vector<12x64xf32>
    %c0_12 = arith.constant 0 : index
    %c0_13 = arith.constant 0 : index
    %17 = vector.load %arg6[%c0_12, %c0_13] : memref<64x128xbf16, #tpu.memory_space<vmem>>, vector<64x128xbf16>
    %c0_14 = arith.constant 0 : index
    %c0_15 = arith.constant 0 : index
    %18 = vector.load %arg7[%c0_14, %c0_15] : memref<1x128xf32, #tpu.memory_space<vmem>>, vector<1x128xf32>
    %19 = arith.truncf %16 : vector<12x64xf32> to vector<12x64xbf16>
    %cst_16 = arith.constant dense<0.000000e+00> : vector<12x128xf32>
    %20 = tpu.matmul %19, %17, %cst_16 {dimension_numbers = #tpu.dot_dimension_numbers<[1], [0], [0], [1], [0, 0, 1, 1], [], []>} : vector<12x64xbf16>, vector<64x128xbf16>, vector<12x128xf32> -> vector<12x128xf32>
    %21 = vector.broadcast %18 : vector<1x128xf32> to vector<12x128xf32>
    %22 = arith.addf %20, %21 : vector<12x128xf32>
    %c0_17 = arith.constant 0 : index
    %c0_18 = arith.constant 0 : index
    %23 = vector.load %arg8[%c0_17, %c0_18] : memref<12x128xf32, #tpu.memory_space<vmem>>, vector<12x128xf32>
    tpu.vector_store %arg8[%c0_17, %c0_18], %22 {strides = array<i32>} : memref<12x128xf32, #tpu.memory_space<vmem>>, vector<12x128xf32>,
    return
  }
  func.func @transform_0(%arg0: i32) -> (i32, i32) {
    %c0_i32 = arith.constant 0 : i32
    %c0_i32_0 = arith.constant 0 : i32
    return %arg0, %c0_i32 : i32, i32
  }
  func.func @transform_1(%arg0: i32) -> (i32, i32) {
    %c0_i32 = arith.constant 0 : i32
    %c0_i32_0 = arith.constant 0 : i32
    %c0_i32_1 = arith.constant 0 : i32
    return %c0_i32, %c0_i32_0 : i32, i32
  }
  func.func @transform_2(%arg0: i32) -> (i32, i32) {
    %c0_i32 = arith.constant 0 : i32
    %c0_i32_0 = arith.constant 0 : i32
    %c0_i32_1 = arith.constant 0 : i32
    return %c0_i32, %c0_i32_0 : i32, i32
  }
  func.func @transform_3(%arg0: i32) -> (i32, i32) {
    %c0_i32 = arith.constant 0 : i32
    %c0_i32_0 = arith.constant 0 : i32
    %c0_i32_1 = arith.constant 0 : i32
    return %c0_i32, %c0_i32_0 : i32, i32
  }
  func.func @transform_4(%arg0: i32) -> (i32, i32) {
    %c0_i32 = arith.constant 0 : i32
    %c0_i32_0 = arith.constant 0 : i32
    %c0_i32_1 = arith.constant 0 : i32
    return %c0_i32, %c0_i32_0 : i32, i32
  }
  func.func @transform_5(%arg0: i32) -> (i32, i32) {
    %c0_i32 = arith.constant 0 : i32
    %c0_i32_0 = arith.constant 0 : i32
    %c0_i32_1 = arith.constant 0 : i32
    return %c0_i32, %c0_i32_0 : i32, i32
  }
  func.func @transform_6(%arg0: i32) -> (i32, i32) {
    %c0_i32 = arith.constant 0 : i32
    %c0_i32_0 = arith.constant 0 : i32
    %c0_i32_1 = arith.constant 0 : i32
    return %c0_i32, %c0_i32_0 : i32, i32
  }
  func.func @transform_7(%arg0: i32) -> (i32, i32) {
    %c0_i32 = arith.constant 0 : i32
    %c0_i32_0 = arith.constant 0 : i32
    return %arg0, %c0_i32 : i32, i32
  }
}

</mosaic_0001>

<bundles_post_ra>
// kernel: run.10
= control target key start
LH: loop header
LB: loop body
LE: loop exit
PB: predicated region body
PF: predicated region fallthrough
CT: control target
= control target key end

     0   :  { %s643_s15 = smov 0   ;;  %s645_s16 = smov 0   ;;  %s710_s0 = inlined_call_operand.vmem [shape: bf16[2,16,32], index: 0, kind: input, shape index: {}]   ;;  %s711_s1 = inlined_call_operand.vmem [shape: bf16[2,16,32], index: 1, kind: input, shape index: {}]   ;;  %s712_s2 = inlined_call_operand.vmem [shape: bf16[3,32,64], index: 2, kind: input, shape index: {}]   ;;  %s713_s3 = inlined_call_operand.vmem [shape: f32[3,1,64], index: 3, kind: input, shape index: {}]   ;;  %s714_s4 = inlined_call_operand.vmem [shape: bf16[3,2,16,64], index: 4, kind: output, shape index: {}]  }
   0x1   :  { %s647_s17 = smov 0   ;;  %s649_s18 = smov 0  }
   0x2   :  { %s651_s19 = smov 0  }
   0x3 LB: > { %s23_s20 = sadd.s32 1, %s606_s17  ;;  %s26_s21 = sadd.s32 1, %s610_s18  ;;  %s614_s19 = sphi %s651_s19, %s14_s19   ;;  %s610_s18 = sphi %s649_s18, %s718_s18   ;;  %s606_s17 = sphi %s647_s17, %s717_s17   ;;  %s602_s16 = sphi %s645_s16, %s716_s16   ;;  %s598_s15 = sphi %s643_s15, %s715_s15  }
   0x4   : > { %p24_p0 = scmp.ge.s32.totalorder %s23_s20, 2  ;;  %p491_p1 = scmp.ge.s32.totalorder %s614_s19, 1 }
   0x5   : > { %p204_p2 = scmp.lt.s32.totalorder %s614_s19, 7 }
   0x6   : > { %s720_s20 = smov (%p24_p0, %s23_s20), 0  ;;  %s722_s21 = smov (!%p24_p0, %s26_s21), %s610_s18 }
   0x7   : > { %p205_p3 = pnand %p491_p1, %p204_p2  ;;  %p28_p4 = scmp.ge.s32.totalorder %s722_s21, 3 }
   0x8   : > { %p257_p5 = scmp.lt.s32.totalorder (!%p205_p3), %s602_s16, 2  ;;  %p247_p6 = scmp.lt.s32.totalorder (!%p205_p3), %s598_s15, 1 }
   0x9   : > { %s724_s21 = smov (%p28_p4, %s722_s21), 0  ;;  %208 = sbr.rel (%p205_p3) target bundleno = 404 (0x194), region = 36 }
   0xa   : > { %s616_s6 = smov (!%p205_p3), 96   ;;  %s617_s14 = smov (!%p205_p3), 32  }
   0xe   : > { %s726_s16 = smov (!%p257_p5, %s602_s16), 2  ;;  %s728_s15 = smov (!%p247_p6, %s598_s15), 1  ;;  %vm304_vm0 = vcmask 261120   ;;  %vm365_vm1 = vcmask 519168  }
   0xf   : > { %s523_s22 = sshll.u32 %s726_s16, 4  ;;  %s499_s23 = sshll.u32 %s726_s16, 2 }
  0x10   : > { %s261_s26 = scalar_lea.vmem %s712_s2, %s523_s22  ;;  %s498_s27 = sshll.u32 %s728_s15, 1 }
  0x11   : > { %v527_v0 = vld [vmem:[%s261_s26 + $0x8] sm:$0xff]  ;;  %s676_s28 = sadd.s32 %s499_s23, %s498_s27  ;;  %s264_s5 = scalar_lea.vmem %s713_s3, %s726_s16  ;;  %v526_v1 = vld [vmem:[%s261_s26] sm:$0xff] }
  0x12   : > { %329 = vrot.lane.b32.xlu0 %v527_v0, %s616_s6  ;;  %314 = vmatpush.bf16.msra.mxu0 %v527_v0  ;;  %s521_s7 = sshll.u32 %s728_s15, 3  ;;  %v575_v2 = vld [vmem:[%s264_s5] ss:$0 sm:$0xff]  ;;  %s500_s15 = sshll.u32 %s676_s28, 2 }
  0x13   : > { %s251_s10 = scalar_lea.vmem %s710_s0, %s521_s7  ;;  %333 = vrot.lane.b32.xlu1 %v575_v2, %s616_s6  ;;  %s256_s13 = scalar_lea.vmem %s711_s1, %s521_s7 }
  0x14   : > { %v524_v3 = vld [vmem:[%s251_s10] sm:$0xff]  ;;  %s273_s23 = scalar_lea.vmem %s714_s4, %s500_s15 }
  0x15   : > { %v525_v6 = vld [vmem:[%s256_s13] sm:$0xff] }
  0x16   : > { %315 = vmatpush.bf16.msra.mxu0 %v526_v1 }
  0x19   : > { %513 = vmatmul.msk.bf16.vlgmr.msra.gmra.mxu0 %vm304_vm0, %v524_v3 }
  0x1a   : > { %327 = vrot.lane.b32.xlu0 %v526_v1, %s616_s6 }
  0x84   : > { %v330_v4 = vpop.permute.xlu0 %329 }
  0x85   : > { %345 = vmatpush.bf16.msra.mxu1 %v330_v4  ;;  %v334_v8 = vpop.permute.xlu1 %333 }
  0x8c   : > { %v328_v5 = vpop.permute.xlu0 %327 }
  0x8d   : > { %346 = vmatpush.bf16.msra.mxu1 %v328_v5 }
  0x90   : > { %518 = vmatmul.msk.bf16.vlgmr.msra.gmra.mxu1 %vm304_vm0, %v525_v6 }
  0x96   : > { %v317_v13 = vpop.f32.mrf.mxu0 }
  0x97   : > { %v318_v16 = vadd.f32 %v575_v2, %v317_v13 }
  0x9e   : > { %v319_v14 = vpop.f32.mrf.mxu0 }
  0x9f   : > { %v320_v17 = vadd.f32 %v575_v2, %v319_v14 }
 0x10d   : > { %v348_v7 = vpop.f32.mrf.mxu1 }
 0x10e   : > { %v349_v10 = vadd.f32 %v348_v7, %v334_v8 }
 0x115   : > { %v350_v9 = vpop.f32.mrf.mxu1 }
 0x116   : > { %v351_v11 = vadd.f32 %v350_v9, %v334_v8 }
 0x118   : > { %v570_v12 = vpack.i.bf16 %v351_v11, %v349_v10 }
 0x11a   : > { %571 = vrot.lane.b32.xlu1 %v570_v12, %s617_s14 }
 0x18c   : > { %v572_v15 = vpop.permute.xlu1 %571 }
 0x18d   : > { %v574_v18 = vunpack.i.h.bf16 %v572_v15  ;;  %v573_v19 = vunpack.i.l.bf16 %v572_v15 }
 0x18f   : > { %v361_v20 = vsel %vm304_vm0, %v318_v16, %v573_v19  ;;  %v362_v21 = vsel %vm304_vm0, %v320_v17, %v574_v18 }
 0x190   : > { %v363_v22 = vpack.c.bf16 %v361_v20, %v361_v20  ;;  %v364_v23 = vpack.c.bf16 %v362_v21, %v362_v21 }
 0x192   : > { %366 = vst.msk [vmem:[%s273_s23] sm:$0xf] %vm365_vm1, %v363_v22 }
 0x193   : > { %367 = vst.msk [vmem:[%s273_s23 + $0x4] sm:$0xf] %vm365_vm1, %v364_v23 }
 0x194 PF: > { %s14_s19 = sadd.s32 1, %s614_s19   ;;  %s715_s15 = smov %s606_s17 }
 0x195   : > { %p11_p7 = scmp.ge.s32.totalorder %s14_s19, 8   ;;  %s716_s16 = smov %s610_s18 }
 0x196   : > { %s717_s17 = smov %s720_s20  ;;  %s718_s18 = smov %s724_s21 }
 0x197   :  { %13 = sbr.rel (!%p11_p7) target bundleno = 3 (0x3), region = 75 }

// kernel: run.12
= control target key start
LH: loop header
LB: loop body
LE: loop exit
PB: predicated region body
PF: predicated region fallthrough
CT: control target
= control target key end

     0   :  { %vm52_vm0 = vcmask 261120   ;;  %s314_s1 = inlined_call_operand.vmem [shape: bf16[32,32], index: 1, kind: input, shape index: {}]   ;;  %s315_s0 = inlined_call_operand.vmem [shape: f32[20,32], index: 0, kind: input, shape index: {}]   ;;  %s316_s2 = inlined_call_operand.vmem [shape: f32[1,32], index: 2, kind: input, shape index: {}]   ;;  %s317_s4 = inlined_call_operand.vmem [shape: f32[1,32], index: 4, kind: input, shape index: {}]   ;;  %s318_s3 = inlined_call_operand.vmem [shape: bf16[32,32], index: 3, kind: input, shape index: {}]   ;;  %s319_s6 = inlined_call_operand.vmem [shape: f32[1,128], index: 6, kind: input, shape index: {}]   ;;  %s320_s5 = inlined_call_operand.vmem [shape: bf16[32,128], index: 5, kind: input, shape index: {}]   ;;  %s321_s7 = inlined_call_operand.vmem [shape: f32[20,128], index: 7, kind: output, shape index: {}]  }
   0x1   :  { %v213_v0 = vld [vmem:[%s314_s1 + $0x8] sm:$0xff]  ;;  %v212_v1 = vld [vmem:[%s314_s1] sm:$0xff]  ;;  %v29_v4 = vld [vmem:[%s315_s0 + $0x10] sm:$0xf] }
   0x2   :  { %65 = vmatpush.bf16.msra.mxu0 %v213_v0  ;;  %v27_v2 = vld [vmem:[%s315_s0] sm:$0xff]  ;;  %v28_v3 = vld [vmem:[%s315_s0 + $0x8] sm:$0xff]  ;;  %218 = vmatpush.bf16.msra.mxu3 %v213_v0  ;;  %v36_v6 = vpack.c.bf16 %v29_v4, %v29_v4 }
   0x3   :  { %v35_v5 = vpack.c.bf16 %v28_v3, %v27_v2  ;;  %v215_v7 = vld [vmem:[%s318_s3 + $0x8] sm:$0xff]  ;;  %v214_v8 = vld [vmem:[%s318_s3] sm:$0xff] }
   0x4   :  { %114 = vmatpush.bf16.msra.mxu1 %v215_v7  ;;  %v220_v10 = vld [vmem:[%s316_s2] ss:$0 sm:$0xff]  ;;  %v217_v22 = vld [vmem:[%s320_s5 + $0x8] sm:$0xff] }
   0x5   :  { %163 = vmatpush.bf16.msra.mxu2 %v217_v22  ;;  %v216_v23 = vld [vmem:[%s320_s5] sm:$0xff] }
   0x6   :  { %66 = vmatpush.bf16.msra.mxu0 %v212_v1  ;;  %219 = vmatpush.bf16.msra.mxu3 %v212_v1  ;;  %v221_v25 = vld [vmem:[%s317_s4] ss:$0 sm:$0xff] }
   0x7   :  { %v222_v37 = vld [vmem:[%s319_s6] ss:$0 sm:$0xff] }
   0x8   :  { %115 = vmatpush.bf16.msra.mxu1 %v214_v8 }
   0x9   :  { %190 = vmatmul.msk.bf16.vlgmr.msra.gmra.mxu0 %vm52_vm0, %v35_v5  ;;  %191 = vmatmul.msk.bf16.vlgmr.msra.gmra.mxu3 %vm52_vm0, %v36_v6 }
   0xa   :  { %164 = vmatpush.bf16.msra.mxu2 %v216_v23 }
  0x86   :  { %v68_v9 = vpop.f32.mrf.mxu0 }
  0x87   :  { %v69_v12 = vadd.f32 %v220_v10, %v68_v9 }
  0x89   :  { %v77_v15 = vmax.f32 %v69_v12, 0.0 }
  0x8c   :  { %v73_v11 = vpop.f32.mrf.mxu3 }
  0x8d   :  { %v74_v19 = vadd.f32 %v220_v10, %v73_v11 }
  0x8e   :  { %v70_v13 = vpop.f32.mrf.mxu0 }
  0x8f   :  { %v71_v14 = vadd.f32 %v220_v10, %v70_v13  ;;  %v79_v20 = vmax.f32 %v74_v19, 0.0 }
  0x91   :  { %v78_v16 = vmax.f32 %v71_v14, 0.0  ;;  %v86_v21 = vpack.c.bf16 %v79_v20, %v79_v20 }
  0x93   :  { %v85_v17 = vpack.c.bf16 %v78_v16, %v77_v15 }
  0x94   :  { %v75_v18 = vpop.f32.mrf.mxu3 }
  0x95   :  { %200 = vmatmul.msk.bf16.vlgmr.msra.gmra.mxu1 %vm52_vm0, %v85_v17 }
  0xa5   :  { %201 = vmatmul.msk.bf16.gmra.mxu1 %vm52_vm0, %v86_v21 }
 0x112   :  { %v117_v24 = vpop.f32.mrf.mxu1 }
 0x113   :  { %v118_v26 = vadd.f32 %v221_v25, %v117_v24 }
 0x115   :  { %v126_v29 = vmax.f32 %v118_v26, 0.0 }
 0x11a   :  { %v119_v27 = vpop.f32.mrf.mxu1 }
 0x11b   :  { %v120_v28 = vadd.f32 %v221_v25, %v119_v27 }
 0x11d   :  { %v127_v30 = vmax.f32 %v120_v28, 0.0 }
 0x11f   :  { %v134_v31 = vpack.c.bf16 %v127_v30, %v126_v29 }
 0x121   :  { %210 = vmatmul.msk.bf16.vlgmr.msra.gmra.mxu2 %vm52_vm0, %v134_v31 }
 0x122   :  { %v122_v32 = vpop.f32.mrf.mxu1 }
 0x123   :  { %v123_v33 = vadd.f32 %v221_v25, %v122_v32 }
 0x125   :  { %v128_v34 = vmax.f32 %v123_v33, 0.0 }
 0x127   :  { %v135_v36 = vpack.c.bf16 %v128_v34, %v128_v34 }
 0x12a   :  { %v124_v35 = vpop.f32.mrf.mxu1 }
 0x131   :  { %211 = vmatmul.msk.bf16.gmra.mxu2 %vm52_vm0, %v135_v36 }
 0x1a4   :  { %v166_v38 = vpop.f32.mrf.mxu2 }
 0x1a5   :  { %v167_v39 = vadd.f32 %v222_v37, %v166_v38 }
 0x1a7   :  { %175 = vst [vmem:[%s321_s7] sm:$0xff] %v167_v39 }
 0x1ac   :  { %v168_v40 = vpop.f32.mrf.mxu2 }
 0x1ad   :  { %v169_v41 = vadd.f32 %v222_v37, %v168_v40 }
 0x1af   :  { %176 = vst [vmem:[%s321_s7 + $0x8] sm:$0xff] %v169_v41 }
 0x1b4   :  { %v171_v42 = vpop.f32.mrf.mxu2 }
 0x1b5   :  { %v172_v43 = vadd.f32 %v222_v37, %v171_v42 }
 0x1b7   :  { %177 = vst [vmem:[%s321_s7 + $0x10] sm:$0xf] %v172_v43 }
 0x1bc   :  { %v173_v44 = vpop.f32.mrf.mxu2 }

// kernel: run.11
= control target key start
LH: loop header
LB: loop body
LE: loop exit
PB: predicated region body
PF: predicated region fallthrough
CT: control target
= control target key end

     0   :  { %s2252_s24 = smov 0   ;;  %s2254_s25 = smov 0   ;;  %s2671_s0 = inlined_call_operand.vmem [shape: f32[2,10,32], index: 0, kind: input, shape index: {}]   ;;  %s2672_s1 = inlined_call_operand.vmem [shape: f32[2,10,4], index: 1, kind: input, shape index: {}]   ;;  %s2673_s2 = inlined_call_operand.vmem [shape: bf16[2,16,64], index: 2, kind: input, shape index: {}]   ;;  %s2674_s3 = inlined_call_operand.vmem [shape: f32[4,64], index: 3, kind: input, shape index: {}]   ;;  %s2675_s4 = inlined_call_operand.vmem [shape: f32[1,64], index: 4, kind: input, shape index: {}]   ;;  %s2676_s5 = inlined_call_operand.vmem [shape: bf16[96,32], index: 5, kind: input, shape index: {}]   ;;  %s2677_s6 = inlined_call_operand.vmem [shape: f32[2,32], index: 6, kind: input, shape index: {}]   ;;  %s2678_s7 = inlined_call_operand.vmem [shape: bf16[32,128], index: 7, kind: input, shape index: {}]   ;;  %s2679_s8 = inlined_call_operand.vmem [shape: f32[1,128], index: 8, kind: input, shape index: {}]   ;;  %s2680_s9 = inlined_call_operand.vmem [shape: bf16[32,64], index: 9, kind: input, shape index: {}]   ;;  %s2681_s10 = inlined_call_operand.vmem [shape: f32[1,64], index: 10, kind: input, shape index: {}]   ;;  %s2682_s11 = inlined_call_operand.vmem [shape: bf16[32,64], index: 11, kind: input, shape index: {}]   ;;  %s2683_s12 = inlined_call_operand.vmem [shape: f32[1,64], index: 12, kind: input, shape index: {}]   ;;  %s2684_s13 = inlined_call_operand.vmem [shape: bf16[64,32], index: 13, kind: input, shape index: {}]   ;;  %s2685_s14 = inlined_call_operand.vmem [shape: f32[1,32], index: 14, kind: input, shape index: {}]   ;;  %s2686_s15 = inlined_call_operand.vmem [shape: f32[8,32], index: 15, kind: input, shape index: {}]   ;;  %s2687_s16 = inlined_call_operand.vmem [shape: f32[2,10,32], index: 16, kind: output, shape index: {0}]   ;;  %s2688_s17 = inlined_call_operand.vmem [shape: f32[2,10,32], index: 17, kind: output, shape index: {1}]  }
   0x1   :  { %2689 = sst [smem:[#allocation2_spill]] %s2671_s0  ;;  %s2256_s26 = smov 0  }
   0x2   :  { %2690 = sst [smem:[#allocation3_spill]] %s2672_s1 }
   0x3 LB: > { %s40_s27 = sadd.s32 1, %s2145_s25  ;;  %p1927_p0 = scmp.ge.s32.totalorder %s2149_s26, 1  ;;  %s2149_s26 = sphi %s2256_s26, %s28_s26   ;;  %s2145_s25 = sphi %s2254_s25, %s2698_s25   ;;  %s2141_s24 = sphi %s2252_s24, %s2697_s24  }
   0x4   : > { %p42_p1 = scmp.ge.s32.totalorder %s40_s27, 2  ;;  %p540_p2 = scmp.lt.s32.totalorder %s2149_s26, 3 }
   0x6   : > { %s2700_s27 = smov (%p42_p1, %s40_s27), 0  ;;  %p541_p3 = pnand %p1927_p0, %p540_p2 }
   0x7   : > { %p624_p4 = scmp.lt.s32.totalorder (!%p541_p3), %s2141_s24, 1  ;;  %s2691_s19 = sld [smem:[#allocation3_spill]] (!%p541_p3) }
   0x8   : > { %544 = sbr.rel (%p541_p3) target bundleno = 3554 (0xde2), region = 84  ;;  %s2158_s30 = smov (!%p541_p3), 96  }
   0x9   : > { %s2696_s29 = sld [smem:[#allocation2_spill]] (!%p541_p3) }
   0xd   : > { %v673_v0 = vld [vmem:[%s2674_s3] sm:$0xf]  ;;  %vm699_vm0 = vcmask 1043456   ;;  %s2702_s24 = smov (!%p624_p4, %s2141_s24), 1  ;;  %vm692_vm1 = vcmask 31744  }
   0xe   : > { %1938 = vmatpush.msk.msra.mxu0 %vm699_vm0, %v673_v0  ;;  %s2276_s0 = sshll.u32 %s2702_s24, 4  ;;  %v2088_v3 = vld [vmem:[%s2675_s4] ss:$0 sm:$0xff]  ;;  %v2151_v25 = vmov 683565275  }
   0xf   : > { %s641_s1 = scalar_lea.vmem %s2691_s19, %s2276_s0  ;;  %v2152_v27 = vmov 2475754826   ;;  %v2153_v29 = vmov 2131351028   ;;  %v2154_v31 = vmov 2102212464   ;;  %s631_s18 = scalar_lea.vmem %s2696_s29, %s2276_s0 }
  0x10   : > { %v671_v1 = vld [vmem:[%s641_s1] sm:$0xff]  ;;  %v672_v2 = vld [vmem:[%s641_s1 + $0x8] sm:$0x3]  ;;  %v2155_v36 = vmov 920167782   ;;  %s2159_s19 = smov 64   ;;  %s666_s22 = scalar_lea.vmem %s2688_s17, %s2276_s0 }
  0x11   : > { %1939 = vmatmul.msk.f32.vlgmr.msra.gmra.mxu0 %vm692_vm1, %v671_v1  ;;  %v2156_v39 = vmov 1326507024   ;;  %s2160_s1 = smov 32  }
  0x19   : > { %1940 = vmatmul.msk.f32.gmra.mxu0 %vm692_vm1, %v672_v2 }
  0x8e   : > { %v720_v4 = vpop.f32.mrf.mxu0 }
  0x8f   : > { %v2285_v5 = vadd.f32 %v2088_v3, %v720_v4 }
  0x91   : > { %v726_v6 = vand.u32 2147483647, %v2285_v5  ;;  %v729_v7 = vand.u32 2139095040, %v2285_v5 }
  0x93   : > { %v730_v8 = vshrl.u32 %v729_v7, 23  ;;  %v733_v9 = vand.u32 8388607, %v726_v6 }
  0x95   : > { %v1941_v10 = vadd.s32 4294967169, %v730_v8  ;;  %v734_v11 = vor.u32 8388608, %v733_v9 }
  0x96   : > { %v723_v12 = vpop.f32.mrf.mxu0 }
  0x97   : > { %v736_v13 = vadd.s32 1, %v1941_v10  ;;  %v2291_v14 = vadd.f32 %v2088_v3, %v723_v12  ;;  %v2293_v15 = vshll.u32 %v734_v11, 8 }
  0x99   : > { %vm737_vm2 = vcmp.gt.s32.totalorder %v736_v13, 0  ;;  %v880_v16 = vand.u32 2147483647, %v2291_v14  ;;  %v883_v18 = vand.u32 2139095040, %v2291_v14  ;;  %v775_v22 = vand.u32 65535, %v2293_v15 }
  0x9a   : > { %v738_v17 = vsel %vm737_vm2, %v736_v13, 0  ;;  %v776_v61 = vshrl.u32 %v2293_v15, 16 }
  0x9b   : > { %v740_v19 = vand.u32 31, %v738_v17  ;;  %v739_v20 = vshrl.u32 %v738_v17, 5  ;;  %v884_v23 = vshrl.u32 %v883_v18, 23  ;;  %v887_v24 = vand.u32 8388607, %v880_v16 }
  0x9d   : > { %v741_v21 = vsub.s32 32, %v740_v19  ;;  %v743_v26 = vshll.u32 %v2151_v25, %v740_v19  ;;  %v746_v28 = vshll.u32 %v2152_v27, %v740_v19  ;;  %v749_v30 = vshll.u32 %v2153_v29, %v740_v19 }
  0x9e   : > { %v752_v32 = vshll.u32 %v2154_v31, %v740_v19  ;;  %v755_v37 = vshll.u32 %v2155_v36, %v740_v19  ;;  %vm758_vm3 = vcmp.lt.s32.totalorder %v739_v20, 1  ;;  %vm759_vm4 = vcmp.lt.s32.totalorder %v739_v20, 2 }
  0x9f   : > { %v744_v33 = vshrl.u32 %v2152_v27, %v741_v21  ;;  %v747_v34 = vshrl.u32 %v2153_v29, %v741_v21  ;;  %v750_v35 = vshrl.u32 %v2154_v31, %v741_v21  ;;  %v753_v38 = vshrl.u32 %v2155_v36, %v741_v21 }
  0xa0   : > { %v756_v40 = vshrl.u32 %v2156_v39, %v741_v21  ;;  %v1944_v44 = vadd.s32 4294967169, %v884_v23  ;;  %v742_v45 = vshrl.u32 %v2151_v25, %v741_v21  ;;  %vm761_vm5 = vcmp.lt.s32.totalorder %v739_v20, 4 }
  0xa1   : > { %v745_v41 = vor.u32 %v744_v33, %v743_v26  ;;  %v748_v42 = vor.u32 %v747_v34, %v746_v28  ;;  %v751_v43 = vor.u32 %v750_v35, %v749_v30  ;;  %v754_v46 = vor.u32 %v753_v38, %v752_v32 }
  0xa2   : > { %v757_v47 = vor.u32 %v756_v40, %v755_v37  ;;  %vm760_vm6 = vcmp.lt.s32.totalorder %v739_v20, 3  ;;  %v888_v53 = vor.u32 8388608, %v887_v24  ;;  %v890_v54 = vadd.s32 1, %v1944_v44 }
  0xa3   : > { %v763_v48 = vsel %vm761_vm5, %v751_v43, 2102212464  ;;  %v766_v49 = vsel %vm758_vm3, %v745_v41, %v748_v42  ;;  %v770_v50 = vsel %vm758_vm3, %v748_v42, %v751_v43  ;;  %v767_v51 = vsel %vm761_vm5, %v754_v46, 920167782 }
  0xa4   : > { %v771_v52 = vsel %vm761_vm5, %v757_v47, 1326507024  ;;  %v762_v55 = vsel %vm758_vm3, %v742_v45, %v745_v41  ;;  %v764_v56 = vsel %vm760_vm6, %v748_v42, %v763_v48  ;;  %v768_v57 = vsel %vm760_vm6, %v751_v43, %v767_v51 }
  0xa5   : > { %v772_v58 = vsel %vm760_vm6, %v754_v46, %v771_v52  ;;  %v769_v59 = vsel %vm759_vm4, %v766_v49, %v768_v57  ;;  %vm891_vm7 = vcmp.gt.s32.totalorder %v890_v54, 0  ;;  %v2318_v2 = vsel %vm759_vm4, %v762_v55, %v764_v56 }
  0xa6   : > { %v773_v60 = vsel %vm759_vm4, %v770_v50, %v772_v58  ;;  %v799_v0 = vand.u32 65535, %v769_v59  ;;  %v800_v1 = vshrl.u32 %v769_v59, 16  ;;  %v892_v7 = vsel %vm891_vm7, %v890_v54, 0 }
  0xa7   : > { %v777_v62 = vand.u32 65535, %v773_v60  ;;  %v778_v63 = vshrl.u32 %v773_v60, 16  ;;  %v2320_v8 = vshll.u32 %v888_v53, 8  ;;  %v894_v30 = vand.u32 31, %v892_v7 }
  0xa8   : > { %v802_v11 = vmul.u32 %v800_v1, %v775_v22  ;;  %v803_v12 = vmul.u32 %v799_v0, %v776_v61  ;;  %v801_v18 = vmul.u32 %v799_v0, %v775_v22  ;;  %v804_v19 = vmul.u32 %v800_v1, %v776_v61 }
  0xa9   : > { %v780_v3 = vmul.u32 %v778_v63, %v775_v22  ;;  %v781_v4 = vmul.u32 %v777_v62, %v776_v61  ;;  %v779_v9 = vmul.u32 %v777_v62, %v775_v22  ;;  %v782_v10 = vmul.u32 %v778_v63, %v776_v61 }
  0xaa   : > { %v805_v24 = vshll.u32 %v802_v11, 16  ;;  %v806_v26 = vshrl.u32 %v802_v11, 16  ;;  %v807_v28 = vshll.u32 %v803_v12, 16  ;;  %v2157_v32 = vmov 0  }
  0xab   : > { %v783_v13 = vshll.u32 %v780_v3, 16  ;;  %v784_v17 = vshrl.u32 %v780_v3, 16  ;;  %v785_v21 = vshll.u32 %v781_v4, 16  ;;  %v786_v23 = vshrl.u32 %v781_v4, 16 }
  0xac   : > { %v808_v34 = vshrl.u32 %v803_v12, 16  ;;  %vm809_vm9 = vc.u32 %v801_v18, %v805_v24  ;;  %v811_v35 = vadd.s32 %v805_v24, %v801_v18  ;;  %v2324_v22 = vsub.s32 32, %v894_v30 }
  0xad   : > { %vm787_vm8 = vc.u32 %v779_v9, %v783_v13  ;;  %v789_v20 = vadd.s32 %v783_v13, %v779_v9  ;;  %v810_v38 = vsel %vm809_vm9, 1, %v2157_v32  ;;  %v2327_v42 = vshrl.u32 %v892_v7, 5 }
  0xae   : > { %v788_v33 = vsel %vm787_vm8, 1, %v2157_v32  ;;  %v812_v41 = vadd.s32 %v810_v38, %v804_v19  ;;  %vm813_vm11 = vc.u32 %v811_v35, %v807_v28  ;;  %v2330_v45 = vadd.s32 %v811_v35, %v807_v28 }
  0xaf   : > { %v790_v37 = vadd.s32 %v788_v33, %v782_v10  ;;  %vm791_vm10 = vc.u32 %v789_v20, %v785_v21  ;;  %v814_v44 = vsel %vm813_vm11, 1, %v2157_v32  ;;  %v897_v46 = vshll.u32 %v2151_v25, %v894_v30 }
  0xb0   : > { %v792_v40 = vsel %vm791_vm10, 1, %v2157_v32  ;;  %v816_v47 = vadd.s32 %v814_v44, %v812_v41  ;;  %v898_v48 = vshrl.u32 %v2152_v27, %v2324_v22  ;;  %v900_v49 = vshll.u32 %v2152_v27, %v894_v30 }
  0xb1   : > { %v794_v43 = vadd.s32 %v792_v40, %v790_v37  ;;  %v901_v50 = vshrl.u32 %v2153_v29, %v2324_v22  ;;  %v903_v52 = vshll.u32 %v2153_v29, %v894_v30  ;;  %v904_v53 = vshrl.u32 %v2154_v31, %v2324_v22 }
  0xb2   : > { %v906_v54 = vshll.u32 %v2154_v31, %v894_v30  ;;  %v817_v55 = vadd.s32 %v816_v47, %v806_v26  ;;  %v2342_v56 = vor.u32 %v898_v48, %v897_v46  ;;  %v907_v58 = vshrl.u32 %v2155_v36, %v2324_v22 }
  0xb3   : > { %v795_v51 = vadd.s32 %v794_v43, %v784_v17  ;;  %v2344_v57 = vor.u32 %v901_v50, %v900_v49  ;;  %v905_v59 = vor.u32 %v904_v53, %v903_v52  ;;  %v909_v60 = vshll.u32 %v2155_v36, %v894_v30 }
  0xb4   : > { %v910_v29 = vshrl.u32 %v2156_v39, %v2324_v22  ;;  %v818_v61 = vadd.s32 %v817_v55, %v808_v34  ;;  %v908_v62 = vor.u32 %v907_v58, %v906_v54  ;;  %v819_v31 = vmul.u32 %v2293_v15, %v2318_v2 }
  0xb5   : > { %v2348_v27 = vadd.s32 %v795_v51, %v786_v23  ;;  %vm912_vm13 = vcmp.lt.s32.totalorder %v2327_v42, 1  ;;  %vm915_vm14 = vcmp.lt.s32.totalorder %v2327_v42, 4  ;;  %v929_v39 = vand.u32 65535, %v2320_v8 }
  0xb6   : > { %v911_v63 = vor.u32 %v910_v29, %v909_v60  ;;  %v822_v0 = vadd.s32 1, %v818_v61  ;;  %v920_v36 = vsel %vm912_vm13, %v2342_v56, %v2344_v57  ;;  %vm914_vm15 = vcmp.lt.s32.totalorder %v2327_v42, 3 }
  0xb7   : > { %vm821_vm12 = vc.u32 %v2348_v27, %v2330_v45  ;;  %v921_v15 = vsel %vm915_vm14, %v908_v62, 920167782  ;;  %v924_v1 = vsel %vm912_vm13, %v2344_v57, %v905_v59  ;;  %vm913_vm0 = vcmp.lt.s32.totalorder %v2327_v42, 2 }
  0xb8   : > { %v925_v2 = vsel %vm915_vm14, %v911_v63, 1326507024  ;;  %v823_v3 = vsel %vm821_vm12, %v822_v0, %v818_v61  ;;  %v922_v4 = vsel %vm914_vm15, %v905_v59, %v921_v15  ;;  %v930_v12 = vshrl.u32 %v2320_v8, 16 }
  0xb9   : > { %v926_v7 = vsel %vm914_vm15, %v908_v62, %v925_v2  ;;  %v824_v9 = vadd.s32 %v823_v3, %v819_v31  ;;  %v923_v10 = vsel %vm913_vm0, %v920_v36, %v922_v4  ;;  %v917_v54 = vsel %vm915_vm14, %v905_v59, 2102212464 }
  0xba   : > { %v927_v11 = vsel %vm913_vm0, %v924_v1, %v926_v7  ;;  %v953_v18 = vand.u32 65535, %v923_v10  ;;  %v954_v19 = vshrl.u32 %v923_v10, 16  ;;  %v896_v29 = vshrl.u32 %v2151_v25, %v2324_v22 }
  0xbb   : > { %v931_v13 = vand.u32 65535, %v927_v11  ;;  %v932_v17 = vshrl.u32 %v927_v11, 16  ;;  %v825_v21 = vadd.s32 536870912, %v824_v9  ;;  %v918_v59 = vsel %vm914_vm15, %v2344_v57, %v917_v54 }
  0xbc   : > { %v956_v20 = vmul.u32 %v954_v19, %v929_v39  ;;  %v957_v33 = vmul.u32 %v953_v18, %v930_v12  ;;  %v955_v37 = vmul.u32 %v953_v18, %v929_v39  ;;  %v958_v43 = vmul.u32 %v954_v19, %v930_v12 }
  0xbd   : > { %v934_v23 = vmul.u32 %v932_v17, %v929_v39  ;;  %v935_v24 = vmul.u32 %v931_v13, %v930_v12  ;;  %v2382_v26 = vshrl.u32 %v825_v21, 30  ;;  %v933_v28 = vmul.u32 %v931_v13, %v929_v39 }
  0xbe   : > { %v936_v35 = vmul.u32 %v932_v17, %v930_v12  ;;  %v959_v38 = vshll.u32 %v956_v20, 16  ;;  %v961_v49 = vshll.u32 %v957_v33, 16  ;;  %v960_v0 = vshrl.u32 %v956_v20, 16 }
  0xbf   : > { %v937_v30 = vshll.u32 %v934_v23, 16  ;;  %v827_v34 = vshll.u32 %v2382_v26, 30  ;;  %v939_v40 = vshll.u32 %v935_v24, 16  ;;  %v938_v55 = vshrl.u32 %v934_v23, 16 }
  0xc0   : > { %vm963_vm2 = vc.u32 %v955_v37, %v959_v38  ;;  %v965_v47 = vadd.s32 %v959_v38, %v955_v37  ;;  %v940_v61 = vshrl.u32 %v935_v24, 16  ;;  %v916_v39 = vsel %vm912_vm13, %v896_v29, %v2342_v56  ;;  %v2039_v24 = vld [vmem:[%s2676_s5 + $0x18] sm:$0xff] }
  0xc1   : > { %vm941_vm1 = vc.u32 %v933_v28, %v937_v30  ;;  %v943_v41 = vadd.s32 %v937_v30, %v933_v28  ;;  %v828_v44 = vsub.s32 %v824_v9, %v827_v34  ;;  %v964_v50 = vsel %vm963_vm2, 1, %v2157_v32  ;;  %1068 = vmatpush.bf16.msra.mxu1 %v2039_v24 }
  0xc2   : > { %v942_v46 = vsel %vm941_vm1, 1, %v2157_v32  ;;  %v966_v53 = vadd.s32 %v964_v50, %v958_v43  ;;  %vm967_vm5 = vc.u32 %v965_v47, %v961_v49  ;;  %v962_v2 = vshrl.u32 %v957_v33, 16 }
  0xc3   : > { %v944_v48 = vadd.s32 %v942_v46, %v936_v35  ;;  %vm945_vm3 = vc.u32 %v943_v41, %v939_v40  ;;  %vm829_vm4 = vcmp.lt.s32.totalorder %v828_v44, 0  ;;  %v830_v51 = vsub.s32 0, %v828_v44  ;;  %v2037_v35 = vld [vmem:[%s2676_s5 + $0x8] sm:$0xff] }
  0xc4   : > { %v946_v52 = vsel %vm945_vm3, 1, %v2157_v32  ;;  %v968_v62 = vsel %vm967_vm5, 1, %v2157_v32  ;;  %v969_v25 = vadd.s32 %v965_v47, %v961_v49  ;;  %v919_v32 = vsel %vm913_vm0, %v916_v39, %v918_v59  ;;  %v2036_v47 = vld [vmem:[%s2676_s5] sm:$0xff] }
  0xc5   : > { %v948_v58 = vadd.s32 %v946_v52, %v944_v48  ;;  %v831_v60 = vsel %vm829_vm4, %v830_v51, %v828_v44  ;;  %v970_v36 = vadd.s32 %v968_v62, %v966_v53  ;;  %v820_v7 = vadd.s32 %v2330_v45, %v2348_v27 }
  0xc6   : > { %v832_v31 = vclz %v831_v60  ;;  %v973_v57 = vmul.u32 %v2320_v8, %v919_v32  ;;  %v2038_v8 = vld [vmem:[%s2676_s5 + $0x10] sm:$0xff]  ;;  %vm728_vm8 = vcmp.lt.s32.totalorder %v2285_v5, 0  ;;  %vm2419_vm10 = vcmp.le.f32.partialorder %v726_v6, 0.7853982 }
  0xc7   : > { %v949_v63 = vadd.s32 %v948_v58, %v938_v55  ;;  %v971_v3 = vadd.s32 %v970_v36, %v960_v0  ;;  %1069 = vmatpush.bf16.msra.mxu1 %v2038_v8  ;;  %vm882_vm12 = vcmp.lt.s32.totalorder %v2291_v14, 0  ;;  %vm2434_vm13 = vcmp.le.f32.partialorder %v880_v16, 0.7853982 }
  0xc8   : > { %v1942_v15 = vadd.s32 4294967294, %v832_v31  ;;  %vm869_vm4 = vweird.f32 %v2285_v5  ;;  %vm1023_vm5 = vweird.f32 %v2291_v14 }
  0xc9   : > { %v950_v1 = vadd.s32 %v949_v63, %v940_v61  ;;  %v972_v22 = vadd.s32 %v971_v3, %v962_v2 }
  0xca   : > { %vm1943_vm6 = vcmp.lt.s32.totalorder %v1942_v15, 0 }
  0xcb   : > { %v835_v4 = vsel %vm1943_vm6, 0, %v1942_v15  ;;  %vm975_vm7 = vc.u32 %v950_v1, %v969_v25  ;;  %v976_v10 = vadd.s32 1, %v972_v22  ;;  %1070 = vmatpush.bf16.msra.mxu1 %v2037_v35  ;;  %v974_v50 = vadd.s32 %v969_v25, %v950_v1  ;;  %v2499_v1 = vld [vmem:[%s631_s18 + $0x8] sm:$0x3] }
  0xcc   : > { %v836_v56 = vsub.s32 32, %v835_v4  ;;  %v840_v9 = vsub.s32 4294967266, %v835_v4  ;;  %v837_v11 = vshll.u32 %v828_v44, %v835_v4  ;;  %vm1060_vm6 = vcmask 523264  }
  0xcd   : > { %v977_v17 = vsel %vm975_vm7, %v976_v10, %v972_v22  ;;  %v850_v22 = vsub.s32 4, %v2382_v26  ;;  %vm1094_vm7 = vcmask 261120  }
  0xce   : > { %v838_v12 = vshrl.u32 %v820_v7, %v836_v56  ;;  %v841_v13 = vadd.s32 127, %v840_v9  ;;  %v978_v18 = vadd.s32 %v977_v17, %v973_v57 }
  0xcf   : > { %1071 = vmatpush.bf16.msra.mxu1 %v2036_v47  ;;  %v851_v16 = vsel %vm728_vm8, %v850_v22, %v2382_v26 }
  0xd0   : > { %v839_v19 = vor.u32 %v838_v12, %v837_v11  ;;  %v842_v21 = vshll.u32 %v841_v13, 23  ;;  %v979_v42 = vadd.s32 536870912, %v978_v18  ;;  %v853_v17 = vsel %vm2419_vm10, 0, %v851_v16 }
  0xd2   : > { %v843_v23 = vor.u32 4788187, %v842_v21  ;;  %v2407_v20 = vshrl.u32 %v979_v42, 30  ;;  %v846_v27 = vcvt.s32.f32 %v839_v19 }
  0xd4   : > { %v844_v45 = vand.u32 2147483647, %v843_v23  ;;  %v981_v28 = vshll.u32 %v2407_v20, 30  ;;  %v1004_v57 = vsub.s32 4, %v2407_v20 }
  0xd6   : > { %v847_v30 = vmul.f32 %v846_v27, %v844_v45  ;;  %v982_v33 = vsub.s32 %v978_v18, %v981_v28  ;;  %v1005_v42 = vsel %vm882_vm12, %v1004_v57, %v2407_v20  ;;  %v870_v27 = vand.u32 3, %v853_v17 }
  0xd7   : > { %v1007_v8 = vsel %vm2434_vm13, 0, %v1005_v42 }
  0xd8   : > { %v848_v34 = vxor.u32 2147483648, %v847_v30  ;;  %vm983_vm9 = vcmp.lt.s32.totalorder %v982_v33, 0  ;;  %v984_v37 = vsub.s32 0, %v982_v33  ;;  %vm872_vm14 = vcmp.eq.s32.totalorder %v870_v27, 0 }
  0xd9   : > { %vm875_vm15 = vcmp.eq.s32.totalorder %v870_v27, 2  ;;  %vm871_vm0 = vcmp.lt.s32.totalorder %v870_v27, 2 }
  0xda   : > { %v849_v40 = vsel %vm728_vm8, %v848_v34, %v847_v30  ;;  %v985_v43 = vsel %vm983_vm9, %v984_v37, %v982_v33  ;;  %v1024_v37 = vand.u32 3, %v1007_v8  ;;  %vm1224_vm8 = vcmask 80896  }
  0xdb   : > { %v852_v41 = vsel %vm2419_vm10, %v2285_v5, %v849_v40  ;;  %v986_v46 = vclz %v985_v43  ;;  %v2467_v5 = vld [vmem:[%s2678_s7 + $0x8] sm:$0xff]  ;;  %vm1228_vm9 = vcmask 74752   ;;  %vm1253_vm10 = vcmask 1044480  }
  0xdc   : > { %v854_v44 = vmul.f32 %v852_v41, %v852_v41  ;;  %vm1026_vm1 = vcmp.eq.s32.totalorder %v1024_v37, 0  ;;  %vm1029_vm2 = vcmp.eq.s32.totalorder %v1024_v37, 2  ;;  %vm1025_vm3 = vcmp.lt.s32.totalorder %v1024_v37, 2  ;;  %1154 = vrot.lane.b32.xlu0 %v2467_v5, %s2158_s30  ;;  %1144 = vmatpush.bf16.msra.mxu3 %v2467_v5 }
  0xdd   : > { %v1945_v48 = vadd.s32 4294967294, %v986_v46 }
  0xde   : > { %v862_v6 = vmul.f32 -0.00019511016, %v854_v44  ;;  %v855_v61 = vmul.f32 -0.001358992, %v854_v44 }
  0xdf   : > { %vm1946_vm11 = vcmp.lt.s32.totalorder %v1945_v48, 0 }
  0xe0   : > { %v989_v49 = vsel %vm1946_vm11, 0, %v1945_v48  ;;  %v863_v58 = vadd.f32 0.008332121, %v862_v6  ;;  %v856_v36 = vadd.f32 0.041655596, %v855_v61  ;;  %vm1305_vm11 = vcmask 254976  }
  0xe1   : > { %v990_v51 = vsub.s32 32, %v989_v49  ;;  %v994_v52 = vsub.s32 4294967266, %v989_v49  ;;  %v991_v53 = vshll.u32 %v982_v33, %v989_v49 }
  0xe2   : > { %v864_v31 = vmul.f32 %v863_v58, %v854_v44  ;;  %v857_v2 = vmul.f32 %v856_v36, %v854_v44  ;;  %v2487_v36 = vld [vmem:[%s2679_s8] ss:$0 sm:$0xff] }
  0xe3   : > { %v992_v54 = vshrl.u32 %v974_v50, %v990_v51  ;;  %v995_v55 = vadd.s32 127, %v994_v52  ;;  %v2041_v51 = vld [vmem:[%s2676_s5 + $0x28] sm:$0xff]  ;;  %v2040_v52 = vld [vmem:[%s2676_s5 + $0x20] sm:$0xff]  ;;  %1158 = vrot.lane.b32.xlu1 %v2487_v36, %s2158_s30 }
  0xe4   : > { %v865_v59 = vadd.f32 -0.16666654, %v864_v31  ;;  %v858_v7 = vadd.f32 -0.4999988, %v857_v2  ;;  %1104 = vmatpush.bf16.msra.mxu2 %v2041_v51  ;;  %v2497_v2 = vld [vmem:[%s631_s18] sm:$0xff]  ;;  %s2033_s18 = sshll.u32 %s2702_s24, 3 }
  0xe5   : > { %v993_v60 = vor.u32 %v992_v54, %v991_v53  ;;  %v996_v29 = vshll.u32 %v995_v55, 23  ;;  %v688_v53 = vld [vmem:[%s2677_s6] sm:$0x3]  ;;  %s647_s20 = scalar_lea.vmem %s2673_s2, %s2033_s18 }
  0xe6   : > { %v866_v25 = vmul.f32 %v865_v59, %v854_v44  ;;  %v859_v11 = vmul.f32 %v858_v7, %v854_v44  ;;  %v1035_v55 = vperm.slane %v688_v53, 0  ;;  %v1081_v59 = vperm.slane %v688_v53, 1 }
  0xe7   : > { %v997_v62 = vor.u32 4788187, %v996_v29  ;;  %v1000_v0 = vcvt.s32.f32 %v993_v60 }
  0xe8   : > { %v867_v56 = vadd.f32 1.0, %v866_v25  ;;  %v860_v23 = vadd.f32 1.0, %v859_v11  ;;  %1105 = vmatpush.bf16.msra.mxu2 %v2040_v52 }
  0xe9   : > { %v998_v63 = vand.u32 2147483647, %v997_v62 }
  0xea   : > { %v868_v18 = vmul.f32 %v867_v56, %v852_v41  ;;  %v876_v33 = vxor.u32 2147483648, %v860_v23 }
  0xeb   : > { %v1001_v39 = vmul.f32 %v1000_v0, %v998_v63  ;;  %1178 = vrot.lane.b32.xlu1 %v2467_v5, %s2159_s19 }
  0xec   : > { %v873_v26 = vxor.u32 2147483648, %v868_v18  ;;  %v877_v20 = vsel %vm875_vm15, %v876_v33, %v868_v18 }
  0xed   : > { %v1002_v15 = vxor.u32 2147483648, %v1001_v39 }
  0xee   : > { %v874_v38 = vsel %vm872_vm14, %v860_v23, %v873_v26  ;;  %v1175_v23 = vpack.c.bf16 %v2499_v1, %v2497_v2 }
  0xef   : > { %v1003_v3 = vsel %vm882_vm12, %v1002_v15, %v1001_v39  ;;  %v878_v44 = vsel %vm871_vm0, %v874_v38, %v877_v20 }
  0xf0   : > { %v1006_v32 = vsel %vm2434_vm13, %v2291_v14, %v1003_v3  ;;  %v879_v6 = vsel %vm869_vm4, nan, %v878_v44  ;;  %v2475_v14 = vld [vmem:[%s2678_s7] sm:$0xff]  ;;  %vm1432_vm4 = vcmask 123904  }
  0xf1   : > { %v1008_v4 = vmul.f32 %v1006_v32, %v1006_v32  ;;  %1145 = vmatpush.bf16.msra.mxu3 %v2475_v14  ;;  %1152 = vrot.lane.b32.xlu0 %v2475_v14, %s2158_s30 }
  0xf2   : > { %1176 = vrot.lane.b32.xlu2 %v2475_v14, %s2159_s19 }
  0xf3   : > { %v1009_v9 = vmul.f32 -0.001358992, %v1008_v4  ;;  %v1016_v10 = vmul.f32 -0.00019511016, %v1008_v4 }
  0xf5   : > { %v1010_v12 = vadd.f32 0.041655596, %v1009_v9  ;;  %v1017_v13 = vadd.f32 0.008332121, %v1016_v10 }
  0xf7   : > { %v1011_v19 = vmul.f32 %v1010_v12, %v1008_v4  ;;  %v1018_v21 = vmul.f32 %v1017_v13, %v1008_v4 }
  0xf9   : > { %v1012_v24 = vadd.f32 -0.4999988, %v1011_v19  ;;  %v1019_v45 = vadd.f32 -0.16666654, %v1018_v21 }
  0xfb   : > { %v1013_v28 = vmul.f32 %v1012_v24, %v1008_v4  ;;  %v1020_v30 = vmul.f32 %v1019_v45, %v1008_v4 }
  0xfd   : > { %v1014_v34 = vadd.f32 1.0, %v1013_v28  ;;  %v1021_v35 = vadd.f32 1.0, %v1020_v30 }
  0xff   : > { %v1022_v40 = vmul.f32 %v1021_v35, %v1006_v32  ;;  %v1030_v41 = vxor.u32 2147483648, %v1014_v34 }
 0x101   : > { %v1027_v43 = vxor.u32 2147483648, %v1022_v40  ;;  %v1031_v47 = vsel %vm1029_vm2, %v1030_v41, %v1022_v40 }
 0x103   : > { %v1028_v46 = vsel %vm1026_vm1, %v1014_v34, %v1027_v43 }
 0x104   : > { %v1032_v48 = vsel %vm1025_vm3, %v1028_v46, %v1031_v47  ;;  %vm1428_vm3 = vcmask 130048  }
 0x105   : > { %v1033_v49 = vsel %vm1023_vm5, nan, %v1032_v48 }
 0x106   : > { %v1034_v50 = vpack.c.bf16 %v1033_v49, %v879_v6 }
 0x108   : > { %1963 = vmatmul.msk.bf16.vlgmr.msra.gmra.mxu1 %vm1060_vm6, %v1034_v50 }
 0x14c   : > { %v1177_v42 = vpop.permute.xlu2 %1176 }
 0x14e   : > { %v1155_v63 = vpop.permute.xlu0 %1154 }
 0x14f   : > { %1167 = vmatpush.bf16.msrb.mxu0 %v1155_v63 }
 0x155   : > { %v1159_v56 = vpop.permute.xlu1 %1158 }
 0x15d   : > { %v1179_v21 = vpop.permute.xlu1 %1178 }
 0x15e   : > { %1194 = vmatpush.bf16.msrb.mxu2 %v1179_v21 }
 0x162   : > { %1195 = vmatpush.bf16.msrb.mxu2 %v1177_v42 }
 0x163   : > { %v1153_v0 = vpop.permute.xlu0 %1152 }
 0x164   : > { %1168 = vmatpush.bf16.msrb.mxu0 %v1153_v0 }
 0x185   : > { %v1073_v54 = vpop.f32.mrf.mxu1 }
 0x186   : > { %v1074_v58 = vadd.f32 %v1073_v54, %v1035_v55 }
 0x188   : > { %v1078_v61 = vmax.f32 %v1074_v58, 0.0 }
 0x18d   : > { %v1075_v60 = vpop.f32.mrf.mxu1 }
 0x18e   : > { %v1076_v29 = vadd.f32 %v1075_v60, %v1035_v55 }
 0x190   : > { %v1079_v62 = vmax.f32 %v1076_v29, 0.0 }
 0x192   : > { %v1080_v31 = vpack.c.bf16 %v1079_v62, %v1078_v61 }
 0x194   : > { %1972 = vmatmul.msk.bf16.vlgmr.msra.gmra.mxu2 %vm1094_vm7, %v1080_v31 }
 0x1a4   : > { %1983 = vmatmul.msk.bf16.vlgmr.msrb.gmra.mxu2 %vm1094_vm7, %v1175_v23 }
 0x217   : > { %v1107_v39 = vpop.f32.mrf.mxu2 }
 0x218   : > { %v2495_v15 = vadd.f32 %v1107_v39, %v1081_v59 }
 0x21a   : > { %v1117_v32 = vadd.f32 %v2495_v15, %v2497_v2 }
 0x21f   : > { %v1109_v3 = vpop.f32.mrf.mxu2 }
 0x220   : > { %v2501_v25 = vadd.f32 %v1109_v3, %v1081_v59 }
 0x222   : > { %v1118_v22 = vadd.f32 %v2501_v25, %v2499_v1 }
 0x224   : > { %v1119_v4 = vpack.c.bf16 %v1118_v22, %v1117_v32  ;;  %v2161_v32 = vmov 32.0  }
 0x226   : > { %1981 = vmatmul.msk.bf16.vlgmr.msra.gmra.mxu3 %vm1094_vm7, %v1119_v4  ;;  %1982 = vmatmul.msk.bf16.vlgmr.msrb.gmra.mxu0 %vm1094_vm7, %v1119_v4 }
 0x227   : > { %v1197_v20 = vpop.f32.mrf.mxu2 }
 0x22f   : > { %v1199_v47 = vpop.f32.mrf.mxu2 }
 0x2a3   : > { %v1170_v7 = vpop.f32.mrf.mxu0 }
 0x2a4   : > { %v1171_v16 = vadd.f32 %v1170_v7, %v1159_v56 }
 0x2a9   : > { %v1147_v9 = vpop.f32.mrf.mxu3 }
 0x2aa   : > { %v1148_v18 = vadd.f32 %v2487_v36, %v1147_v9 }
 0x2ab   : > { %v1172_v10 = vpop.f32.mrf.mxu0 }
 0x2ac   : > { %v1173_v57 = vadd.f32 %v1172_v10, %v1159_v56 }
 0x2ae   : > { %v1203_v11 = vpack.c.bf16 %v1173_v57, %v1171_v16 }
 0x2b0   : > { %v1208_v12 = vsel %vm1094_vm7, %v1203_v11, 0 }
 0x2b1   : > { %v1149_v13 = vpop.f32.mrf.mxu3  ;;  %1217 = vmatpush.bf16.xpose.msrb.mxu3 %v1208_v12 }
 0x2b2   : > { %v1150_v17 = vadd.f32 %v2487_v36, %v1149_v13 }
 0x2b4   : > { %v1202_v19 = vpack.c.bf16 %v1150_v17, %v1148_v18 }
 0x2b8   : > { %1984 = vmatmul.msk.bf16.vlgmr.msrb.gmra.mxu3 %vm1094_vm7, %v1202_v19 }
 0x33b   : > { %v1219_v24 = vpop.f32.mrf.mxu3 }
 0x33c   : > { %v1225_v45 = vsel %vm1224_vm8, %v1219_v24, -inf }
 0x33d   : > { %1226 = vmax.xlane.f32.xlu2 %v1225_v45  ;;  %v2551_v45 = vld [vmem:[%s2680_s9] sm:$0xff] }
 0x343   : > { %v1221_v27 = vpop.f32.mrf.mxu3 }
 0x344   : > { %v1229_v26 = vsel %vm1228_vm9, %v1221_v27, -inf }
 0x345   : > { %1230 = vmax.xlane.f32.xlu0 %v1229_v26 }
 0x359   : > { %1274 = vrot.lane.b32.xlu0 %v2467_v5, %s2160_s1 }
 0x361   : > { %1297 = vrot.lane.b32.xlu0 %v2487_v36, %s2160_s1 }
 0x3b0   : > { %v1227_v8 = vpop.xlane.xlu2 %1226 }
 0x3b1   : > { %v1232_v28 = vsub.f32 %v1219_v24, %v1227_v8  ;;  %v2545_v24 = vld [vmem:[%s2680_s9 + $0x8] sm:$0xff] }
 0x3b2   : > { %1394 = vmatpush.bf16.msra.mxu2 %v2545_v24 }
 0x3b3   : > { %v1234_v30 = vmul.f32 1.442695, %v1232_v28 }
 0x3b5   : > { %2093 = vpow2.f32 %v1234_v30 }
 0x3b6   : > { %1395 = vmatpush.bf16.msra.mxu2 %v2551_v45 }
 0x3b8   : > { %v1231_v33 = vpop.xlane.xlu0 %1230 }
 0x3b9   : > { %v1233_v34 = vsub.f32 %v1221_v27, %v1231_v33 }
 0x3bb   : > { %v2094_v35 = vpop.eup %2093  ;;  %v1236_v37 = vmul.f32 1.442695, %v1233_v34 }
 0x3bc   : > { %v1238_v38 = vsel %vm1224_vm8, %v2094_v35, 0.0 }
 0x3bd   : > { %2095 = vpow2.f32 %v1236_v37  ;;  %1239 = vadd.xlane.f32.xlu1 %v1238_v38 }
 0x3c3   : > { %v2096_v40 = vpop.eup %2095 }
 0x3c4   : > { %v1241_v41 = vsel %vm1228_vm9, %v2096_v40, 0.0 }
 0x3c5   : > { %1242 = vadd.xlane.f32.xlu2 %v1241_v41  ;;  %v2558_v41 = vld [vmem:[%s2686_s15] sm:$0xff] }
 0x3cb   : > { %v1275_v54 = vpop.permute.xlu0 %1274 }
 0x3cc   : > { %1287 = vmatpush.bf16.msra.mxu0 %v1275_v54 }
 0x3d3   : > { %v1298_v62 = vpop.permute.xlu0 %1297 }
 0x3d6   : > { %1272 = vrot.lane.b32.xlu1 %v2475_v14, %s2160_s1  ;;  %s656_s1 = scalar_lea.vmem %s2687_s16, %s2276_s0 }
 0x3dd   : > { %1182 = vrot.lane.b32.xlu2 %v2487_v36, %s2159_s19 }
 0x430   : > { %v1240_v44 = vpop.xlane.xlu1 %1239 }
 0x438   : > { %v1243_v43 = vpop.xlane.xlu2 %1242 }
 0x439   : > { %2097 = vrcp.f32 %v1243_v43 }
 0x43a   : > { %2099 = vrcp.f32 %v1240_v44 }
 0x43b   : > { %2101 = vrcp.f32 %v2161_v32 }
 0x43f   : > { %v2098_v46 = vpop.eup %2097 }
 0x440   : > { %v1183_v48 = vpop.permute.xlu2 %1182  ;;  %v2100_v50 = vpop.eup %2099  ;;  %v1247_v51 = vmul.f32 %v2098_v46, %v2096_v40  ;;  %v1354_v46 = vperm.slane %v2558_v41, 0 }
 0x441   : > { %v1198_v6 = vadd.f32 %v1197_v20, %v1183_v48  ;;  %v1200_v49 = vadd.f32 %v1199_v47, %v1183_v48  ;;  %v1246_v5 = vmul.f32 %v2100_v50, %v2094_v35  ;;  %v2102_v22 = vpop.eup %2101 }
 0x442   : > { %v1310_v4 = vmul.f32 32.0, %v2102_v22  ;;  %vm1314_vm12 = vweird.f32 %v2102_v22 }
 0x443   : > { %v1249_v52 = vpack.c.bf16 %v1200_v49, %v1198_v6  ;;  %v1248_v14 = vpack.c.bf16 %v1247_v51, %v1246_v5  ;;  %v1357_v49 = vperm.slane %v2558_v41, 1 }
 0x444   : > { %v1311_v7 = vsub.f32 1.0, %v1310_v4 }
 0x445   : > { %v1255_v53 = vsel %vm1253_vm10, %v1249_v52, 0 }
 0x446   : > { %1264 = vmatpush.bf16.msrb.mxu1 %v1255_v53  ;;  %v1312_v56 = vmul.f32 %v2102_v22, %v1311_v7 }
 0x448   : > { %v1273_v55 = vpop.permute.xlu1 %1272  ;;  %v1313_v9 = vadd.f32 %v2102_v22, %v1312_v56 }
 0x449   : > { %1985 = vmatmul.msk.bf16.vlgmr.msrb.gmra.mxu1 %vm1224_vm8, %v1248_v14  ;;  %1288 = vmatpush.bf16.msra.mxu0 %v1273_v55 }
 0x4c6   : > { %v1266_v58 = vpop.f32.mrf.mxu1 }
 0x4ce   : > { %v1268_v60 = vpop.f32.mrf.mxu1 }
 0x4cf   : > { %v1271_v29 = vpack.c.bf16 %v1268_v60, %v1266_v58  ;;  %v2046_v60 = vld [vmem:[%s647_s20] sm:$0xff] }
 0x4d1   : > { %1986 = vmatmul.msk.bf16.vlgmr.msra.gmra.mxu0 %vm1094_vm7, %v1271_v29  ;;  %v1412_v29 = vsel %vm1094_vm7, %v2046_v60, 0 }
 0x4d2   : > { %1421 = vmatpush.bf16.xpose.msra.mxu3 %v1412_v29 }
 0x54e   : > { %v1290_v61 = vpop.f32.mrf.mxu0 }
 0x54f   : > { %v1295_v31 = vadd.f32 %v1290_v61, %v2497_v2  ;;  %v2535_v2 = vsel %vm1314_vm12, %v2102_v22, %v1313_v9 }
 0x551   : > { %v1300_v63 = vadd.f32 %v1298_v62, %v1295_v31 }
 0x553   : > { %v1302_v0 = vsel %vm1094_vm7, %v1300_v63, 0.0 }
 0x554   : > { %1303 = vadd.xlane.f32.xlu2 %v1302_v0 }
 0x556   : > { %v1292_v36 = vpop.f32.mrf.mxu0 }
 0x557   : > { %v1296_v39 = vadd.f32 %v1292_v36, %v2499_v1 }
 0x559   : > { %v1301_v59 = vadd.f32 %v1298_v62, %v1296_v39 }
 0x55b   : > { %v1306_v3 = vsel %vm1305_vm11, %v1301_v59, 0.0 }
 0x55c   : > { %1307 = vadd.xlane.f32.xlu1 %v1306_v3 }
 0x5c7   : > { %v1304_v10 = vpop.xlane.xlu2 %1303 }
 0x5c8   : > { %v1316_v16 = vmul.f32 %v2535_v2, %v1304_v10 }
 0x5ca   : > { %v1318_v57 = vsub.f32 %v1300_v63, %v1316_v16 }
 0x5cc   : > { %v1320_v1 = vmul.f32 %v1318_v57, %v1318_v57 }
 0x5ce   : > { %v1322_v11 = vsel %vm1094_vm7, %v1320_v1, 0.0 }
 0x5cf   : > { %v1308_v12 = vpop.xlane.xlu1 %1307  ;;  %1323 = vadd.xlane.f32.xlu0 %v1322_v11 }
 0x5d0   : > { %v1317_v13 = vmul.f32 %v2535_v2, %v1308_v12 }
 0x5d2   : > { %v1319_v17 = vsub.f32 %v1301_v59, %v1317_v13 }
 0x5d4   : > { %v1321_v18 = vmul.f32 %v1319_v17, %v1319_v17 }
 0x5d6   : > { %v1325_v19 = vsel %vm1305_vm11, %v1321_v18, 0.0 }
 0x5d7   : > { %1326 = vadd.xlane.f32.xlu2 %v1325_v19 }
 0x642   : > { %v1324_v21 = vpop.xlane.xlu0 %1323 }
 0x643   : > { %v1328_v42 = vmul.f32 %v1324_v21, %v2535_v2 }
 0x645   : > { %v1330_v23 = vadd.f32 1e-05, %v1328_v42 }
 0x647   : > { %2103 = vrsqrt.f32 %v1330_v23  ;;  %vm1338_vm14 = vweird.f32 %v1330_v23 }
 0x64a   : > { %v1327_v27 = vpop.xlane.xlu2 %1326 }
 0x64b   : > { %v1329_v26 = vmul.f32 %v1327_v27, %v2535_v2 }
 0x64d   : > { %v2104_v8 = vpop.eup %2103  ;;  %v1331_v28 = vadd.f32 1e-05, %v1329_v26 }
 0x64e   : > { %v1333_v30 = vmul.f32 %v2104_v8, %v1330_v23  ;;  %vm1339_vm13 = vweird.f32 %v2104_v8 }
 0x64f   : > { %2105 = vrsqrt.f32 %v1331_v28  ;;  %vm1340_vm15 = vmor %vm1338_vm14, %vm1339_vm13  ;;  %vm1348_vm1 = vweird.f32 %v1331_v28 }
 0x650   : > { %v1334_v33 = vmul.f32 %v2104_v8, %v1333_v30 }
 0x652   : > { %v1335_v34 = vmul.f32 0.5, %v1334_v33 }
 0x654   : > { %v1336_v35 = vsub.f32 1.5, %v1335_v34 }
 0x655   : > { %v2106_v37 = vpop.eup %2105 }
 0x656   : > { %v1337_v38 = vmul.f32 %v2104_v8, %v1336_v35  ;;  %v1343_v40 = vmul.f32 %v2106_v37, %v1331_v28  ;;  %vm1349_vm0 = vweird.f32 %v2106_v37 }
 0x657   : > { %vm1350_vm2 = vmor %vm1348_vm1, %vm1349_vm0 }
 0x658   : > { %v1341_v20 = vsel %vm1340_vm15, %v2104_v8, %v1337_v38  ;;  %v1344_v43 = vmul.f32 %v2106_v37, %v1343_v40 }
 0x659   : > { %v1352_v47 = vmul.f32 %v1341_v20, %v1318_v57 }
 0x65a   : > { %v1345_v44 = vmul.f32 0.5, %v1344_v43 }
 0x65b   : > { %v1355_v50 = vmul.f32 %v1354_v46, %v1352_v47 }
 0x65c   : > { %v1346_v48 = vsub.f32 1.5, %v1345_v44 }
 0x65d   : > { %v2562_v5 = vadd.f32 %v1357_v49, %v1355_v50 }
 0x65e   : > { %v1347_v6 = vmul.f32 %v2106_v37, %v1346_v48 }
 0x65f   : > { %v1367_v54 = vadd.f32 %v2562_v5, %v2495_v15  ;;  %v2090_v15 = vld [vmem:[%s2681_s10] ss:$0 sm:$0xff] }
 0x660   : > { %v1351_v51 = vsel %vm1350_vm2, %v2106_v37, %v1347_v6 }
 0x661   : > { %v1353_v52 = vmul.f32 %v1351_v51, %v1319_v17 }
 0x663   : > { %v1356_v53 = vmul.f32 %v1354_v46, %v1353_v52 }
 0x665   : > { %v2564_v14 = vadd.f32 %v1357_v49, %v1356_v53 }
 0x667   : > { %v1368_v55 = vadd.f32 %v2564_v14, %v2501_v25 }
 0x669   : > { %v1369_v58 = vpack.c.bf16 %v1368_v55, %v1367_v54 }
 0x66b   : > { %1995 = vmatmul.msk.bf16.vlgmr.msra.gmra.mxu2 %vm1094_vm7, %v1369_v58 }
 0x6ee   : > { %v1397_v61 = vpop.f32.mrf.mxu2 }
 0x6ef   : > { %v1398_v31 = vadd.f32 %v2090_v15, %v1397_v61 }
 0x6f6   : > { %v1399_v62 = vpop.f32.mrf.mxu2 }
 0x6f7   : > { %v1400_v25 = vadd.f32 %v2090_v15, %v1399_v62 }
 0x6f9   : > { %v1402_v63 = vpack.c.bf16 %v1400_v25, %v1398_v31 }
 0x6fb   : > { %2000 = vmatmul.msk.bf16.vlgmr.msra.gmra.mxu3 %vm1094_vm7, %v1402_v63 }
 0x77e   : > { %v1423_v0 = vpop.f32.mrf.mxu3 }
 0x77f   : > { %v1429_v36 = vsel %vm1428_vm3, %v1423_v0, -inf }
 0x780   : > { %1430 = vmax.xlane.f32.xlu1 %v1429_v36 }
 0x786   : > { %v1425_v39 = vpop.f32.mrf.mxu3 }
 0x787   : > { %v1433_v59 = vsel %vm1432_vm4, %v1425_v39, -inf }
 0x788   : > { %1434 = vmax.xlane.f32.xlu0 %v1433_v59 }
 0x79c   : > { %1453 = vrot.lane.b32.xlu0 %v2046_v60, %s2158_s30 }
 0x7a4   : > { %1499 = vrot.lane.b32.xlu0 %v2090_v15, %s2158_s30 }
 0x7f3   : > { %v1431_v3 = vpop.xlane.xlu1 %1430 }
 0x7f4   : > { %v1436_v32 = vsub.f32 %v1423_v0, %v1431_v3  ;;  %v1548_v3 = vperm.slane %v2558_v41, 2 }
 0x7f6   : > { %v1438_v22 = vmul.f32 1.442695, %v1436_v32 }
 0x7f8   : > { %2107 = vpow2.f32 %v1438_v22 }
 0x7fb   : > { %v1435_v4 = vpop.xlane.xlu0 %1434 }
 0x7fc   : > { %v1437_v7 = vsub.f32 %v1425_v39, %v1435_v4 }
 0x7fe   : > { %v2108_v56 = vpop.eup %2107  ;;  %v1440_v9 = vmul.f32 1.442695, %v1437_v7  ;;  %v1551_v7 = vperm.slane %v2558_v41, 3 }
 0x7ff   : > { %v1442_v10 = vsel %vm1428_vm3, %v2108_v56, 0.0 }
 0x800   : > { %2109 = vpow2.f32 %v1440_v9  ;;  %1443 = vadd.xlane.f32.xlu2 %v1442_v10 }
 0x806   : > { %v2110_v16 = vpop.eup %2109 }
 0x807   : > { %v1445_v57 = vsel %vm1432_vm4, %v2110_v16, 0.0 }
 0x808   : > { %1446 = vadd.xlane.f32.xlu1 %v1445_v57 }
 0x80e   : > { %v1454_v1 = vpop.permute.xlu0 %1453 }
 0x80f   : > { %1466 = vmatpush.bf16.msra.mxu1 %v1454_v1 }
 0x816   : > { %v1500_v8 = vpop.permute.xlu0 %1499 }
 0x818   : > { %1476 = vrot.lane.b32.xlu2 %v2545_v24, %s2158_s30 }
 0x821   : > { %1474 = vrot.lane.b32.xlu1 %v2551_v45, %s2158_s30 }
 0x873   : > { %v1444_v11 = vpop.xlane.xlu2 %1443 }
 0x874   : > { %2111 = vrcp.f32 %v1444_v11  ;;  %v2052_v11 = vld [vmem:[%s2684_s13 + $0x18] sm:$0xff] }
 0x875   : > { %1634 = vmatpush.bf16.msrb.mxu3 %v2052_v11 }
 0x87a   : > { %v2112_v13 = vpop.eup %2111 }
 0x87b   : > { %v1447_v12 = vpop.xlane.xlu1 %1446  ;;  %v1450_v18 = vmul.f32 %v2112_v13, %v2108_v56  ;;  %v1477_v42 = vpop.permute.xlu2 %1476  ;;  %v2050_v13 = vld [vmem:[%s2684_s13 + $0x8] sm:$0xff] }
 0x87c   : > { %2113 = vrcp.f32 %v1447_v12  ;;  %1489 = vmatpush.bf16.msrb.mxu0 %v1477_v42  ;;  %v2051_v12 = vld [vmem:[%s2684_s13 + $0x10] sm:$0xff] }
 0x87d   : > { %1635 = vmatpush.bf16.msrb.mxu3 %v2051_v12 }
 0x881   : > { %1636 = vmatpush.bf16.msrb.mxu3 %v2050_v13 }
 0x882   : > { %v2114_v17 = vpop.eup %2113 }
 0x883   : > { %v1451_v19 = vmul.f32 %v2114_v17, %v2110_v16  ;;  %v2049_v17 = vld [vmem:[%s2684_s13] sm:$0xff] }
 0x885   : > { %v1452_v21 = vpack.c.bf16 %v1451_v19, %v1450_v18  ;;  %1637 = vmatpush.bf16.msrb.mxu3 %v2049_v17  ;;  %v2091_v19 = vld [vmem:[%s2683_s12] ss:$0 sm:$0xff] }
 0x887   : > { %2001 = vmatmul.msk.bf16.vlgmr.msra.gmra.mxu1 %vm1428_vm3, %v1452_v21 }
 0x893   : > { %v1475_v23 = vpop.permute.xlu1 %1474 }
 0x894   : > { %1490 = vmatpush.bf16.msrb.mxu0 %v1475_v23 }
 0x904   : > { %v1468_v24 = vpop.f32.mrf.mxu1 }
 0x90c   : > { %v1470_v27 = vpop.f32.mrf.mxu1 }
 0x90d   : > { %v1473_v45 = vpack.c.bf16 %v1470_v27, %v1468_v24 }
 0x90f   : > { %2002 = vmatmul.msk.bf16.vlgmr.msrb.gmra.mxu0 %vm1094_vm7, %v1473_v45 }
 0x98c   : > { %v1492_v26 = vpop.f32.mrf.mxu0 }
 0x98d   : > { %v1497_v28 = vadd.f32 %v1492_v26, %v2562_v5  ;;  %v2048_v5 = vld [vmem:[%s2682_s11 + $0x8] sm:$0xff]  ;;  %v2092_v26 = vld [vmem:[%s2685_s14] ss:$0 sm:$0xff] }
 0x98e   : > { %1584 = vmatpush.bf16.msrb.mxu2 %v2048_v5 }
 0x98f   : > { %v1502_v30 = vadd.f32 %v1500_v8, %v1497_v28 }
 0x991   : > { %v1504_v33 = vsel %vm1094_vm7, %v1502_v30, 0.0 }
 0x992   : > { %1505 = vadd.xlane.f32.xlu2 %v1504_v33 }
 0x994   : > { %v1494_v34 = vpop.f32.mrf.mxu0 }
 0x995   : > { %v1498_v35 = vadd.f32 %v1494_v34, %v2564_v14  ;;  %v2047_v14 = vld [vmem:[%s2682_s11] sm:$0xff] }
 0x996   : > { %1585 = vmatpush.bf16.msrb.mxu2 %v2047_v14 }
 0x997   : > { %v1503_v37 = vadd.f32 %v1500_v8, %v1498_v35 }
 0x999   : > { %v1507_v38 = vsel %vm1305_vm11, %v1503_v37, 0.0 }
 0x99a   : > { %1508 = vadd.xlane.f32.xlu0 %v1507_v38 }
 0xa05   : > { %v1506_v40 = vpop.xlane.xlu2 %1505 }
 0xa06   : > { %v1510_v20 = vmul.f32 %v1506_v40, %v2535_v2 }
 0xa08   : > { %v1512_v43 = vsub.f32 %v1502_v30, %v1510_v20 }
 0xa0a   : > { %v1514_v44 = vmul.f32 %v1512_v43, %v1512_v43 }
 0xa0c   : > { %v1516_v46 = vsel %vm1094_vm7, %v1514_v44, 0.0 }
 0xa0d   : > { %v1509_v47 = vpop.xlane.xlu0 %1508  ;;  %1517 = vadd.xlane.f32.xlu1 %v1516_v46 }
 0xa0e   : > { %v1511_v48 = vmul.f32 %v1509_v47, %v2535_v2 }
 0xa10   : > { %v1513_v6 = vsub.f32 %v1503_v37, %v1511_v48 }
 0xa12   : > { %v1515_v49 = vmul.f32 %v1513_v6, %v1513_v6 }
 0xa14   : > { %v1519_v50 = vsel %vm1305_vm11, %v1515_v49, 0.0 }
 0xa15   : > { %1520 = vadd.xlane.f32.xlu2 %v1519_v50 }
 0xa80   : > { %v1518_v51 = vpop.xlane.xlu1 %1517 }
 0xa81   : > { %v1522_v52 = vmul.f32 %v1518_v51, %v2535_v2 }
 0xa83   : > { %v1524_v53 = vadd.f32 1e-05, %v1522_v52 }
 0xa85   : > { %2115 = vrsqrt.f32 %v1524_v53  ;;  %vm1532_vm8 = vweird.f32 %v1524_v53 }
 0xa88   : > { %v1521_v54 = vpop.xlane.xlu2 %1520 }
 0xa89   : > { %v1523_v55 = vmul.f32 %v1521_v54, %v2535_v2 }
 0xa8b   : > { %v2116_v58 = vpop.eup %2115  ;;  %v1525_v60 = vadd.f32 1e-05, %v1523_v55 }
 0xa8c   : > { %v1527_v29 = vmul.f32 %v2116_v58, %v1524_v53  ;;  %vm1533_vm5 = vweird.f32 %v2116_v58 }
 0xa8d   : > { %2117 = vrsqrt.f32 %v1525_v60  ;;  %vm1534_vm9 = vmor %vm1532_vm8, %vm1533_vm5  ;;  %vm1542_vm12 = vweird.f32 %v1525_v60 }
 0xa8e   : > { %v1528_v61 = vmul.f32 %v2116_v58, %v1527_v29 }
 0xa90   : > { %v1529_v15 = vmul.f32 0.5, %v1528_v61 }
 0xa92   : > { %v1530_v62 = vsub.f32 1.5, %v1529_v15 }
 0xa93   : > { %v2118_v31 = vpop.eup %2117 }
 0xa94   : > { %v1531_v25 = vmul.f32 %v2116_v58, %v1530_v62  ;;  %v1537_v63 = vmul.f32 %v2118_v31, %v1525_v60  ;;  %vm1543_vm10 = vweird.f32 %v2118_v31 }
 0xa95   : > { %vm1544_vm13 = vmor %vm1542_vm12, %vm1543_vm10 }
 0xa96   : > { %v1538_v0 = vmul.f32 %v2118_v31, %v1537_v63  ;;  %v1535_v36 = vsel %vm1534_vm9, %v2116_v58, %v1531_v25  ;;  %v1696_v25 = vperm.slane %v2558_v41, 4 }
 0xa97   : > { %v1546_v32 = vmul.f32 %v1535_v36, %v1512_v43 }
 0xa98   : > { %v1539_v39 = vmul.f32 0.5, %v1538_v0 }
 0xa99   : > { %v1549_v56 = vmul.f32 %v1548_v3, %v1546_v32 }
 0xa9a   : > { %v1540_v59 = vsub.f32 1.5, %v1539_v39  ;;  %v1699_v39 = vperm.slane %v2558_v41, 5 }
 0xa9b   : > { %v1552_v16 = vadd.f32 %v1551_v7, %v1549_v56 }
 0xa9c   : > { %v1541_v22 = vmul.f32 %v2118_v31, %v1540_v59 }
 0xa9e   : > { %v1545_v4 = vsel %vm1544_vm13, %v2118_v31, %v1541_v22 }
 0xa9f   : > { %v1547_v9 = vmul.f32 %v1545_v4, %v1513_v6 }
 0xaa1   : > { %v1550_v10 = vmul.f32 %v1548_v3, %v1547_v9 }
 0xaa3   : > { %v1553_v57 = vadd.f32 %v1551_v7, %v1550_v10 }
 0xaa5   : > { %v1558_v1 = vpack.c.bf16 %v1553_v57, %v1552_v16 }
 0xaa7   : > { %2011 = vmatmul.msk.bf16.vlgmr.msrb.gmra.mxu2 %vm1094_vm7, %v1558_v1 }
 0xb2a   : > { %v1587_v18 = vpop.f32.mrf.mxu2 }
 0xb2b   : > { %v1588_v21 = vadd.f32 %v2091_v19, %v1587_v18 }
 0xb2d   : > { %v1592_v24 = vmax.f32 %v1588_v21, 0.0 }
 0xb32   : > { %v1589_v42 = vpop.f32.mrf.mxu2 }
 0xb33   : > { %v1590_v23 = vadd.f32 %v2091_v19, %v1589_v42 }
 0xb35   : > { %v1593_v27 = vmax.f32 %v1590_v23, 0.0 }
 0xb37   : > { %v1602_v45 = vpack.c.bf16 %v1593_v27, %v1592_v24 }
 0xb39   : > { %2028 = vmatmul.msk.bf16.vlgmr.msrb.gmra.mxu3 %vm1060_vm6, %v1602_v45 }
 0xbbc   : > { %v1639_v8 = vpop.f32.mrf.mxu3 }
 0xbbd   : > { %v1644_v28 = vadd.f32 %v1639_v8, %v1552_v16 }
 0xbbf   : > { %v1650_v30 = vadd.f32 %v2092_v26, %v1644_v28 }
 0xbc1   : > { %v1652_v33 = vsel %vm1094_vm7, %v1650_v30, 0.0 }
 0xbc2   : > { %1653 = vadd.xlane.f32.xlu0 %v1652_v33 }
 0xbc4   : > { %v1641_v34 = vpop.f32.mrf.mxu3 }
 0xbc5   : > { %v1645_v35 = vadd.f32 %v1641_v34, %v1553_v57 }
 0xbc7   : > { %v1651_v37 = vadd.f32 %v2092_v26, %v1645_v35 }
 0xbc9   : > { %v1655_v38 = vsel %vm1305_vm11, %v1651_v37, 0.0 }
 0xbca   : > { %1656 = vadd.xlane.f32.xlu1 %v1655_v38 }
 0xc35   : > { %v1654_v40 = vpop.xlane.xlu0 %1653 }
 0xc36   : > { %v1658_v20 = vmul.f32 %v1654_v40, %v2535_v2 }
 0xc38   : > { %v1660_v43 = vsub.f32 %v1650_v30, %v1658_v20 }
 0xc3a   : > { %v1662_v44 = vmul.f32 %v1660_v43, %v1660_v43 }
 0xc3c   : > { %v1664_v46 = vsel %vm1094_vm7, %v1662_v44, 0.0 }
 0xc3d   : > { %1665 = vadd.xlane.f32.xlu2 %v1664_v46  ;;  %v1657_v47 = vpop.xlane.xlu1 %1656 }
 0xc3e   : > { %v1659_v48 = vmul.f32 %v1657_v47, %v2535_v2 }
 0xc40   : > { %v1661_v6 = vsub.f32 %v1651_v37, %v1659_v48 }
 0xc42   : > { %v1663_v49 = vmul.f32 %v1661_v6, %v1661_v6 }
 0xc44   : > { %v1667_v50 = vsel %vm1305_vm11, %v1663_v49, 0.0 }
 0xc45   : > { %1668 = vadd.xlane.f32.xlu0 %v1667_v50 }
 0xcb0   : > { %v1666_v51 = vpop.xlane.xlu2 %1665 }
 0xcb1   : > { %v1670_v52 = vmul.f32 %v1666_v51, %v2535_v2 }
 0xcb3   : > { %v1672_v5 = vadd.f32 1e-05, %v1670_v52 }
 0xcb5   : > { %2119 = vrsqrt.f32 %v1672_v5  ;;  %vm1680_vm14 = vweird.f32 %v1672_v5 }
 0xcb8   : > { %v1669_v53 = vpop.xlane.xlu0 %1668 }
 0xcb9   : > { %v1671_v14 = vmul.f32 %v1669_v53, %v2535_v2 }
 0xcbb   : > { %v2120_v54 = vpop.eup %2119  ;;  %v1673_v55 = vadd.f32 1e-05, %v1671_v14 }
 0xcbc   : > { %v1675_v58 = vmul.f32 %v2120_v54, %v1672_v5  ;;  %vm1681_vm6 = vweird.f32 %v2120_v54 }
 0xcbd   : > { %2121 = vrsqrt.f32 %v1673_v55  ;;  %vm1682_vm15 = vmor %vm1680_vm14, %vm1681_vm6  ;;  %vm1690_vm1 = vweird.f32 %v1673_v55 }
 0xcbe   : > { %v1676_v60 = vmul.f32 %v2120_v54, %v1675_v58 }
 0xcc0   : > { %v1677_v29 = vmul.f32 0.5, %v1676_v60 }
 0xcc2   : > { %v1678_v61 = vsub.f32 1.5, %v1677_v29 }
 0xcc3   : > { %v2122_v15 = vpop.eup %2121 }
 0xcc4   : > { %v1679_v62 = vmul.f32 %v2120_v54, %v1678_v61  ;;  %v1685_v31 = vmul.f32 %v2122_v15, %v1673_v55  ;;  %vm1691_vm0 = vweird.f32 %v2122_v15 }
 0xcc5   : > { %vm1692_vm2 = vmor %vm1690_vm1, %vm1691_vm0 }
 0xcc6   : > { %v1683_v63 = vsel %vm1682_vm15, %v2120_v54, %v1679_v62  ;;  %v1686_v0 = vmul.f32 %v2122_v15, %v1685_v31 }
 0xcc7   : > { %v1694_v36 = vmul.f32 %v1683_v63, %v1660_v43  ;;  %v1748_v43 = vperm.slane %v2558_v41, 6 }
 0xcc8   : > { %v1687_v59 = vmul.f32 0.5, %v1686_v0 }
 0xcc9   : > { %v1697_v3 = vmul.f32 %v1696_v25, %v1694_v36 }
 0xcca   : > { %v1688_v32 = vsub.f32 1.5, %v1687_v59 }
 0xccb   : > { %v1700_v22 = vadd.f32 %v1699_v39, %v1697_v3 }
 0xccc   : > { %v1689_v4 = vmul.f32 %v2122_v15, %v1688_v32 }
 0xccd   : > { %1702 = vst.msk [vmem:[%s656_s1] sm:$0xff] %vm1094_vm7, %v1700_v22  ;;  %v1704_v7 = vsel %vm1094_vm7, %v1700_v22, 0.0 }
 0xcce   : > { %v1693_v56 = vsel %vm1692_vm2, %v2122_v15, %v1689_v4  ;;  %1705 = vadd.xlane.f32.xlu1 %v1704_v7 }
 0xccf   : > { %v1695_v9 = vmul.f32 %v1693_v56, %v1661_v6 }
 0xcd1   : > { %v1698_v10 = vmul.f32 %v1696_v25, %v1695_v9 }
 0xcd3   : > { %v1701_v16 = vadd.f32 %v1699_v39, %v1698_v10 }
 0xcd5   : > { %v1707_v57 = vsel %vm1305_vm11, %v1701_v16, 0.0  ;;  %1703 = vst.msk [vmem:[%s656_s1 + $0x8] sm:$0x3] %vm1305_vm11, %v1701_v16 }
 0xcd6   : > { %1708 = vadd.xlane.f32.xlu2 %v1707_v57 }
 0xd41   : > { %v1706_v1 = vpop.xlane.xlu1 %1705 }
 0xd42   : > { %v1710_v11 = vmul.f32 %v1706_v1, %v2535_v2 }
 0xd44   : > { %v1712_v12 = vsub.f32 %v1700_v22, %v1710_v11 }
 0xd46   : > { %v1714_v13 = vmul.f32 %v1712_v12, %v1712_v12 }
 0xd48   : > { %v1716_v17 = vsel %vm1094_vm7, %v1714_v13, 0.0 }
 0xd49   : > { %v1709_v18 = vpop.xlane.xlu2 %1708  ;;  %1717 = vadd.xlane.f32.xlu0 %v1716_v17 }
 0xd4a   : > { %v1711_v19 = vmul.f32 %v1709_v18, %v2535_v2 }
 0xd4c   : > { %v1713_v21 = vsub.f32 %v1701_v16, %v1711_v19 }
 0xd4e   : > { %v1715_v42 = vmul.f32 %v1713_v21, %v1713_v21 }
 0xd50   : > { %v1719_v23 = vsel %vm1305_vm11, %v1715_v42, 0.0 }
 0xd51   : > { %1720 = vadd.xlane.f32.xlu1 %v1719_v23 }
 0xdbc   : > { %v1718_v24 = vpop.xlane.xlu0 %1717 }
 0xdbd   : > { %v1722_v27 = vmul.f32 %v1718_v24, %v2535_v2 }
 0xdbf   : > { %v1724_v45 = vadd.f32 1e-05, %v1722_v27 }
 0xdc1   : > { %2123 = vrsqrt.f32 %v1724_v45  ;;  %vm1732_vm4 = vweird.f32 %v1724_v45 }
 0xdc4   : > { %v1721_v26 = vpop.xlane.xlu1 %1720 }
 0xdc5   : > { %v1723_v8 = vmul.f32 %v1721_v26, %v2535_v2  ;;  %v1751_v2 = vperm.slane %v2558_v41, 7 }
 0xdc7   : > { %v2124_v28 = vpop.eup %2123  ;;  %v1725_v30 = vadd.f32 1e-05, %v1723_v8 }
 0xdc8   : > { %v1727_v33 = vmul.f32 %v2124_v28, %v1724_v45  ;;  %vm1733_vm3 = vweird.f32 %v2124_v28 }
 0xdc9   : > { %2125 = vrsqrt.f32 %v1725_v30  ;;  %vm1734_vm5 = vmor %vm1732_vm4, %vm1733_vm3  ;;  %vm1742_vm9 = vweird.f32 %v1725_v30 }
 0xdca   : > { %v1728_v34 = vmul.f32 %v2124_v28, %v1727_v33 }
 0xdcc   : > { %v1729_v35 = vmul.f32 0.5, %v1728_v34 }
 0xdce   : > { %v1730_v37 = vsub.f32 1.5, %v1729_v35 }
 0xdcf   : > { %v2126_v38 = vpop.eup %2125 }
 0xdd0   : > { %v1731_v40 = vmul.f32 %v2124_v28, %v1730_v37  ;;  %v1737_v20 = vmul.f32 %v2126_v38, %v1725_v30  ;;  %vm1743_vm8 = vweird.f32 %v2126_v38 }
 0xdd1   : > { %vm1744_vm10 = vmor %vm1742_vm9, %vm1743_vm8 }
 0xdd2   : > { %v1735_v44 = vsel %vm1734_vm5, %v2124_v28, %v1731_v40  ;;  %v1738_v46 = vmul.f32 %v2126_v38, %v1737_v20 }
 0xdd3   : > { %v1746_v47 = vmul.f32 %v1735_v44, %v1712_v12 }
 0xdd4   : > { %v1739_v48 = vmul.f32 0.5, %v1738_v46 }
 0xdd5   : > { %v1749_v6 = vmul.f32 %v1748_v43, %v1746_v47 }
 0xdd6   : > { %v1740_v49 = vsub.f32 1.5, %v1739_v48 }
 0xdd7   : > { %v1752_v50 = vadd.f32 %v1751_v2, %v1749_v6 }
 0xdd8   : > { %v1741_v51 = vmul.f32 %v2126_v38, %v1740_v49 }
 0xdd9   : > { %1754 = vst.msk [vmem:[%s666_s22] sm:$0xff] %vm1094_vm7, %v1752_v50 }
 0xdda   : > { %v1745_v52 = vsel %vm1744_vm10, %v2126_v38, %v1741_v51 }
 0xddb   : > { %v1747_v5 = vmul.f32 %v1745_v52, %v1713_v21 }
 0xddd   : > { %v1750_v53 = vmul.f32 %v1748_v43, %v1747_v5 }
 0xddf   : > { %v1753_v14 = vadd.f32 %v1751_v2, %v1750_v53 }
 0xde1   : > { %1755 = vst.msk [vmem:[%s666_s22 + $0x8] sm:$0x3] %vm1305_vm11, %v1753_v14 }
 0xde2 PF: > { %s28_s26 = sadd.s32 1, %s2149_s26   ;;  %s2697_s24 = smov %s2145_s25 }
 0xde3   : > { %p25_p5 = scmp.ge.s32.totalorder %s28_s26, 4   ;;  %s2698_s25 = smov %s2700_s27 }
 0xde5   :  { %27 = sbr.rel (!%p25_p5) target bundleno = 3 (0x3), region = 132 }

// kernel: run.15
= control target key start
LH: loop header
LB: loop body
LE: loop exit
PB: predicated region body
PF: predicated region fallthrough
CT: control target
= control target key end

     0   :  { %vm50_vm0 = vcmask 261120   ;;  %s272_s1 = inlined_call_operand.vmem [shape: bf16[32,32], index: 1, kind: input, shape index: {}]   ;;  %s273_s0 = inlined_call_operand.vmem [shape: f32[12,32], index: 0, kind: input, shape index: {}]   ;;  %s274_s2 = inlined_call_operand.vmem [shape: f32[1,32], index: 2, kind: input, shape index: {}]   ;;  %s275_s4 = inlined_call_operand.vmem [shape: f32[1,32], index: 4, kind: input, shape index: {}]   ;;  %s276_s3 = inlined_call_operand.vmem [shape: bf16[32,32], index: 3, kind: input, shape index: {}]   ;;  %s277_s6 = inlined_call_operand.vmem [shape: f32[1,128], index: 6, kind: input, shape index: {}]   ;;  %s278_s5 = inlined_call_operand.vmem [shape: bf16[32,128], index: 5, kind: input, shape index: {}]   ;;  %s279_s7 = inlined_call_operand.vmem [shape: f32[12,128], index: 7, kind: output, shape index: {}]  }
   0x1   :  { %v182_v0 = vld [vmem:[%s272_s1 + $0x8] sm:$0xff]  ;;  %v181_v1 = vld [vmem:[%s272_s1] sm:$0xff] }
   0x2   :  { %60 = vmatpush.bf16.msra.mxu0 %v182_v0  ;;  %v27_v2 = vld [vmem:[%s273_s0] sm:$0xff]  ;;  %v28_v3 = vld [vmem:[%s273_s0 + $0x8] sm:$0xf] }
   0x3   :  { %v34_v4 = vpack.c.bf16 %v28_v3, %v27_v2  ;;  %v184_v5 = vld [vmem:[%s276_s3 + $0x8] sm:$0xff]  ;;  %v183_v6 = vld [vmem:[%s276_s3] sm:$0xff] }
   0x4   :  { %100 = vmatpush.bf16.msra.mxu1 %v184_v5  ;;  %v187_v8 = vld [vmem:[%s274_s2] ss:$0 sm:$0xff]  ;;  %v186_v15 = vld [vmem:[%s278_s5 + $0x8] sm:$0xff] }
   0x5   :  { %140 = vmatpush.bf16.msra.mxu2 %v186_v15  ;;  %v185_v16 = vld [vmem:[%s278_s5] sm:$0xff] }
   0x6   :  { %61 = vmatpush.bf16.msra.mxu0 %v181_v1  ;;  %v188_v18 = vld [vmem:[%s275_s4] ss:$0 sm:$0xff] }
   0x7   :  { %v189_v25 = vld [vmem:[%s277_s6] ss:$0 sm:$0xff] }
   0x8   :  { %101 = vmatpush.bf16.msra.mxu1 %v183_v6 }
   0x9   :  { %162 = vmatmul.msk.bf16.vlgmr.msra.gmra.mxu0 %vm50_vm0, %v34_v4  ;;  %141 = vmatpush.bf16.msra.mxu2 %v185_v16 }
  0x86   :  { %v63_v7 = vpop.f32.mrf.mxu0 }
  0x87   :  { %v64_v9 = vadd.f32 %v187_v8, %v63_v7 }
  0x89   :  { %v68_v12 = vmax.f32 %v64_v9, 0.0 }
  0x8e   :  { %v65_v10 = vpop.f32.mrf.mxu0 }
  0x8f   :  { %v66_v11 = vadd.f32 %v187_v8, %v65_v10 }
  0x91   :  { %v69_v13 = vmax.f32 %v66_v11, 0.0 }
  0x93   :  { %v75_v14 = vpack.c.bf16 %v69_v13, %v68_v12 }
  0x95   :  { %171 = vmatmul.msk.bf16.vlgmr.msra.gmra.mxu1 %vm50_vm0, %v75_v14 }
 0x112   :  { %v103_v17 = vpop.f32.mrf.mxu1 }
 0x113   :  { %v104_v19 = vadd.f32 %v188_v18, %v103_v17 }
 0x115   :  { %v108_v22 = vmax.f32 %v104_v19, 0.0 }
 0x11a   :  { %v105_v20 = vpop.f32.mrf.mxu1 }
 0x11b   :  { %v106_v21 = vadd.f32 %v188_v18, %v105_v20 }
 0x11d   :  { %v109_v23 = vmax.f32 %v106_v21, 0.0 }
 0x11f   :  { %v115_v24 = vpack.c.bf16 %v109_v23, %v108_v22 }
 0x121   :  { %180 = vmatmul.msk.bf16.vlgmr.msra.gmra.mxu2 %vm50_vm0, %v115_v24 }
 0x1a4   :  { %v143_v26 = vpop.f32.mrf.mxu2 }
 0x1a5   :  { %v144_v27 = vadd.f32 %v189_v25, %v143_v26 }
 0x1a7   :  { %148 = vst [vmem:[%s279_s7] sm:$0xff] %v144_v27 }
 0x1ac   :  { %v145_v28 = vpop.f32.mrf.mxu2 }
 0x1ad   :  { %v146_v29 = vadd.f32 %v189_v25, %v145_v28 }
 0x1af   :  { %149 = vst [vmem:[%s279_s7 + $0x8] sm:$0xf] %v146_v29 }

// kernel: run.16
= control target key start
LH: loop header
LB: loop body
LE: loop exit
PB: predicated region body
PF: predicated region fallthrough
CT: control target
= control target key end

     0   :  { %s928_s21 = smov 0   ;;  %s1007_s0 = inlined_call_operand.vmem [shape: f32[2,6,2], index: 0, kind: input, shape index: {}]   ;;  %s1008_s1 = inlined_call_operand.vmem [shape: f32[2,6,2], index: 1, kind: input, shape index: {}]   ;;  %s1009_s2 = inlined_call_operand.vmem [shape: f32[2,64], index: 2, kind: input, shape index: {}]   ;;  %s1010_s3 = inlined_call_operand.vmem [shape: f32[1,64], index: 3, kind: input, shape index: {}]   ;;  %s1011_s4 = inlined_call_operand.vmem [shape: f32[2,2], index: 4, kind: input, shape index: {}]   ;;  %s1012_s5 = inlined_call_operand.vmem [shape: f32[1,2], index: 5, kind: input, shape index: {}]   ;;  %s1013_s6 = inlined_call_operand.vmem [shape: f32[2,32], index: 6, kind: input, shape index: {}]   ;;  %s1014_s7 = inlined_call_operand.vmem [shape: f32[1,32], index: 7, kind: input, shape index: {}]   ;;  %s1015_s8 = inlined_call_operand.vmem [shape: f32[2,32], index: 8, kind: input, shape index: {}]   ;;  %s1016_s9 = inlined_call_operand.vmem [shape: f32[1,32], index: 9, kind: input, shape index: {}]   ;;  %s1017_s10 = inlined_call_operand.vmem [shape: f32[2,128], index: 10, kind: input, shape index: {}]   ;;  %s1018_s11 = inlined_call_operand.vmem [shape: f32[1,128], index: 11, kind: input, shape index: {}]   ;;  %s1019_s12 = inlined_call_operand.vmem [shape: f32[2,6,128], index: 12, kind: output, shape index: {}]  }
   0x1 LB: > { %s802_s22 = sadd.s32 4294967295, %s860_s21   ;;  %p806_p0 = scmp.ge.s32.totalorder %s860_s21, 1  ;;  %s860_s21 = sphi %s928_s21, %s22_s21  }
   0x2   : > { %p370_p1 = scmp.lt.s32.totalorder %s860_s21, 3 }
   0x4   : > { %p371_p2 = pnand %p806_p0, %p370_p1 }
   0x5   : > { %s862_s25 = smov (!%p371_p2), 96   ;;  %p414_p3 = scmp.lt.s32.totalorder (!%p371_p2), %s802_s22, 1 }
   0x6   : > { %374 = sbr.rel (%p371_p2) target bundleno = 1408 (0x580), region = 68 }
   0xb   : > { %v428_v0 = vld [vmem:[%s1009_s2] sm:$0x3]  ;;  %s1021_s22 = smov (!%p414_p3, %s802_s22), 1  ;;  %vm437_vm0 = vcmask 1041408   ;;  %vm433_vm1 = vcmask 15360   ;;  %vm516_vm2 = vcmask 261120  }
   0xc   : > { %461 = vrot.lane.b32.xlu0 %v428_v0, %s862_s25  ;;  %s939_s26 = sshll.u32 %s1021_s22, 3  ;;  %810 = vmatpush.msk.msra.mxu0 %vm437_vm0, %v428_v0  ;;  %v841_v2 = vld [vmem:[%s1010_s3] ss:$0 sm:$0xff]  ;;  %vm543_vm3 = vcmask 46080   ;;  %vm559_vm4 = vcmask 1045504   ;;  %vm555_vm5 = vcmask 48128  }
   0xd   : > { %s417_s29 = scalar_lea.vmem %s1007_s0, %s939_s26  ;;  %v488_v9 = vld [vmem:[%s1011_s4] sm:$0x3]  ;;  %s421_s20 = scalar_lea.vmem %s1008_s1, %s939_s26 }
   0xe   : > { %v426_v1 = vld [vmem:[%s417_s29] sm:$0x3f]  ;;  %814 = vmatpush.msk.msra.mxu2 %vm437_vm0, %v488_v9  ;;  %s425_s19 = scalar_lea.vmem %s1019_s12, %s939_s26 }
   0xf   : > { %811 = vmatmul.msk.f32.vlgmr.msra.gmra.mxu0 %vm433_vm1, %v426_v1  ;;  %815 = vmatmul.msk.f32.vlgmr.msra.gmra.mxu2 %vm433_vm1, %v426_v1  ;;  %v842_v17 = vld [vmem:[%s1012_s5] ss:$0 sm:$0xff] }
  0x10   : > { %v614_v20 = vld [vmem:[%s1015_s8] sm:$0x3] }
  0x11   : > { %v427_v21 = vld [vmem:[%s421_s20] sm:$0x3f]  ;;  %822 = vmatpush.msk.msrb.mxu2 %vm437_vm0, %v614_v20 }
  0x12   : > { %v583_v22 = vld [vmem:[%s1013_s6] sm:$0x3] }
  0x13   : > { %v843_v26 = vld [vmem:[%s1016_s9] ss:$0 sm:$0xff] }
  0x14   : > { %463 = vrot.lane.b32.xlu0 %v841_v2, %s862_s25  ;;  %v844_v31 = vld [vmem:[%s1014_s7] ss:$0 sm:$0xff] }
  0x15   : > { %v645_v34 = vld [vmem:[%s1017_s10] sm:$0x3] }
  0x16   : > { %v845_v37 = vld [vmem:[%s1018_s11] ss:$0 sm:$0xff] }
  0x17   : > { %823 = vmatmul.msk.f32.vlgmr.msrb.gmra.mxu2 %vm433_vm1, %v427_v21 }
  0x7e   : > { %v462_v3 = vpop.permute.xlu0 %461 }
  0x7f   : > { %812 = vmatpush.msk.msra.mxu1 %vm437_vm0, %v462_v3 }
  0x80   : > { %813 = vmatmul.msk.f32.vlgmr.msra.gmra.mxu1 %vm433_vm1, %v426_v1 }
  0x81   : > { %820 = vmatpush.msk.msrb.mxu1 %vm437_vm0, %v583_v22 }
  0x86   : > { %v464_v4 = vpop.permute.xlu0 %463 }
  0x8c   : > { %v458_v5 = vpop.f32.mrf.mxu0 }
  0x8d   : > { %v459_v8 = vadd.f32 %v841_v2, %v458_v5 }
  0x92   : > { %v513_v18 = vpop.f32.mrf.mxu2 }
  0x93   : > { %v514_v19 = vadd.f32 %v842_v17, %v513_v18 }
  0x95   : > { %818 = vmatpush.msk.msrb.mxu0 %vm559_vm4, %v514_v19 }
  0x9a   : > { %v642_v27 = vpop.f32.mrf.mxu2 }
  0x9b   : > { %v643_v28 = vadd.f32 %v843_v26, %v642_v27 }
  0x9d   : > { %826 = vmatpush.xpose.msk.msra.mxu0 %vm516_vm2, %v643_v28 }
  0xfd   : > { %v485_v6 = vpop.f32.mrf.mxu1 }
  0xfe   : > { %v486_v7 = vadd.f32 %v485_v6, %v464_v4 }
 0x100   : > { %816 = vmatpush.xpose.msk.msra.mxu3 %vm516_vm2, %v486_v7 }
 0x103   : > { %817 = vmatmul.msk.f32.vlgmr.msra.gmra.mxu3 %vm516_vm2, %v459_v8 }
 0x104   : > { %824 = vmatpush.msk.msrb.mxu3 %vm437_vm0, %v645_v34 }
 0x10b   : > { %825 = vmatmul.msk.f32.vlgmr.msrb.gmra.mxu3 %vm433_vm1, %v427_v21 }
 0x186   : > { %v540_v10 = vpop.f32.mrf.mxu3 }
 0x187   : > { %v544_v11 = vsel %vm543_vm3, %v540_v10, -inf }
 0x188   : > { %545 = vmax.xlane.f32.xlu1 %v544_v11 }
 0x18e   : > { %v670_v38 = vpop.f32.mrf.mxu3 }
 0x18f   : > { %v671_v39 = vadd.f32 %v845_v37, %v670_v38 }
 0x191   : > { %828 = vmatpush.msk.msra.mxu1 %vm559_vm4, %v671_v39 }
 0x1fb   : > { %v546_v12 = vpop.xlane.xlu1 %545 }
 0x1fc   : > { %v547_v13 = vsub.f32 %v540_v10, %v546_v12 }
 0x1fe   : > { %v548_v14 = vmul.f32 1.442695, %v547_v13 }
 0x200   : > { %846 = vpow2.f32 %v548_v14 }
 0x206   : > { %v847_v15 = vpop.eup %846 }
 0x207   : > { %v550_v16 = vsel %vm543_vm3, %v847_v15, 0.0 }
 0x208   : > { %551 = vadd.xlane.f32.xlu1 %v550_v16 }
 0x27b   : > { %v552_v23 = vpop.xlane.xlu1 %551 }
 0x27c   : > { %848 = vrcp.f32 %v552_v23 }
 0x282   : > { %v849_v24 = vpop.eup %848 }
 0x283   : > { %v554_v25 = vmul.f32 %v849_v24, %v847_v15 }
 0x285   : > { %819 = vmatmul.msk.f32.vlgmr.msrb.gmra.mxu0 %vm555_vm5, %v554_v25 }
 0x302   : > { %v580_v29 = vpop.f32.mrf.mxu0 }
 0x303   : > { %v581_v30 = vadd.f32 %v580_v29, %v427_v21 }
 0x305   : > { %821 = vmatmul.msk.f32.vlgmr.msrb.gmra.mxu1 %vm433_vm1, %v581_v30 }
 0x382   : > { %v611_v32 = vpop.f32.mrf.mxu1 }
 0x383   : > { %v612_v33 = vadd.f32 %v844_v31, %v611_v32 }
 0x385   : > { %827 = vmatmul.msk.f32.vlgmr.msra.gmra.mxu0 %vm516_vm2, %v612_v33 }
 0x402   : > { %v696_v35 = vpop.f32.mrf.mxu0 }
 0x403   : > { %v699_v36 = vsel %vm543_vm3, %v696_v35, -inf }
 0x404   : > { %700 = vmax.xlane.f32.xlu2 %v699_v36 }
 0x477   : > { %v701_v40 = vpop.xlane.xlu2 %700 }
 0x478   : > { %v702_v41 = vsub.f32 %v696_v35, %v701_v40 }
 0x47a   : > { %v703_v42 = vmul.f32 1.442695, %v702_v41 }
 0x47c   : > { %850 = vpow2.f32 %v703_v42 }
 0x482   : > { %v851_v43 = vpop.eup %850 }
 0x483   : > { %v705_v44 = vsel %vm543_vm3, %v851_v43, 0.0 }
 0x484   : > { %706 = vadd.xlane.f32.xlu2 %v705_v44 }
 0x4f7   : > { %v707_v45 = vpop.xlane.xlu2 %706 }
 0x4f8   : > { %852 = vrcp.f32 %v707_v45 }
 0x4fe   : > { %v853_v46 = vpop.eup %852 }
 0x4ff   : > { %v709_v47 = vmul.f32 %v853_v46, %v851_v43 }
 0x501   : > { %829 = vmatmul.msk.f32.vlgmr.msra.gmra.mxu1 %vm555_vm5, %v709_v47 }
 0x57e   : > { %v733_v48 = vpop.f32.mrf.mxu1 }
 0x57f   : > { %736 = vst [vmem:[%s425_s19] sm:$0x3f] %v733_v48 }
 0x580 PF: > { %s22_s21 = sadd.s32 1, %s860_s21  }
 0x581   : > { %p19_p4 = scmp.ge.s32.totalorder %s22_s21, 4  }
 0x583   :  { %21 = sbr.rel (!%p19_p4) target bundleno = 1 (0x1), region = 101 }

// kernel: run.17
= control target key start
LH: loop header
LB: loop body
LE: loop exit
PB: predicated region body
PF: predicated region fallthrough
CT: control target
= control target key end

     0   :  { %s2289_s0 = inlined_call_operand.vmem [shape: f32[2,8,32], index: 0, kind: input, shape index: {}]   ;;  %s2290_s1 = inlined_call_operand.vmem [shape: f32[2,8,4], index: 1, kind: input, shape index: {}]   ;;  %s2291_s2 = inlined_call_operand.vmem [shape: bf16[2,16,64], index: 2, kind: input, shape index: {}]   ;;  %s2292_s3 = inlined_call_operand.vmem [shape: f32[4,64], index: 3, kind: input, shape index: {}]   ;;  %s2293_s4 = inlined_call_operand.vmem [shape: f32[1,64], index: 4, kind: input, shape index: {}]   ;;  %s2294_s5 = inlined_call_operand.vmem [shape: bf16[96,32], index: 5, kind: input, shape index: {}]   ;;  %s2295_s6 = inlined_call_operand.vmem [shape: f32[2,32], index: 6, kind: input, shape index: {}]   ;;  %s2296_s7 = inlined_call_operand.vmem [shape: bf16[32,128], index: 7, kind: input, shape index: {}]   ;;  %s2297_s8 = inlined_call_operand.vmem [shape: f32[1,128], index: 8, kind: input, shape index: {}]   ;;  %s2298_s9 = inlined_call_operand.vmem [shape: bf16[32,64], index: 9, kind: input, shape index: {}]   ;;  %s2299_s10 = inlined_call_operand.vmem [shape: f32[1,64], index: 10, kind: input, shape index: {}]   ;;  %s2300_s11 = inlined_call_operand.vmem [shape: bf16[32,64], index: 11, kind: input, shape index: {}]   ;;  %s2301_s12 = inlined_call_operand.vmem [shape: f32[1,64], index: 12, kind: input, shape index: {}]   ;;  %s2302_s13 = inlined_call_operand.vmem [shape: bf16[64,32], index: 13, kind: input, shape index: {}]   ;;  %s2303_s14 = inlined_call_operand.vmem [shape: f32[1,32], index: 14, kind: input, shape index: {}]   ;;  %s2304_s15 = inlined_call_operand.vmem [shape: f32[8,32], index: 15, kind: input, shape index: {}]   ;;  %s2305_s16 = inlined_call_operand.vmem [shape: f32[2,8,32], index: 16, kind: output, shape index: {0}]   ;;  %s2306_s17 = inlined_call_operand.hbm [shape: f32[2,8,32], index: 17, kind: output, shape index: {1}]  }
   0x1   :  { %2311 = sst [smem:[#allocation10_spill]] %s2289_s0 }
   0x2   :  { %2312 = sst [smem:[#allocation11_spill]] %s2290_s1 }
   0x3   :  { %2313 = sst [smem:[#allocation12_spill]] %s2292_s3 }
   0x4   :  { %23 = vsyncpa [#allocation3], 0 }
   0x5   :  { %25 = vsyncpa [#allocation3 + $0x1], 0  ;;  %s1960_s24 = smov 0   ;;  %s1962_s25 = smov 0  }
   0x6   :  { %s1964_s26 = smov 0   ;;  %s1966_s27 = smov 0  }
   0x7   :  { %s1968_s28 = smov 0   ;;  %s1970_s29 = smov 0  }
   0x8 LB: > { %2314 = sst [smem:[#allocation5_spill]] %s1845_s26  ;;  %s1570_s0 = sadd.s32 4294967295, %s1857_s29   ;;  %s1857_s29 = sphi %s1970_s29, %s31_s29   ;;  %s1853_s28 = sphi %s1968_s28, %s2330_s28   ;;  %s1849_s27 = sphi %s1966_s27, %s2329_s27   ;;  %s1845_s26 = sphi %s1964_s26, %s2328_s26   ;;  %s1841_s25 = sphi %s1962_s25, %s2332_s25   ;;  %s1837_s24 = sphi %s1960_s24, %s2331_s24  }
   0x9   : > { %2315 = sst [smem:[#allocation6_spill]] %s1853_s28  ;;  %s1571_s30 = sadd.s32 4294967294, %s1857_s29  }
   0xa   : > { %s43_s18 = sadd.s32 1, %s1853_s28  ;;  %s435_s19 = sadd.s32 1, %s1845_s26 }
   0xb   : > { %p45_p0 = scmp.ge.s32.totalorder %s43_s18, 2  ;;  %p445_p1 = scmp.ne.s32.totalorder %s1845_s26, %s1841_s25 }
   0xc   : > { %p446_p2 = scmp.eq.s32.totalorder %s1570_s0, 1  ;;  %p451_p3 = scmp.ne.s32.totalorder %s1841_s25, %s1837_s24 }
   0xd   : > { %s2334_s18 = smov (%p45_p0, %s43_s18), 0  ;;  %p452_p5 = scmp.eq.s32.totalorder %s1571_s30, 1 }
   0xe   : > { %2316 = sst [smem:[#allocation7_spill]] %s2334_s18  ;;  %p2000_p4 = por %p446_p2, %p445_p1 }
   0xf   : > { %s430_s20 = ssub.s32 %s1853_s28, %s2334_s18  ;;  %p1574_p6 = scmp.ge.s32.totalorder %s1857_s29, 1 }
  0x10   : > { %p433_p7 = scmp.eq.s32.totalorder %s430_s20, 0  ;;  %p2007_p8 = por %p452_p5, %p451_p3 }
  0x11   : > { %p537_p9 = scmp.lt.s32.totalorder %s1857_s29, 3 }
  0x12   : > { %s2318_s21 = scalar_select %p2007_p8, 1, 0 }
  0x13   : > { %s2013_s22 = scalar_select %p433_p7, %s1845_s26, %s435_s19  }
  0x14   : > { %2319 = sst [smem:[#allocation8_spill]] %s2318_s21  ;;  %p538_p10 = pnand %p1574_p6, %p537_p9 }
  0x15   : > { %2320 = sst [smem:[#allocation9_spill]] %s2013_s22  ;;  %p610_p11 = scmp.lt.s32.totalorder (!%p538_p10), %s1849_s27, 1 }
  0x16   : > { %541 = sbr.rel (%p538_p10) target bundleno = 3449 (0xd79), region = 84  ;;  %s2321_s3 = sld [smem:[#allocation12_spill]] (!%p538_p10) }
  0x17   : > { %s2322_s28 = sld [smem:[#allocation11_spill]] (!%p538_p10)  ;;  %s1868_s18 = smov (!%p538_p10), 32  }
  0x1b   : > { %vm662_vm0 = vcmask 1043456   ;;  %s611_s30 = scalar_select %p610_p11, %s1849_s27, 1  ;;  %vm658_vm1 = vcmask 31744   ;;  %v1756_v2 = vld [vmem:[%s2293_s4] ss:$0 sm:$0xff]  ;;  %v1676_v5 = vld [vmem:[%s2294_s5 + $0x18] sm:$0xff] }
  0x1c   : > { %v639_v0 = vld [vmem:[%s2321_s3] sm:$0xf]  ;;  %874 = vmatpush.bf16.msra.mxu1 %v1676_v5  ;;  %v1675_v7 = vld [vmem:[%s2294_s5 + $0x10] sm:$0xff]  ;;  %v1674_v10 = vld [vmem:[%s2294_s5 + $0x8] sm:$0xff]  ;;  %v1859_v20 = vmov 683565275  }
  0x1d   : > { %1581 = vmatpush.msk.msra.mxu0 %vm662_vm0, %v639_v0  ;;  %s2021_s20 = sshll.u32 %s611_s30, 3  ;;  %v1673_v13 = vld [vmem:[%s2294_s5] sm:$0xff]  ;;  %v1860_v22 = vmov 2475754826   ;;  %v1861_v25 = vmov 2131351028  }
  0x1e   : > { %s623_s22 = scalar_lea.vmem %s2322_s28, %s2021_s20  ;;  %v1862_v28 = vmov 2102212464   ;;  %v1863_v31 = vmov 920167782   ;;  %v1864_v34 = vmov 1326507024   ;;  %s635_s21 = scalar_lea.vmem %s2305_s16, %s2021_s20 }
  0x1f   : > { %v638_v1 = vld [vmem:[%s623_s22] sm:$0xff]  ;;  %v1865_v5 = vmov 0   ;;  %s1866_s28 = smov 96   ;;  %s2325_s30 = sld [smem:[#allocation10_spill]] }
  0x20   : > { %1582 = vmatmul.msk.f32.vlgmr.msra.gmra.mxu0 %vm658_vm1, %v638_v1  ;;  %875 = vmatpush.bf16.msra.mxu1 %v1675_v7  ;;  %s1867_s3 = smov 64  }
  0x24   : > { %876 = vmatpush.bf16.msra.mxu1 %v1674_v10 }
  0x25   : > { %s616_s26 = scalar_lea.vmem %s2325_s30, %s2021_s20 }
  0x28   : > { %877 = vmatpush.bf16.msra.mxu1 %v1673_v13 }
  0x9d   : > { %v683_v3 = vpop.f32.mrf.mxu0 }
  0x9e   : > { %v2030_v4 = vadd.f32 %v1756_v2, %v683_v3 }
  0xa0   : > { %v689_v6 = vand.u32 2139095040, %v2030_v4  ;;  %v686_v11 = vand.u32 2147483647, %v2030_v4  ;;  %vm688_vm14 = vcmp.lt.s32.totalorder %v2030_v4, 0 }
  0xa2   : > { %v690_v8 = vshrl.u32 %v689_v6, 23  ;;  %v693_v14 = vand.u32 8388607, %v686_v11  ;;  %vm2096_vm15 = vcmp.le.f32.partialorder %v686_v11, 0.7853982 }
  0xa4   : > { %v1583_v9 = vadd.s32 4294967169, %v690_v8  ;;  %v694_v18 = vor.u32 8388608, %v693_v14 }
  0xa6   : > { %v696_v12 = vadd.s32 1, %v1583_v9  ;;  %v2059_v41 = vshll.u32 %v694_v18, 8 }
  0xa8   : > { %vm697_vm2 = vcmp.gt.s32.totalorder %v696_v12, 0  ;;  %v735_v50 = vand.u32 65535, %v2059_v41  ;;  %v736_v51 = vshrl.u32 %v2059_v41, 16 }
  0xa9   : > { %v698_v15 = vsel %vm697_vm2, %v696_v12, 0 }
  0xaa   : > { %v700_v16 = vand.u32 31, %v698_v15  ;;  %v2050_v19 = vshrl.u32 %v698_v15, 5 }
  0xac   : > { %v2048_v17 = vsub.s32 32, %v700_v16  ;;  %v703_v21 = vshll.u32 %v1859_v20, %v700_v16  ;;  %v706_v23 = vshll.u32 %v1860_v22, %v700_v16  ;;  %v709_v27 = vshll.u32 %v1861_v25, %v700_v16 }
  0xad   : > { %v712_v30 = vshll.u32 %v1862_v28, %v700_v16  ;;  %v715_v33 = vshll.u32 %v1863_v31, %v700_v16  ;;  %vm718_vm3 = vcmp.lt.s32.totalorder %v2050_v19, 1  ;;  %vm721_vm4 = vcmp.lt.s32.totalorder %v2050_v19, 4 }
  0xae   : > { %v704_v24 = vshrl.u32 %v1860_v22, %v2048_v17  ;;  %v707_v26 = vshrl.u32 %v1861_v25, %v2048_v17  ;;  %v710_v29 = vshrl.u32 %v1862_v28, %v2048_v17  ;;  %v713_v32 = vshrl.u32 %v1863_v31, %v2048_v17 }
  0xaf   : > { %v716_v35 = vshrl.u32 %v1864_v34, %v2048_v17  ;;  %vm720_vm5 = vcmp.lt.s32.totalorder %v2050_v19, 3  ;;  %vm719_vm6 = vcmp.lt.s32.totalorder %v2050_v19, 2  ;;  %v702_v15 = vshrl.u32 %v1859_v20, %v2048_v17 }
  0xb0   : > { %v705_v36 = vor.u32 %v704_v24, %v703_v21  ;;  %v708_v37 = vor.u32 %v707_v26, %v706_v23  ;;  %v711_v38 = vor.u32 %v710_v29, %v709_v27  ;;  %v714_v39 = vor.u32 %v713_v32, %v712_v30 }
  0xb1   : > { %v717_v40 = vor.u32 %v716_v35, %v715_v33 }
  0xb2   : > { %v726_v42 = vsel %vm718_vm3, %v705_v36, %v708_v37  ;;  %v730_v43 = vsel %vm718_vm3, %v708_v37, %v711_v38  ;;  %v727_v44 = vsel %vm721_vm4, %v714_v39, 920167782  ;;  %v723_v12 = vsel %vm721_vm4, %v711_v38, 2102212464 }
  0xb3   : > { %v731_v45 = vsel %vm721_vm4, %v717_v40, 1326507024  ;;  %v728_v46 = vsel %vm720_vm5, %v711_v38, %v727_v44  ;;  %v722_v24 = vsel %vm718_vm3, %v702_v15, %v705_v36  ;;  %v724_v25 = vsel %vm720_vm5, %v708_v37, %v723_v12 }
  0xb4   : > { %v732_v47 = vsel %vm720_vm5, %v714_v39, %v731_v45  ;;  %v729_v48 = vsel %vm719_vm6, %v726_v42, %v728_v46  ;;  %v725_v17 = vsel %vm719_vm6, %v722_v24, %v724_v25  ;;  %vm829_vm4 = vweird.f32 %v2030_v4  ;;  %v1678_v25 = vld [vmem:[%s2294_s5 + $0x28] sm:$0xff] }
  0xb5   : > { %v733_v49 = vsel %vm719_vm6, %v730_v43, %v732_v47  ;;  %v759_v54 = vand.u32 65535, %v729_v48  ;;  %v760_v55 = vshrl.u32 %v729_v48, 16  ;;  %v779_v33 = vmul.u32 %v2059_v41, %v725_v17  ;;  %908 = vmatpush.bf16.msra.mxu2 %v1678_v25 }
  0xb6   : > { %v737_v52 = vand.u32 65535, %v733_v49  ;;  %v738_v53 = vshrl.u32 %v733_v49, 16  ;;  %vm866_vm5 = vcmask 523264   ;;  %vm898_vm6 = vcmask 261120  }
  0xb7   : > { %v762_v58 = vmul.u32 %v760_v55, %v735_v50  ;;  %v763_v59 = vmul.u32 %v759_v54, %v736_v51  ;;  %v761_v63 = vmul.u32 %v759_v54, %v735_v50  ;;  %v764_v3 = vmul.u32 %v760_v55, %v736_v51 }
  0xb8   : > { %v740_v56 = vmul.u32 %v738_v53, %v735_v50  ;;  %v741_v57 = vmul.u32 %v737_v52, %v736_v51  ;;  %v739_v60 = vmul.u32 %v737_v52, %v735_v50  ;;  %v742_v62 = vmul.u32 %v738_v53, %v736_v51 }
  0xb9   : > { %v765_v0 = vshll.u32 %v762_v58, 16  ;;  %v767_v7 = vshll.u32 %v763_v59, 16  ;;  %v766_v22 = vshrl.u32 %v762_v58, 16  ;;  %v768_v28 = vshrl.u32 %v763_v59, 16 }
  0xba   : > { %v743_v61 = vshll.u32 %v740_v56, 16  ;;  %v745_v1 = vshll.u32 %v741_v57, 16  ;;  %v744_v16 = vshrl.u32 %v740_v56, 16  ;;  %v746_v26 = vshrl.u32 %v741_v57, 16 }
  0xbb   : > { %vm769_vm8 = vc.u32 %v761_v63, %v765_v0  ;;  %v771_v8 = vadd.s32 %v765_v0, %v761_v63 }
  0xbc   : > { %vm747_vm7 = vc.u32 %v739_v60, %v743_v61  ;;  %v749_v2 = vadd.s32 %v743_v61, %v739_v60  ;;  %v770_v10 = vsel %vm769_vm8, 1, %v1865_v5 }
  0xbd   : > { %v748_v6 = vsel %vm747_vm7, 1, %v1865_v5  ;;  %v772_v14 = vadd.s32 %v770_v10, %v764_v3  ;;  %vm773_vm10 = vc.u32 %v771_v8, %v767_v7  ;;  %v775_v31 = vadd.s32 %v771_v8, %v767_v7 }
  0xbe   : > { %v750_v9 = vadd.s32 %v748_v6, %v742_v62  ;;  %vm751_vm9 = vc.u32 %v749_v2, %v745_v1  ;;  %v774_v21 = vsel %vm773_vm10, 1, %v1865_v5  ;;  %vm1022_vm7 = vcmask 64512  }
  0xbf   : > { %v752_v13 = vsel %vm751_vm9, 1, %v1865_v5  ;;  %v776_v23 = vadd.s32 %v774_v21, %v772_v14 }
  0xc0   : > { %v754_v18 = vadd.s32 %v752_v13, %v750_v9 }
  0xc1   : > { %v777_v29 = vadd.s32 %v776_v23, %v766_v22 }
  0xc2   : > { %v755_v27 = vadd.s32 %v754_v18, %v744_v16 }
  0xc3   : > { %v778_v20 = vadd.s32 %v777_v29, %v768_v28  ;;  %v654_v28 = vld [vmem:[%s2295_s6] sm:$0x3] }
  0xc4   : > { %v756_v30 = vadd.s32 %v755_v27, %v746_v26  ;;  %v1677_v26 = vld [vmem:[%s2294_s5 + $0x20] sm:$0xff]  ;;  %v841_v29 = vperm.slane %v654_v28, 0 }
  0xc5   : > { %v782_v32 = vadd.s32 1, %v778_v20  ;;  %909 = vmatpush.bf16.msra.mxu2 %v1677_v26  ;;  %v2124_v27 = vld [vmem:[%s2296_s7] sm:$0xff] }
  0xc6   : > { %vm781_vm11 = vc.u32 %v756_v30, %v775_v31  ;;  %v780_v19 = vadd.s32 %v775_v31, %v756_v30  ;;  %976 = vrot.lane.b32.xlu2 %v2124_v27, %s1867_s3 }
  0xc7   : > { %v783_v34 = vsel %vm781_vm11, %v782_v32, %v778_v20  ;;  %vm1181_vm11 = vcmask 130048  }
  0xc8   : > { %v784_v35 = vadd.s32 %v783_v34, %v779_v33 }
  0xca   : > { %v785_v36 = vadd.s32 536870912, %v784_v35 }
  0xcc   : > { %v786_v38 = vshrl.u32 %v785_v36, 30  ;;  %v885_v36 = vperm.slane %v654_v28, 1 }
  0xce   : > { %v787_v39 = vshll.u32 %v786_v38, 30  ;;  %v810_v63 = vsub.s32 4, %v786_v38 }
  0xd0   : > { %v788_v37 = vsub.s32 %v784_v35, %v787_v39  ;;  %v811_v5 = vsel %vm688_vm14, %v810_v63, %v786_v38  ;;  %v1757_v35 = vld [vmem:[%s2297_s8] ss:$0 sm:$0xff] }
  0xd1   : > { %v813_v11 = vsel %vm2096_vm15, 0, %v811_v5  ;;  %959 = vrot.lane.b32.xlu1 %v1757_v35, %s1866_s28  ;;  %v2141_v38 = vld [vmem:[%s616_s26] sm:$0xff]  ;;  %s628_s26 = scalar_lea.vmem %s2291_s2, %s2021_s20  ;;  %s607_s20 = sand.u32 1, %s1841_s25  }
  0xd2   : > { %vm789_vm12 = vcmp.lt.s32.totalorder %v788_v37, 0  ;;  %v790_v40 = vsub.s32 0, %v788_v37  ;;  %v830_v13 = vand.u32 3, %v813_v11  ;;  %s1575_s22 = sshll.u32 %s607_s20, 3 }
  0xd3   : > { %s609_s30 = scalar_lea.vmem [#allocation2], %s1575_s22  ;;  %s1799_s22 = scalar_lea.hbm %s2306_s17, 16 }
  0xd4   : > { %v791_v42 = vsel %vm789_vm12, %v790_v40, %v788_v37  ;;  %vm832_vm1 = vcmp.eq.s32.totalorder %v830_v13, 0  ;;  %vm835_vm2 = vcmp.eq.s32.totalorder %v830_v13, 2  ;;  %vm831_vm3 = vcmp.lt.s32.totalorder %v830_v13, 2 }
  0xd5   : > { %v792_v43 = vclz %v791_v42 }
  0xd7   : > { %v1584_v44 = vadd.s32 4294967294, %v792_v43 }
  0xd9   : > { %vm1585_vm13 = vcmp.lt.s32.totalorder %v1584_v44, 0 }
  0xda   : > { %v795_v45 = vsel %vm1585_vm13, 0, %v1584_v44 }
  0xdb   : > { %v796_v46 = vsub.s32 32, %v795_v45  ;;  %v800_v47 = vsub.s32 4294967266, %v795_v45  ;;  %v797_v48 = vshll.u32 %v788_v37, %v795_v45 }
  0xdd   : > { %v798_v49 = vshrl.u32 %v780_v19, %v796_v46  ;;  %v801_v50 = vadd.s32 127, %v800_v47 }
  0xdf   : > { %v799_v41 = vor.u32 %v798_v49, %v797_v48  ;;  %v802_v51 = vshll.u32 %v801_v50, 23 }
  0xe1   : > { %v803_v52 = vor.u32 4788187, %v802_v51  ;;  %v806_v54 = vcvt.s32.f32 %v799_v41 }
  0xe3   : > { %v804_v53 = vand.u32 2147483647, %v803_v52 }
  0xe5   : > { %v807_v55 = vmul.f32 %v806_v54, %v804_v53  ;;  %v975_v54 = vpack.c.bf16 %v2141_v38, %v2141_v38 }
  0xe7   : > { %v808_v56 = vxor.u32 2147483648, %v807_v55 }
  0xe9   : > { %v809_v58 = vsel %vm688_vm14, %v808_v56, %v807_v55 }
  0xea   : > { %v812_v59 = vsel %vm2096_vm15, %v2030_v4, %v809_v58  ;;  %v2116_v4 = vld [vmem:[%s2296_s7 + $0x8] sm:$0xff] }
  0xeb   : > { %v814_v60 = vmul.f32 %v812_v59, %v812_v59  ;;  %955 = vrot.lane.b32.xlu0 %v2116_v4, %s1866_s28  ;;  %946 = vmatpush.bf16.msra.mxu3 %v2116_v4 }
  0xec   : > { %978 = vrot.lane.b32.xlu1 %v2116_v4, %s1867_s3 }
  0xed   : > { %v815_v61 = vmul.f32 -0.001358992, %v814_v60  ;;  %v822_v62 = vmul.f32 -0.00019511016, %v814_v60 }
  0xef   : > { %v816_v0 = vadd.f32 0.041655596, %v815_v61  ;;  %v823_v1 = vadd.f32 0.008332121, %v822_v62  ;;  %947 = vmatpush.bf16.msra.mxu3 %v2124_v27 }
  0xf1   : > { %v817_v2 = vmul.f32 %v816_v0, %v814_v60  ;;  %v824_v3 = vmul.f32 %v823_v1, %v814_v60 }
  0xf3   : > { %v818_v6 = vadd.f32 -0.4999988, %v817_v2  ;;  %v825_v7 = vadd.f32 -0.16666654, %v824_v3  ;;  %953 = vrot.lane.b32.xlu0 %v2124_v27, %s1866_s28 }
  0xf4   : > { %982 = vrot.lane.b32.xlu1 %v1757_v35, %s1867_s3 }
  0xf5   : > { %v819_v8 = vmul.f32 %v818_v6, %v814_v60  ;;  %v826_v9 = vmul.f32 %v825_v7, %v814_v60 }
  0xf7   : > { %v820_v10 = vadd.f32 1.0, %v819_v8  ;;  %v827_v12 = vadd.f32 1.0, %v826_v9 }
  0xf9   : > { %v828_v14 = vmul.f32 %v827_v12, %v812_v59  ;;  %v836_v15 = vxor.u32 2147483648, %v820_v10 }
  0xfb   : > { %v833_v16 = vxor.u32 2147483648, %v828_v14  ;;  %v837_v21 = vsel %vm835_vm2, %v836_v15, %v828_v14 }
  0xfc   : > { %1058 = vrot.lane.b32.xlu1 %v2116_v4, %s1868_s18 }
  0xfd   : > { %v834_v18 = vsel %vm832_vm1, %v820_v10, %v833_v16 }
  0xfe   : > { %v838_v22 = vsel %vm831_vm3, %v834_v18, %v837_v21 }
  0xff   : > { %v839_v23 = vsel %vm829_vm4, nan, %v838_v22 }
 0x100   : > { %v840_v24 = vpack.c.bf16 %v839_v23, %v839_v23 }
 0x102   : > { %1602 = vmatmul.msk.bf16.vlgmr.msra.gmra.mxu1 %vm866_vm5, %v840_v24  ;;  %v1869_v24 = vmov 32.0  }
 0x104   : > { %1056 = vrot.lane.b32.xlu1 %v2124_v27, %s1868_s18 }
 0x10c   : > { %1079 = vrot.lane.b32.xlu1 %v1757_v35, %s1868_s18 }
 0x120   : > { %v977_v53 = vpop.permute.xlu2 %976 }
 0x143   : > { %v960_v44 = vpop.permute.xlu1 %959 }
 0x15d   : > { %v956_v33 = vpop.permute.xlu0 %955 }
 0x15e   : > { %968 = vmatpush.bf16.msrb.mxu0 %v956_v33  ;;  %v979_v52 = vpop.permute.xlu1 %978  ;;  %v1682_v33 = vld [vmem:[%s2298_s9 + $0x8] sm:$0xff] }
 0x15f   : > { %994 = vmatpush.bf16.msrb.mxu2 %v979_v52 }
 0x163   : > { %995 = vmatpush.bf16.msrb.mxu2 %v977_v53 }
 0x165   : > { %v954_v34 = vpop.permute.xlu0 %953 }
 0x166   : > { %969 = vmatpush.bf16.msrb.mxu0 %v954_v34  ;;  %v983_v58 = vpop.permute.xlu1 %982  ;;  %v1681_v34 = vld [vmem:[%s2298_s9] sm:$0xff] }
 0x16e   : > { %v1059_v6 = vpop.permute.xlu1 %1058 }
 0x16f   : > { %1071 = vmatpush.bf16.msrb.mxu1 %v1059_v6 }
 0x176   : > { %v1057_v8 = vpop.permute.xlu1 %1056 }
 0x177   : > { %1072 = vmatpush.bf16.msrb.mxu1 %v1057_v8 }
 0x17e   : > { %v1080_v16 = vpop.permute.xlu1 %1079 }
 0x17f   : > { %v879_v30 = vpop.f32.mrf.mxu1 }
 0x180   : > { %v880_v31 = vadd.f32 %v879_v30, %v841_v29 }
 0x182   : > { %v883_v17 = vmax.f32 %v880_v31, 0.0 }
 0x184   : > { %v884_v20 = vpack.c.bf16 %v883_v17, %v883_v17 }
 0x186   : > { %1611 = vmatmul.msk.bf16.vlgmr.msra.gmra.mxu2 %vm898_vm6, %v884_v20 }
 0x187   : > { %v881_v32 = vpop.f32.mrf.mxu1  ;;  %1149 = vmatpush.bf16.msra.mxu2 %v1682_v33 }
 0x18b   : > { %1150 = vmatpush.bf16.msra.mxu2 %v1681_v34 }
 0x196   : > { %1622 = vmatmul.msk.bf16.vlgmr.msrb.gmra.mxu2 %vm898_vm6, %v975_v54 }
 0x209   : > { %v911_v39 = vpop.f32.mrf.mxu2 }
 0x20a   : > { %v2143_v37 = vadd.f32 %v911_v39, %v885_v36 }
 0x20c   : > { %v920_v40 = vadd.f32 %v2143_v37, %v2141_v38 }
 0x20e   : > { %v921_v42 = vpack.c.bf16 %v920_v40, %v920_v40 }
 0x210   : > { %1620 = vmatmul.msk.bf16.vlgmr.msra.gmra.mxu3 %vm898_vm6, %v921_v42  ;;  %1621 = vmatmul.msk.bf16.vlgmr.msrb.gmra.mxu0 %vm898_vm6, %v921_v42 }
 0x211   : > { %v913_v43 = vpop.f32.mrf.mxu2 }
 0x219   : > { %v997_v59 = vpop.f32.mrf.mxu2 }
 0x21a   : > { %v998_v60 = vadd.f32 %v997_v59, %v983_v58 }
 0x21c   : > { %v1035_v63 = vpack.c.bf16 %v998_v60, %v998_v60 }
 0x21e   : > { %v1040_v1 = vsel %vm662_vm0, %v1035_v63, 0 }
 0x21f   : > { %1049 = vmatpush.bf16.msra.mxu0 %v1040_v1 }
 0x221   : > { %v999_v2 = vpop.f32.mrf.mxu2 }
 0x28d   : > { %v971_v45 = vpop.f32.mrf.mxu0 }
 0x28e   : > { %v972_v19 = vadd.f32 %v971_v45, %v960_v44 }
 0x290   : > { %v1002_v46 = vpack.c.bf16 %v972_v19, %v972_v19  ;;  %v2184_v19 = vld [vmem:[%s2304_s15] sm:$0xff] }
 0x292   : > { %v1007_v47 = vsel %vm898_vm6, %v1002_v46, 0 }
 0x293   : > { %v949_v48 = vpop.f32.mrf.mxu3  ;;  %1016 = vmatpush.bf16.xpose.msrb.mxu3 %v1007_v47 }
 0x294   : > { %v950_v49 = vadd.f32 %v1757_v35, %v949_v48  ;;  %v1112_v48 = vperm.slane %v2184_v19, 0 }
 0x295   : > { %v973_v50 = vpop.f32.mrf.mxu0 }
 0x296   : > { %v1001_v41 = vpack.c.bf16 %v950_v49, %v950_v49  ;;  %v1114_v50 = vperm.slane %v2184_v19, 1 }
 0x29a   : > { %1623 = vmatmul.msk.bf16.vlgmr.msrb.gmra.mxu3 %vm898_vm6, %v1001_v41 }
 0x29b   : > { %v951_v51 = vpop.f32.mrf.mxu3 }
 0x31d   : > { %v1018_v55 = vpop.f32.mrf.mxu3 }
 0x31e   : > { %v1023_v56 = vsel %vm1022_vm7, %v1018_v55, -inf }
 0x31f   : > { %1024 = vmax.xlane.f32.xlu2 %v1023_v56 }
 0x325   : > { %v1020_v57 = vpop.f32.mrf.mxu3 }
 0x392   : > { %v1025_v61 = vpop.xlane.xlu2 %1024 }
 0x393   : > { %v1026_v62 = vsub.f32 %v1018_v55, %v1025_v61  ;;  %v1758_v55 = vld [vmem:[%s2299_s10] ss:$0 sm:$0xff] }
 0x395   : > { %v1027_v0 = vmul.f32 1.442695, %v1026_v62 }
 0x397   : > { %1761 = vpow2.f32 %v1027_v0 }
 0x39d   : > { %v1762_v3 = vpop.eup %1761 }
 0x39e   : > { %v1029_v5 = vsel %vm1022_vm7, %v1762_v3, 0.0 }
 0x39f   : > { %1030 = vadd.xlane.f32.xlu0 %v1029_v5 }
 0x412   : > { %v1031_v7 = vpop.xlane.xlu0 %1030 }
 0x413   : > { %1763 = vrcp.f32 %v1031_v7 }
 0x414   : > { %1765 = vrcp.f32 %v1869_v24 }
 0x419   : > { %v1764_v11 = vpop.eup %1763 }
 0x41a   : > { %v1033_v9 = vmul.f32 %v1764_v11, %v1762_v3  ;;  %v1766_v25 = vpop.eup %1765 }
 0x41b   : > { %v1087_v26 = vmul.f32 32.0, %v1766_v25  ;;  %vm1091_vm0 = vweird.f32 %v1766_v25 }
 0x41c   : > { %v1034_v10 = vpack.c.bf16 %v1033_v9, %v1033_v9 }
 0x41d   : > { %v1088_v4 = vsub.f32 1.0, %v1087_v26 }
 0x41e   : > { %1624 = vmatmul.msk.bf16.vlgmr.msra.gmra.mxu0 %vm1022_vm7, %v1034_v10 }
 0x41f   : > { %v1089_v27 = vmul.f32 %v1766_v25, %v1088_v4 }
 0x421   : > { %v1090_v28 = vadd.f32 %v1766_v25, %v1089_v27  ;;  %v1685_v27 = vld [vmem:[%s2300_s11 + $0x8] sm:$0xff] }
 0x422   : > { %1297 = vmatpush.bf16.msrb.mxu2 %v1685_v27 }
 0x423   : > { %v2165_v29 = vsel %vm1091_vm0, %v1766_v25, %v1090_v28  ;;  %v1684_v28 = vld [vmem:[%s2300_s11] sm:$0xff] }
 0x426   : > { %1298 = vmatpush.bf16.msrb.mxu2 %v1684_v28 }
 0x49b   : > { %v1051_v12 = vpop.f32.mrf.mxu0 }
 0x49c   : > { %v1055_v13 = vpack.c.bf16 %v1051_v12, %v1051_v12 }
 0x49e   : > { %1625 = vmatmul.msk.bf16.vlgmr.msrb.gmra.mxu1 %vm898_vm6, %v1055_v13 }
 0x4a3   : > { %v1053_v14 = vpop.f32.mrf.mxu0 }
 0x51b   : > { %v1074_v15 = vpop.f32.mrf.mxu1 }
 0x51c   : > { %v1078_v18 = vadd.f32 %v1074_v15, %v2141_v38  ;;  %v1683_v38 = vld [vmem:[%s628_s26] sm:$0xff]  ;;  %s1438_s26 = sshll.u32 %s609_s30, 4  ;;  %s1439_s26 = int_to_ptr.vmem [resolvable:$true] %s1438_s26 }
 0x51d   : > { %v1166_v40 = vsel %vm898_vm6, %v1683_v38, 0 }
 0x51e   : > { %v1082_v21 = vadd.f32 %v1080_v16, %v1078_v18  ;;  %1175 = vmatpush.bf16.xpose.msra.mxu3 %v1166_v40  ;;  %v1263_v40 = vperm.slane %v2184_v19, 2 }
 0x520   : > { %v1083_v22 = vsel %vm898_vm6, %v1082_v21, 0.0 }
 0x521   : > { %1084 = vadd.xlane.f32.xlu1 %v1083_v22 }
 0x523   : > { %v1076_v23 = vpop.f32.mrf.mxu1 }
 0x594   : > { %v1085_v30 = vpop.xlane.xlu1 %1084 }
 0x595   : > { %v1093_v31 = vmul.f32 %v2165_v29, %v1085_v30  ;;  %v1689_v30 = vld [vmem:[%s2302_s13 + $0x18] sm:$0xff] }
 0x596   : > { %1345 = vmatpush.bf16.msrb.mxu3 %v1689_v30 }
 0x597   : > { %v1094_v17 = vsub.f32 %v1082_v21, %v1093_v31 }
 0x599   : > { %v1095_v20 = vmul.f32 %v1094_v17, %v1094_v17 }
 0x59b   : > { %v1096_v32 = vsel %vm898_vm6, %v1095_v20, 0.0  ;;  %v1688_v20 = vld [vmem:[%s2302_s13 + $0x10] sm:$0xff] }
 0x59c   : > { %1097 = vadd.xlane.f32.xlu2 %v1096_v32  ;;  %1346 = vmatpush.bf16.msrb.mxu3 %v1688_v20 }
 0x60f   : > { %v1098_v35 = vpop.xlane.xlu2 %1097 }
 0x610   : > { %v1099_v36 = vmul.f32 %v1098_v35, %v2165_v29 }
 0x612   : > { %v1100_v39 = vadd.f32 1e-05, %v1099_v36 }
 0x614   : > { %1767 = vrsqrt.f32 %v1100_v39  ;;  %vm1107_vm9 = vweird.f32 %v1100_v39 }
 0x61a   : > { %v1768_v42 = vpop.eup %1767 }
 0x61b   : > { %v1102_v43 = vmul.f32 %v1768_v42, %v1100_v39  ;;  %vm1108_vm8 = vweird.f32 %v1768_v42 }
 0x61c   : > { %vm1109_vm10 = vmor %vm1107_vm9, %vm1108_vm8 }
 0x61d   : > { %v1103_v44 = vmul.f32 %v1768_v42, %v1102_v43  ;;  %v1265_v43 = vperm.slane %v2184_v19, 3 }
 0x61f   : > { %v1104_v45 = vmul.f32 0.5, %v1103_v44 }
 0x621   : > { %v1105_v46 = vsub.f32 1.5, %v1104_v45 }
 0x623   : > { %v1106_v47 = vmul.f32 %v1768_v42, %v1105_v46 }
 0x625   : > { %v1110_v49 = vsel %vm1109_vm10, %v1768_v42, %v1106_v47 }
 0x626   : > { %v1111_v41 = vmul.f32 %v1110_v49, %v1094_v17  ;;  %v1686_v49 = vld [vmem:[%s2302_s13] sm:$0xff] }
 0x628   : > { %v1113_v51 = vmul.f32 %v1112_v48, %v1111_v41  ;;  %v1687_v48 = vld [vmem:[%s2302_s13 + $0x8] sm:$0xff] }
 0x629   : > { %1347 = vmatpush.bf16.msrb.mxu3 %v1687_v48 }
 0x62a   : > { %v1115_v52 = vadd.f32 %v1114_v50, %v1113_v51  ;;  %v1759_v50 = vld [vmem:[%s2301_s12] ss:$0 sm:$0xff] }
 0x62c   : > { %v1123_v53 = vadd.f32 %v1115_v52, %v2143_v37 }
 0x62d   : > { %1348 = vmatpush.bf16.msrb.mxu3 %v1686_v49 }
 0x62e   : > { %v1124_v54 = vpack.c.bf16 %v1123_v53, %v1123_v53 }
 0x630   : > { %1634 = vmatmul.msk.bf16.vlgmr.msra.gmra.mxu2 %vm898_vm6, %v1124_v54 }
 0x6b3   : > { %v1152_v56 = vpop.f32.mrf.mxu2 }
 0x6b4   : > { %v1153_v57 = vadd.f32 %v1758_v55, %v1152_v56 }
 0x6b6   : > { %v1156_v58 = vpack.c.bf16 %v1153_v57, %v1153_v57 }
 0x6b8   : > { %1639 = vmatmul.msk.bf16.vlgmr.msra.gmra.mxu3 %vm898_vm6, %v1156_v58 }
 0x6bb   : > { %v1154_v59 = vpop.f32.mrf.mxu2 }
 0x73b   : > { %v1177_v60 = vpop.f32.mrf.mxu3 }
 0x73c   : > { %v1182_v61 = vsel %vm1181_vm11, %v1177_v60, -inf }
 0x73d   : > { %1183 = vmax.xlane.f32.xlu2 %v1182_v61 }
 0x743   : > { %v1179_v62 = vpop.f32.mrf.mxu3 }
 0x755   : > { %1194 = vrot.lane.b32.xlu2 %v1683_v38, %s1866_s28 }
 0x75d   : > { %1237 = vrot.lane.b32.xlu2 %v1758_v55, %s1866_s28  ;;  %v1760_v55 = vld [vmem:[%s2303_s14] ss:$0 sm:$0xff] }
 0x7b0   : > { %v1184_v37 = vpop.xlane.xlu2 %1183 }
 0x7b1   : > { %v1185_v63 = vsub.f32 %v1177_v60, %v1184_v37 }
 0x7b3   : > { %v1186_v0 = vmul.f32 1.442695, %v1185_v63 }
 0x7b5   : > { %1769 = vpow2.f32 %v1186_v0 }
 0x7b8   : > { %v1195_v3 = vpop.permute.xlu2 %1194 }
 0x7b9   : > { %1207 = vmatpush.bf16.msrb.mxu0 %v1195_v3 }
 0x7bb   : > { %v1770_v1 = vpop.eup %1769 }
 0x7bc   : > { %v1188_v2 = vsel %vm1181_vm11, %v1770_v1, 0.0 }
 0x7bd   : > { %1189 = vadd.xlane.f32.xlu0 %v1188_v2 }
 0x7c0   : > { %v1238_v15 = vpop.permute.xlu2 %1237 }
 0x7d1   : > { %1216 = vrot.lane.b32.xlu0 %v1682_v33, %s1866_s28 }
 0x7d9   : > { %1214 = vrot.lane.b32.xlu0 %v1681_v34, %s1866_s28  ;;  %s1669_s28 = sshll.u32 %s1849_s27, 3  ;;  %s1422_s27 = scalar_lea.sflag [#allocation3], %s607_s20 }
 0x7da   : > { %s1436_s0 = scalar_lea.hbm %s2306_s17, %s1669_s28 }
 0x7db   : > { %s1440_s3 = sshll.u32 %s1436_s0, 4  ;;  %s1441_s3 = int_to_ptr.hbm [resolvable:$true] %s1440_s3 }
 0x7dc   : > { %s1793_s18 = sshra.s32 %s1441_s3, 4  ;;  %s1794_s18 = int_to_ptr.hbm [resolvable:$true] %s1793_s18 }
 0x7dd   : > { %p1800_p1 = scmp.lt.s32.totalorder %s1794_s18, %s2306_s17 }
 0x830   : > { %v1190_v5 = vpop.xlane.xlu0 %1189 }
 0x831   : > { %1771 = vrcp.f32 %v1190_v5 }
 0x837   : > { %v1772_v6 = vpop.eup %1771 }
 0x838   : > { %v1192_v7 = vmul.f32 %v1772_v6, %v1770_v1 }
 0x83a   : > { %v1193_v11 = vpack.c.bf16 %v1192_v7, %v1192_v7 }
 0x83c   : > { %1640 = vmatmul.msk.bf16.vlgmr.msrb.gmra.mxu0 %vm1181_vm11, %v1193_v11 }
 0x843   : > { %v1217_v8 = vpop.permute.xlu0 %1216 }
 0x844   : > { %1229 = vmatpush.bf16.msra.mxu1 %v1217_v8 }
 0x84b   : > { %v1215_v9 = vpop.permute.xlu0 %1214 }
 0x84c   : > { %1230 = vmatpush.bf16.msra.mxu1 %v1215_v9 }
 0x8b9   : > { %v1209_v10 = vpop.f32.mrf.mxu0 }
 0x8ba   : > { %v1213_v12 = vpack.c.bf16 %v1209_v10, %v1209_v10  ;;  %v1382_v10 = vperm.slane %v2184_v19, 4 }
 0x8bc   : > { %1641 = vmatmul.msk.bf16.vlgmr.msra.gmra.mxu1 %vm898_vm6, %v1213_v12 }
 0x8c1   : > { %v1211_v13 = vpop.f32.mrf.mxu0 }
 0x939   : > { %v1232_v14 = vpop.f32.mrf.mxu1 }
 0x93a   : > { %v1236_v16 = vadd.f32 %v1232_v14, %v1115_v52  ;;  %v1384_v14 = vperm.slane %v2184_v19, 5 }
 0x93c   : > { %v1240_v18 = vadd.f32 %v1238_v15, %v1236_v16 }
 0x93e   : > { %v1241_v21 = vsel %vm898_vm6, %v1240_v18, 0.0 }
 0x93f   : > { %1242 = vadd.xlane.f32.xlu1 %v1241_v21 }
 0x941   : > { %v1234_v22 = vpop.f32.mrf.mxu1 }
 0x9b2   : > { %v1243_v23 = vpop.xlane.xlu1 %1242 }
 0x9b3   : > { %v1244_v24 = vmul.f32 %v1243_v23, %v2165_v29 }
 0x9b5   : > { %v1245_v25 = vsub.f32 %v1240_v18, %v1244_v24 }
 0x9b7   : > { %v1246_v26 = vmul.f32 %v1245_v25, %v1245_v25 }
 0x9b9   : > { %v1247_v4 = vsel %vm898_vm6, %v1246_v26, 0.0 }
 0x9ba   : > { %1248 = vadd.xlane.f32.xlu0 %v1247_v4 }
 0xa2d   : > { %v1249_v31 = vpop.xlane.xlu0 %1248 }
 0xa2e   : > { %v1250_v17 = vmul.f32 %v1249_v31, %v2165_v29 }
 0xa30   : > { %v1251_v32 = vadd.f32 1e-05, %v1250_v17 }
 0xa32   : > { %1773 = vrsqrt.f32 %v1251_v32  ;;  %vm1258_vm13 = vweird.f32 %v1251_v32 }
 0xa38   : > { %v1774_v33 = vpop.eup %1773 }
 0xa39   : > { %v1253_v34 = vmul.f32 %v1774_v33, %v1251_v32  ;;  %vm1259_vm12 = vweird.f32 %v1774_v33 }
 0xa3a   : > { %vm1260_vm14 = vmor %vm1258_vm13, %vm1259_vm12 }
 0xa3b   : > { %v1254_v35 = vmul.f32 %v1774_v33, %v1253_v34 }
 0xa3d   : > { %v1255_v36 = vmul.f32 0.5, %v1254_v35  ;;  %v1411_v35 = vperm.slane %v2184_v19, 7 }
 0xa3f   : > { %v1256_v38 = vsub.f32 1.5, %v1255_v36 }
 0xa41   : > { %v1257_v39 = vmul.f32 %v1774_v33, %v1256_v38 }
 0xa43   : > { %v1261_v42 = vsel %vm1260_vm14, %v1774_v33, %v1257_v39  ;;  %v1409_v33 = vperm.slane %v2184_v19, 6 }
 0xa44   : > { %v1262_v44 = vmul.f32 %v1261_v42, %v1245_v25 }
 0xa46   : > { %v1264_v45 = vmul.f32 %v1263_v40, %v1262_v44 }
 0xa48   : > { %v1266_v46 = vadd.f32 %v1265_v43, %v1264_v45 }
 0xa4a   : > { %v1271_v47 = vpack.c.bf16 %v1266_v46, %v1266_v46 }
 0xa4c   : > { %1650 = vmatmul.msk.bf16.vlgmr.msrb.gmra.mxu2 %vm898_vm6, %v1271_v47 }
 0xacf   : > { %v1300_v41 = vpop.f32.mrf.mxu2 }
 0xad0   : > { %v1301_v51 = vadd.f32 %v1759_v50, %v1300_v41 }
 0xad2   : > { %v1304_v52 = vmax.f32 %v1301_v51, 0.0 }
 0xad4   : > { %v1313_v53 = vpack.c.bf16 %v1304_v52, %v1304_v52 }
 0xad6   : > { %1667 = vmatmul.msk.bf16.vlgmr.msrb.gmra.mxu3 %vm866_vm5, %v1313_v53 }
 0xad7   : > { %v1302_v54 = vpop.f32.mrf.mxu2 }
 0xb59   : > { %v1350_v56 = vpop.f32.mrf.mxu3 }
 0xb5a   : > { %v1354_v57 = vadd.f32 %v1350_v56, %v1266_v46 }
 0xb5c   : > { %v1359_v58 = vadd.f32 %v1760_v55, %v1354_v57 }
 0xb5e   : > { %v1360_v59 = vsel %vm898_vm6, %v1359_v58, 0.0 }
 0xb5f   : > { %1361 = vadd.xlane.f32.xlu2 %v1360_v59 }
 0xb61   : > { %v1352_v60 = vpop.f32.mrf.mxu3 }
 0xbd2   : > { %v1362_v61 = vpop.xlane.xlu2 %1361 }
 0xbd3   : > { %v1363_v62 = vmul.f32 %v1362_v61, %v2165_v29 }
 0xbd5   : > { %v1364_v37 = vsub.f32 %v1359_v58, %v1363_v62 }
 0xbd7   : > { %v1365_v63 = vmul.f32 %v1364_v37, %v1364_v37 }
 0xbd9   : > { %v1366_v0 = vsel %vm898_vm6, %v1365_v63, 0.0 }
 0xbda   : > { %1367 = vadd.xlane.f32.xlu1 %v1366_v0 }
 0xc4d   : > { %v1368_v1 = vpop.xlane.xlu1 %1367 }
 0xc4e   : > { %v1369_v2 = vmul.f32 %v1368_v1, %v2165_v29 }
 0xc50   : > { %v1370_v3 = vadd.f32 1e-05, %v1369_v2 }
 0xc52   : > { %1775 = vrsqrt.f32 %v1370_v3  ;;  %vm1377_vm1 = vweird.f32 %v1370_v3 }
 0xc58   : > { %v1776_v5 = vpop.eup %1775 }
 0xc59   : > { %v1372_v6 = vmul.f32 %v1776_v5, %v1370_v3  ;;  %vm1378_vm15 = vweird.f32 %v1776_v5 }
 0xc5a   : > { %vm1379_vm2 = vmor %vm1377_vm1, %vm1378_vm15 }
 0xc5b   : > { %v1373_v7 = vmul.f32 %v1776_v5, %v1372_v6 }
 0xc5d   : > { %v1374_v11 = vmul.f32 0.5, %v1373_v7 }
 0xc5f   : > { %v1375_v8 = vsub.f32 1.5, %v1374_v11 }
 0xc61   : > { %v1376_v9 = vmul.f32 %v1776_v5, %v1375_v8 }
 0xc63   : > { %v1380_v12 = vsel %vm1379_vm2, %v1776_v5, %v1376_v9 }
 0xc64   : > { %v1381_v13 = vmul.f32 %v1380_v12, %v1364_v37 }
 0xc66   : > { %v1383_v15 = vmul.f32 %v1382_v10, %v1381_v13 }
 0xc68   : > { %v1385_v16 = vadd.f32 %v1384_v14, %v1383_v15 }
 0xc6a   : > { %v1387_v18 = vsel %vm898_vm6, %v1385_v16, 0.0  ;;  %1386 = vst.msk [vmem:[%s635_s21] sm:$0xff] %vm898_vm6, %v1385_v16  ;;  %s1795_s21 = scalar_lea.hbm %s1794_s18, 8 }
 0xc6b   : > { %1388 = vadd.xlane.f32.xlu1 %v1387_v18  ;;  %p1796_p12 = scmp.ne.s32.totalorder %s1794_s18, %s1795_s21  ;;  %p1801_p2 = scmp.lt.s32.totalorder %s1799_s22, %s1795_s21 }
 0xc6d   : > { %p1797_p13 = pnand %p1796_p12, %p2000_p4  ;;  %p1802_p3 = por %p1801_p2, %p1800_p1 }
 0xc6f   : > { %p1798_p0 = pneg %p1797_p13 }
 0xc71   : > { %p1803_p5 = pnand %p1802_p3, %p1798_p0 }
 0xcde   : > { %v1389_v21 = vpop.xlane.xlu1 %1388 }
 0xcdf   : > { %v1390_v22 = vmul.f32 %v1389_v21, %v2165_v29 }
 0xce1   : > { %v1391_v23 = vsub.f32 %v1385_v16, %v1390_v22 }
 0xce3   : > { %v1392_v24 = vmul.f32 %v1391_v23, %v1391_v23 }
 0xce5   : > { %v1393_v25 = vsel %vm898_vm6, %v1392_v24, 0.0 }
 0xce6   : > { %1394 = vadd.xlane.f32.xlu1 %v1393_v25 }
 0xd59   : > { %v1395_v26 = vpop.xlane.xlu1 %1394 }
 0xd5a   : > { %v1396_v4 = vmul.f32 %v1395_v26, %v2165_v29 }
 0xd5c   : > { %v1397_v27 = vadd.f32 1e-05, %v1396_v4 }
 0xd5e   : > { %1777 = vrsqrt.f32 %v1397_v27  ;;  %vm1404_vm4 = vweird.f32 %v1397_v27 }
 0xd64   : > { %v1778_v28 = vpop.eup %1777 }
 0xd65   : > { %v1399_v30 = vmul.f32 %v1778_v28, %v1397_v27  ;;  %vm1405_vm3 = vweird.f32 %v1778_v28 }
 0xd66   : > { %vm1406_vm5 = vmor %vm1404_vm4, %vm1405_vm3 }
 0xd67   : > { %v1400_v31 = vmul.f32 %v1778_v28, %v1399_v30 }
 0xd69   : > { %v1401_v17 = vmul.f32 0.5, %v1400_v31 }
 0xd6b   : > { %v1402_v20 = vsub.f32 1.5, %v1401_v17 }
 0xd6d   : > { %v1403_v32 = vmul.f32 %v1778_v28, %v1402_v20 }
 0xd6f   : > { %v1407_v29 = vsel %vm1406_vm5, %v1778_v28, %v1403_v32 }
 0xd70   : > { %v1408_v34 = vmul.f32 %v1407_v29, %v1391_v23 }
 0xd72   : > { %v1410_v36 = vmul.f32 %v1409_v33, %v1408_v34 }
 0xd74   : > { %v1412_v38 = vadd.f32 %v1411_v35, %v1410_v36 }
 0xd76   : > { %1413 = vst.msk [vmem:[%s609_s30] sm:$0xff] %vm898_vm6, %v1412_v38 }
 0xd77   : > { %1806 = shalt.err (!%p1803_p5)
}
 0xd78   : > { %1690 = dma.vmem_to_hbm [thread:$0]  (%p2000_p4), %s1439_s26, 128, %s1441_s3, %s1422_s27  }
 0xd79 PF: > { %p1696_p6 = scmp.ge.s32.totalorder %s1857_s29, 2  ;;  %s1462_s30 = sand.u32 1, %s1837_s24  }
 0xd7a   : > { %s1463_s28 = scalar_lea.sflag [#allocation3], %s1462_s30 }
 0xd7b   : > { %p1693_p7 = pnand %p1696_p6, %p2007_p8 }
 0xd7d   : > { %p1694_p9 = pneg %p1693_p7 }
 0xd7f   : > { %1832 = dma.done.wait (%p1694_p9), %s1463_s28, 128  }
 0xd80   : > { %1834 = vsyncadd (%p1694_p9), %s1463_s28, 4294967168  ;;  %s31_s29 = sadd.s32 1, %s1857_s29   ;;  %s2327_s18 = sld [smem:[#allocation5_spill]] }
 0xd81   : > { %p28_p10 = scmp.ge.s32.totalorder %s31_s29, 4   ;;  %s2328_s26 = sld [smem:[#allocation9_spill]] }
 0xd82   : > { %s2329_s27 = sld [smem:[#allocation6_spill]]  ;;  %s2331_s24 = smov %s1841_s25 }
 0xd83   : > { %s2330_s28 = sld [smem:[#allocation7_spill]]  ;;  %30 = sbr.rel (!%p28_p10) target bundleno = 8 (0x8), region = 137 }
 0xd86   : > { %s2332_s25 = smov %s2327_s18 }
 0xd88   :  { %1469 = vsyncpa [#allocation3], 1 }
 0xd89   :  { %1471 = vsyncpa [#allocation3 + $0x1], 1 }

// kernel: run.18
= control target key start
LH: loop header
LB: loop body
LE: loop exit
PB: predicated region body
PF: predicated region fallthrough
CT: control target
= control target key end

     0   :  { %vm49_vm0 = vcmask 261120   ;;  %s259_s1 = inlined_call_operand.vmem [shape: bf16[32,32], index: 1, kind: input, shape index: {}]   ;;  %s260_s0 = inlined_call_operand.vmem [shape: f32[4,32], index: 0, kind: input, shape index: {}]   ;;  %s261_s2 = inlined_call_operand.vmem [shape: f32[1,32], index: 2, kind: input, shape index: {}]   ;;  %s262_s4 = inlined_call_operand.vmem [shape: f32[1,32], index: 4, kind: input, shape index: {}]   ;;  %s263_s3 = inlined_call_operand.vmem [shape: bf16[32,32], index: 3, kind: input, shape index: {}]   ;;  %s264_s6 = inlined_call_operand.vmem [shape: f32[1,128], index: 6, kind: input, shape index: {}]   ;;  %s265_s5 = inlined_call_operand.vmem [shape: bf16[32,128], index: 5, kind: input, shape index: {}]   ;;  %s266_s7 = inlined_call_operand.vmem [shape: f32[4,128], index: 7, kind: output, shape index: {}]  }
   0x1   :  { %v175_v0 = vld [vmem:[%s259_s1 + $0x8] sm:$0xff]  ;;  %v174_v1 = vld [vmem:[%s259_s1] sm:$0xff] }
   0x2   :  { %59 = vmatpush.bf16.msra.mxu0 %v175_v0  ;;  %v27_v2 = vld [vmem:[%s260_s0] sm:$0xf]  ;;  %v177_v4 = vld [vmem:[%s263_s3 + $0x8] sm:$0xff] }
   0x3   :  { %v33_v3 = vpack.c.bf16 %v27_v2, %v27_v2  ;;  %97 = vmatpush.bf16.msra.mxu1 %v177_v4  ;;  %v176_v5 = vld [vmem:[%s263_s3] sm:$0xff]  ;;  %v179_v12 = vld [vmem:[%s265_s5 + $0x8] sm:$0xff] }
   0x4   :  { %v180_v6 = vld [vmem:[%s261_s2] ss:$0 sm:$0xff]  ;;  %135 = vmatpush.bf16.msra.mxu2 %v179_v12 }
   0x5   :  { %v178_v13 = vld [vmem:[%s265_s5] sm:$0xff] }
   0x6   :  { %60 = vmatpush.bf16.msra.mxu0 %v174_v1  ;;  %v181_v14 = vld [vmem:[%s262_s4] ss:$0 sm:$0xff] }
   0x7   :  { %98 = vmatpush.bf16.msra.mxu1 %v176_v5  ;;  %v182_v20 = vld [vmem:[%s264_s6] ss:$0 sm:$0xff] }
   0x8   :  { %136 = vmatpush.bf16.msra.mxu2 %v178_v13 }
   0x9   :  { %155 = vmatmul.msk.bf16.vlgmr.msra.gmra.mxu0 %vm49_vm0, %v33_v3 }
  0x86   :  { %v62_v7 = vpop.f32.mrf.mxu0 }
  0x87   :  { %v63_v8 = vadd.f32 %v180_v6, %v62_v7 }
  0x89   :  { %v66_v9 = vmax.f32 %v63_v8, 0.0 }
  0x8b   :  { %v72_v10 = vpack.c.bf16 %v66_v9, %v66_v9 }
  0x8d   :  { %164 = vmatmul.msk.bf16.vlgmr.msra.gmra.mxu1 %vm49_vm0, %v72_v10 }
  0x8e   :  { %v64_v11 = vpop.f32.mrf.mxu0 }
 0x10a   :  { %v100_v15 = vpop.f32.mrf.mxu1 }
 0x10b   :  { %v101_v16 = vadd.f32 %v181_v14, %v100_v15 }
 0x10d   :  { %v104_v17 = vmax.f32 %v101_v16, 0.0 }
 0x10f   :  { %v110_v18 = vpack.c.bf16 %v104_v17, %v104_v17 }
 0x111   :  { %173 = vmatmul.msk.bf16.vlgmr.msra.gmra.mxu2 %vm49_vm0, %v110_v18 }
 0x112   :  { %v102_v19 = vpop.f32.mrf.mxu1 }
 0x194   :  { %v138_v21 = vpop.f32.mrf.mxu2 }
 0x195   :  { %v139_v22 = vadd.f32 %v182_v20, %v138_v21 }
 0x197   :  { %142 = vst [vmem:[%s266_s7] sm:$0xf] %v139_v22 }
 0x19c   :  { %v140_v23 = vpop.f32.mrf.mxu2 }

// kernel: run.19
= control target key start
LH: loop header
LB: loop body
LE: loop exit
PB: predicated region body
PF: predicated region fallthrough
CT: control target
= control target key end

     0   :  { %vm50_vm0 = vcmask 261120   ;;  %vm107_vm1 = vcmask 523264   ;;  %s336_s1 = inlined_call_operand.vmem [shape: bf16[32,64], index: 1, kind: input, shape index: {}]   ;;  %s337_s0 = inlined_call_operand.vmem [shape: f32[12,32], index: 0, kind: input, shape index: {}]   ;;  %s338_s2 = inlined_call_operand.vmem [shape: f32[1,64], index: 2, kind: input, shape index: {}]   ;;  %s339_s4 = inlined_call_operand.vmem [shape: f32[1,64], index: 4, kind: input, shape index: {}]   ;;  %s340_s3 = inlined_call_operand.vmem [shape: bf16[64,64], index: 3, kind: input, shape index: {}]   ;;  %s341_s6 = inlined_call_operand.vmem [shape: f32[1,128], index: 6, kind: input, shape index: {}]   ;;  %s342_s5 = inlined_call_operand.vmem [shape: bf16[64,128], index: 5, kind: input, shape index: {}]   ;;  %s343_s7 = inlined_call_operand.vmem [shape: f32[12,128], index: 7, kind: output, shape index: {}]  }
   0x1   :  { %v231_v0 = vld [vmem:[%s336_s1 + $0x8] sm:$0xff]  ;;  %v230_v1 = vld [vmem:[%s336_s1] sm:$0xff]  ;;  %v235_v5 = vld [vmem:[%s340_s3 + $0x18] sm:$0xff] }
   0x2   :  { %60 = vmatpush.bf16.msra.mxu0 %v231_v0  ;;  %v27_v2 = vld [vmem:[%s337_s0] sm:$0xff]  ;;  %v28_v3 = vld [vmem:[%s337_s0 + $0x8] sm:$0xf]  ;;  %115 = vmatpush.bf16.msra.mxu1 %v235_v5  ;;  %v234_v6 = vld [vmem:[%s340_s3 + $0x10] sm:$0xff] }
   0x3   :  { %v34_v4 = vpack.c.bf16 %v28_v3, %v27_v2  ;;  %v233_v7 = vld [vmem:[%s340_s3 + $0x8] sm:$0xff]  ;;  %v232_v8 = vld [vmem:[%s340_s3] sm:$0xff]  ;;  %v239_v17 = vld [vmem:[%s342_s5 + $0x18] sm:$0xff] }
   0x4   :  { %v240_v10 = vld [vmem:[%s338_s2] ss:$0 sm:$0xff]  ;;  %171 = vmatpush.bf16.msra.mxu2 %v239_v17  ;;  %v238_v18 = vld [vmem:[%s342_s5 + $0x10] sm:$0xff]  ;;  %v237_v19 = vld [vmem:[%s342_s5 + $0x8] sm:$0xff] }
   0x5   :  { %v236_v20 = vld [vmem:[%s342_s5] sm:$0xff] }
   0x6   :  { %61 = vmatpush.bf16.msra.mxu0 %v230_v1  ;;  %116 = vmatpush.bf16.msra.mxu1 %v234_v6  ;;  %v241_v22 = vld [vmem:[%s339_s4] ss:$0 sm:$0xff] }
   0x7   :  { %v242_v29 = vld [vmem:[%s341_s6] ss:$0 sm:$0xff] }
   0x8   :  { %172 = vmatpush.bf16.msra.mxu2 %v238_v18 }
   0x9   :  { %195 = vmatmul.msk.bf16.vlgmr.msra.gmra.mxu0 %vm50_vm0, %v34_v4 }
   0xa   :  { %117 = vmatpush.bf16.msra.mxu1 %v233_v7 }
   0xc   :  { %173 = vmatpush.bf16.msra.mxu2 %v237_v19 }
   0xe   :  { %118 = vmatpush.bf16.msra.mxu1 %v232_v8 }
  0x10   :  { %174 = vmatpush.bf16.msra.mxu2 %v236_v20 }
  0x86   :  { %v63_v9 = vpop.f32.mrf.mxu0 }
  0x87   :  { %v64_v11 = vadd.f32 %v240_v10, %v63_v9 }
  0x89   :  { %v68_v14 = vmax.f32 %v64_v11, 0.0 }
  0x8e   :  { %v65_v12 = vpop.f32.mrf.mxu0 }
  0x8f   :  { %v66_v13 = vadd.f32 %v240_v10, %v65_v12 }
  0x91   :  { %v69_v15 = vmax.f32 %v66_v13, 0.0 }
  0x93   :  { %v79_v16 = vpack.c.bf16 %v69_v15, %v68_v14 }
  0x95   :  { %212 = vmatmul.msk.bf16.vlgmr.msra.gmra.mxu1 %vm107_vm1, %v79_v16 }
 0x112   :  { %v120_v21 = vpop.f32.mrf.mxu1 }
 0x113   :  { %v121_v23 = vadd.f32 %v241_v22, %v120_v21 }
 0x115   :  { %v125_v26 = vmax.f32 %v121_v23, 0.0 }
 0x11a   :  { %v122_v24 = vpop.f32.mrf.mxu1 }
 0x11b   :  { %v123_v25 = vadd.f32 %v241_v22, %v122_v24 }
 0x11d   :  { %v126_v27 = vmax.f32 %v123_v25, 0.0 }
 0x11f   :  { %v136_v28 = vpack.c.bf16 %v126_v27, %v125_v26 }
 0x121   :  { %229 = vmatmul.msk.bf16.vlgmr.msra.gmra.mxu2 %vm107_vm1, %v136_v28 }
 0x1a4   :  { %v176_v30 = vpop.f32.mrf.mxu2 }
 0x1a5   :  { %v177_v31 = vadd.f32 %v242_v29, %v176_v30 }
 0x1a7   :  { %181 = vst [vmem:[%s343_s7] sm:$0xff] %v177_v31 }
 0x1ac   :  { %v178_v32 = vpop.f32.mrf.mxu2 }
 0x1ad   :  { %v179_v33 = vadd.f32 %v242_v29, %v178_v32 }
 0x1af   :  { %182 = vst [vmem:[%s343_s7 + $0x8] sm:$0xf] %v179_v33 }

</bundles_post_ra>
